<compile_context>
chip_gen: v5e
topology: v5e:2x2
jax: 0.10.0
libtpu: 0.0.40
codegen_flags: <defaults>
</compile_context>

<pallas_src>
import math

import jax
import jax.numpy as jnp
from jax.experimental import pallas as pl
from jax.experimental.pallas import tpu as pltpu

# ---- model hyper-parameters (small, consistent with the module __init__) ----
HIDDEN = 32                       # hidden_dim
NHEAD = 4
HEAD_DIM = HIDDEN // NHEAD
FFN = 64                          # dim_feedforward
FEATURE_SIZE = (4, 2)             # num_queries = 4*2 = SEQ
SEQ = FEATURE_SIZE[0] * FEATURE_SIZE[1]
BATCH = 2
NUM_ENC = 2                       # num_encoder_layers
NUM_DEC = 2                       # num_decoder_layers
EPS = 1e-5
T = SEQ * BATCH                   # flattened seq-major token count (t = s*B+b)
NEG_INF = -1e9

# ---- layout of the packed "vectors" slab: one (VEC_ROWS, 128) operand that
#      carries every bias, LayerNorm gamma/beta and the additive batch mask ----
ENC_VEC_ROWS = 8                  # qkv_b, out_b, b1, b2, g1, be1, g2, be2
DEC_VEC_ROWS = 12                 # sa_qkv_b, sa_out_b, ca_qkv_b, ca_out_b, b1, b2, g1..be3
DEC_VEC_BASE = NUM_ENC * ENC_VEC_ROWS
FINAL_NORM_ROW = DEC_VEC_BASE + NUM_DEC * DEC_VEC_ROWS   # gamma; +1 = beta
MASK_ROW = ((FINAL_NORM_ROW + 2 + 7) // 8) * 8
VEC_ROWS = ((MASK_ROW + T + 7) // 8) * 8


# =============================== kernel =====================================
def transformer_kernel(x_ref, pos_ref, vecs_ref, qkvw_ref, wow_ref,
                       w1_ref, w2_ref, tgt_ref, dec_out_ref, enc_out_ref):
    E, F, H, D = HIDDEN, FFN, NHEAD, HEAD_DIM
    f32 = jnp.float32

    pos = pos_ref[...]                                   # (T, E)
    mask = vecs_ref[MASK_ROW:MASK_ROW + T, 0:T]          # (T, T) additive batch mask

    def vec(row, n):                                     # (1, n) bias / LN row
        return vecs_ref[row:row + 1, 0:n]

    def layer_norm(z, g_row, b_row):
        mu = jnp.mean(z, axis=-1, keepdims=True)
        var = jnp.mean((z - mu) ** 2, axis=-1, keepdims=True)
        zn = (z - mu) * jax.lax.rsqrt(var + EPS)
        return zn * vec(g_row, E) + vec(b_row, E)

    def mha(q_src, kv_src, attn_idx, b_row, bo_row):
        # One fused input projection per attention block:
        #   [q_src | kv_src | pos] (T,3E) @ packed (3E,3E) -> [q*scale | k | v]
        # (1/sqrt(D) already folded into the q block of the weights/bias).
        packed = jnp.concatenate([q_src, kv_src, pos], axis=-1)          # (T, 3E)
        qkv = jnp.dot(packed, qkvw_ref[attn_idx],
                      preferred_element_type=f32) + vec(b_row, 3 * E)     # (T, 3E)
        heads = []
        for h in range(H):                               # static head loop
            q_h = qkv[:, h * D:(h + 1) * D]
            k_h = qkv[:, E + h * D:E + (h + 1) * D]
            v_h = qkv[:, 2 * E + h * D:2 * E + (h + 1) * D]
            # q @ k^T expressed as contraction on the last dims (no explicit .T)
            s = jnp.einsum("qd,kd->qk", q_h, k_h, preferred_element_type=f32)
            s = s + mask                                  # -1e9 across batches
            s = s - jnp.max(s, axis=-1, keepdims=True)
            e = jnp.exp(s)
            a = e * pl.reciprocal(jnp.sum(e, axis=-1, keepdims=True), approx=True)
            heads.append(jnp.dot(a, v_h, preferred_element_type=f32))
        # head concat fused back, single (T,E)@(E,E) output projection
        o = jnp.concatenate(heads, axis=-1)
        return jnp.dot(o, wow_ref[attn_idx],
                       preferred_element_type=f32) + vec(bo_row, E)

    def ffn(z, mlp_idx, b1_row, b2_row):
        h1 = jnp.dot(z, w1_ref[mlp_idx], preferred_element_type=f32) + vec(b1_row, F)
        h1 = jnp.maximum(h1, 0.0)                         # relu (dropout == id, eval)
        return jnp.dot(h1, w2_ref[mlp_idx], preferred_element_type=f32) + vec(b2_row, E)

    # ------------------------------ encoder ---------------------------------
    x = x_ref[...]                                        # (T, E) src (seq-major)
    for l in range(NUM_ENC):
        base = l * ENC_VEC_ROWS
        x = layer_norm(x + mha(x, x, l, base + 0, base + 1), base + 4, base + 5)
        x = layer_norm(x + ffn(x, l, base + 2, base + 3), base + 6, base + 7)
    memory = x
    enc_out_ref[...] = memory

    # ------------------------------ decoder ---------------------------------
    out = memory
    for l in range(NUM_DEC):
        base = DEC_VEC_BASE + l * DEC_VEC_ROWS
        tgt = tgt_ref[l]                                  # learned queries, pre-tiled
        # "self"-attn: q = tgt+pos, k = memory+pos, v = memory
        sa = mha(tgt, memory, NUM_ENC + 2 * l, base + 0, base + 1)
        tgt = layer_norm(tgt + sa, base + 6, base + 7)
        # cross-attn: q = tgt+pos, k = out+pos, v = out (out = prev decoder output)
        ca = mha(tgt, out, NUM_ENC + 2 * l + 1, base + 2, base + 3)
        tgt = layer_norm(tgt + ca, base + 8, base + 9)
        tgt = layer_norm(tgt + ffn(tgt, NUM_ENC + l, base + 4, base + 5),
                         base + 10, base + 11)
        out = tgt
    dec_out_ref[...] = layer_norm(out, FINAL_NORM_ROW, FINAL_NORM_ROW + 1)


# ====================== one-time host-side weight prep ======================
def _pack_qkv(in_w, in_b, scale):
    """Pack an nn.MultiheadAttention in_proj into a (3E,3E) block slab so that
    [q_src | kv_src | pos] @ slab = [ (q_src+pos)Wq*scale | (kv_src+pos)Wk | kv_src Wv ]."""
    E = HIDDEN
    wq = in_w[:E].T * scale
    wk = in_w[E:2 * E].T
    wv = in_w[2 * E:].T
    z = jnp.zeros((E, E), jnp.float32)
    w = jnp.concatenate([
        jnp.concatenate([wq, z, z], axis=1),       # q-source rows
        jnp.concatenate([z, wk, wv], axis=1),      # kv-source rows
        jnp.concatenate([wq, wk, z], axis=1),      # pos rows
    ], axis=0)
    b = jnp.concatenate([in_b[:E] * scale, in_b[E:2 * E], in_b[2 * E:]])
    return w.astype(jnp.float32), b.astype(jnp.float32)


def prepare_params(params):
    """One-time packing, hoisted OUT of the jitted per-call path: transposes,
    QKV fusion (+scale folding), per-role weight stacking and a single
    (VEC_ROWS,128) slab carrying all biases / LN params / the batch mask."""
    scale = 1.0 / math.sqrt(HEAD_DIM)
    vecs = jnp.zeros((VEC_ROWS, 128), jnp.float32)

    def put(v, row, val):
        val = jnp.asarray(val, jnp.float32).reshape(-1)
        return v.at[row, :val.shape[0]].set(val)

    qkv_w, wo_w, w1_w, w2_w, tgt_q = [], [], [], [], []

    for l, lp in enumerate(params["enc"]):
        w, b = _pack_qkv(lp["attn"]["in_w"], lp["attn"]["in_b"], scale)
        qkv_w.append(w)
        wo_w.append(lp["attn"]["out_w"].T)
        w1_w.append(lp["w1"].T)
        w2_w.append(lp["w2"].T)
        base = l * ENC_VEC_ROWS
        vecs = put(vecs, base + 0, b)
        vecs = put(vecs, base + 1, lp["attn"]["out_b"])
        vecs = put(vecs, base + 2, lp["b1"])
        vecs = put(vecs, base + 3, lp["b2"])
        vecs = put(vecs, base + 4, lp["ln1_g"])
        vecs = put(vecs, base + 5, lp["ln1_b"])
        vecs = put(vecs, base + 6, lp["ln2_g"])
        vecs = put(vecs, base + 7, lp["ln2_b"])

    for l, lp in enumerate(params["dec"]):
        w_sa, b_sa = _pack_qkv(lp["sa"]["in_w"], lp["sa"]["in_b"], scale)
        w_ca, b_ca = _pack_qkv(lp["ca"]["in_w"], lp["ca"]["in_b"], scale)
        qkv_w += [w_sa, w_ca]
        wo_w += [lp["sa"]["out_w"].T, lp["ca"]["out_w"].T]
        w1_w.append(lp["w1"].T)
        w2_w.append(lp["w2"].T)
        # learned queries, pre-tiled to the flat seq-major layout (t = s*B + b)
        tgt_q.append(jnp.repeat(lp["embed"], BATCH, axis=0))
        base = DEC_VEC_BASE + l * DEC_VEC_ROWS
        vecs = put(vecs, base + 0, b_sa)
        vecs = put(vecs, base + 1, lp["sa"]["out_b"])
        vecs = put(vecs, base + 2, b_ca)
        vecs = put(vecs, base + 3, lp["ca"]["out_b"])
        vecs = put(vecs, base + 4, lp["b1"])
        vecs = put(vecs, base + 5, lp["b2"])
        vecs = put(vecs, base + 6, lp["ln1_g"])
        vecs = put(vecs, base + 7, lp["ln1_b"])
        vecs = put(vecs, base + 8, lp["ln2_g"])
        vecs = put(vecs, base + 9, lp["ln2_b"])
        vecs = put(vecs, base + 10, lp["ln3_g"])
        vecs = put(vecs, base + 11, lp["ln3_b"])

    vecs = put(vecs, FINAL_NORM_ROW, params["dec_norm_g"])
    vecs = put(vecs, FINAL_NORM_ROW + 1, params["dec_norm_b"])

    # additive cross-batch mask for the flat token layout (0 within a batch,
    # -1e9 across batches -> exp==0 -> exact per-batch softmax without any
    # (S,B)<->(B,S) transpose).
    b_id = jnp.arange(T) % BATCH
    mask = jnp.where(b_id[:, None] == b_id[None, :], 0.0, NEG_INF).astype(jnp.float32)
    vecs = vecs.at[MASK_ROW:MASK_ROW + T, :T].set(mask)

    return (vecs,
            jnp.stack(qkv_w).astype(jnp.float32),
            jnp.stack(wo_w).astype(jnp.float32),
            jnp.stack(w1_w).astype(jnp.float32),
            jnp.stack(w2_w).astype(jnp.float32),
            jnp.stack(tgt_q).astype(jnp.float32))


# ================================ wrapper ====================================
@jax.jit
def transformer_forward(src, pos_embed, prepped):
    """src: (S, B, E), pos_embed: (S, E) -> (decoder_out, encoder_out), (S, B, E) each."""
    S, B, E = src.shape
    x = src.reshape(S * B, E)                     # seq-major flatten, NO transpose
    pos = jnp.repeat(pos_embed, B, axis=0)        # (S*B, E), row t = s*B + b

    vmem = pl.BlockSpec(memory_space=pltpu.MemorySpace.VMEM)
    dec_flat, enc_flat = pl.pallas_call(
        transformer_kernel,
        out_shape=(jax.ShapeDtypeStruct((S * B, E), jnp.float32),
                   jax.ShapeDtypeStruct((S * B, E), jnp.float32)),
        in_specs=[vmem] * (2 + len(prepped)),
        out_specs=(vmem, vmem),
    )(x, pos, *prepped)
    return dec_flat.reshape(S, B, E), enc_flat.reshape(S, B, E)


# ======================= pure-JAX reference (for check) =====================
def _ref_ln(z, g, b):
    mu = jnp.mean(z, axis=-1, keepdims=True)
    var = jnp.mean((z - mu) ** 2, axis=-1, keepdims=True)
    return (z - mu) / jnp.sqrt(var + EPS) * g + b


def _ref_mha(q_in, k_in, v_in, ap):
    E = HIDDEN
    in_w, in_b = ap["in_w"], ap["in_b"]
    q = q_in @ in_w[:E].T + in_b[:E]
    k = k_in @ in_w[E:2 * E].T + in_b[E:2 * E]
    v = v_in @ in_w[2 * E:].T + in_b[2 * E:]
    Lq, B, _ = q.shape
    Lk = k.shape[0]
    qh = q.reshape(Lq, B, NHEAD, HEAD_DIM)
    kh = k.reshape(Lk, B, NHEAD, HEAD_DIM)
    vh = v.reshape(Lk, B, NHEAD, HEAD_DIM)
    s = jnp.einsum("qbhd,kbhd->bhqk", qh, kh) / math.sqrt(HEAD_DIM)
    a = jax.nn.softmax(s, axis=-1)
    o = jnp.einsum("bhqk,kbhd->qbhd", a, vh).reshape(Lq, B, E)
    return o @ ap["out_w"].T + ap["out_b"]


def ref_transformer(src, pos_embed, params):
    S, B, E = src.shape
    pos = jnp.broadcast_to(pos_embed[:, None, :], (S, B, E))
    x = src
    for lp in params["enc"]:
        attn = _ref_mha(x + pos, x + pos, x, lp["attn"])
        x = _ref_ln(x + attn, lp["ln1_g"], lp["ln1_b"])
        h = jnp.maximum(x @ lp["w1"].T + lp["b1"], 0.0)
        x = _ref_ln(x + h @ lp["w2"].T + lp["b2"], lp["ln2_g"], lp["ln2_b"])
    memory = x
    out = memory
    for lp in params["dec"]:
        tgt = jnp.broadcast_to(lp["embed"][:, None, :], (S, B, E))
        sa = _ref_mha(tgt + pos, memory + pos, memory, lp["sa"])
        tgt = _ref_ln(tgt + sa, lp["ln1_g"], lp["ln1_b"])
        ca = _ref_mha(tgt + pos, out + pos, out, lp["ca"])
        tgt = _ref_ln(tgt + ca, lp["ln2_g"], lp["ln2_b"])
        h = jnp.maximum(tgt @ lp["w1"].T + lp["b1"], 0.0)
        tgt = _ref_ln(tgt + h @ lp["w2"].T + lp["b2"], lp["ln3_g"], lp["ln3_b"])
        out = tgt
    dec_out = _ref_ln(out, params["dec_norm_g"], params["dec_norm_b"])
    return dec_out, memory


# =============================== init & main ================================
def init_params(key):
    keys = iter(jax.random.split(key, 128))

    def dense(shape, s=0.15):
        return s * jax.random.normal(next(keys), shape, jnp.float32)

    def mha_p():
        return {"in_w": dense((3 * HIDDEN, HIDDEN)), "in_b": dense((3 * HIDDEN,)),
                "out_w": dense((HIDDEN, HIDDEN)), "out_b": dense((HIDDEN,))}

    def ln_p():
        return 1.0 + dense((HIDDEN,), 0.1), dense((HIDDEN,), 0.1)

    enc = []
    for _ in range(NUM_ENC):
        g1, b1 = ln_p()
        g2, b2 = ln_p()
        enc.append({"attn": mha_p(),
                    "w1": dense((FFN, HIDDEN)), "b1": dense((FFN,)),
                    "w2": dense((HIDDEN, FFN)), "b2": dense((HIDDEN,)),
                    "ln1_g": g1, "ln1_b": b1, "ln2_g": g2, "ln2_b": b2})
    dec = []
    for _ in range(NUM_DEC):
        g1, b1 = ln_p()
        g2, b2 = ln_p()
        g3, b3 = ln_p()
        dec.append({"embed": dense((SEQ, HIDDEN), 0.5),
                    "sa": mha_p(), "ca": mha_p(),
                    "w1": dense((FFN, HIDDEN)), "b1": dense((FFN,)),
                    "w2": dense((HIDDEN, FFN)), "b2": dense((HIDDEN,)),
                    "ln1_g": g1, "ln1_b": b1, "ln2_g": g2, "ln2_b": b2,
                    "ln3_g": g3, "ln3_b": b3})
    gN, bN = ln_p()
    return {"enc": enc, "dec": dec, "dec_norm_g": gN, "dec_norm_b": bN}


if __name__ == "__main__":
    root = jax.random.PRNGKey(0)
    k_params, k_src, k_pos = jax.random.split(root, 3)

    params = init_params(k_params)
    prepped = prepare_params(params)          # one-time host-side packing

    src = jax.random.normal(k_src, (SEQ, BATCH, HIDDEN), jnp.float32)
    pos_embed = jax.random.normal(k_pos, (SEQ, HIDDEN), jnp.float32)

    dec_out, enc_out = transformer_forward(src, pos_embed, prepped)
    dec_out = jax.block_until_ready(dec_out)
    enc_out = jax.block_until_ready(enc_out)

    with jax.default_matmul_precision("highest"):
        ref_dec, ref_enc = ref_transformer(src, pos_embed, params)

    assert dec_out.shape == (SEQ, BATCH, HIDDEN)
    assert enc_out.shape == (SEQ, BATCH, HIDDEN)
    # f32 everywhere; tolerance set by the approximate (EUP) softmax reciprocal.
    assert jnp.allclose(enc_out, ref_enc, atol=5e-3, rtol=5e-3), "encoder mismatch"
    assert jnp.allclose(dec_out, ref_dec, atol=5e-3, rtol=5e-3), "decoder mismatch"

    print("KERNEL_OK")
</pallas_src>

<mosaic_0001>
module attributes {stable_mosaic.version = 11 : i64} {
  func.func @transformer_kernel(%arg0: memref<16x32xf32, #tpu.memory_space<vmem>>, %arg1: memref<16x32xf32, #tpu.memory_space<vmem>>, %arg2: memref<64x128xf32, #tpu.memory_space<vmem>>, %arg3: memref<6x96x96xf32, #tpu.memory_space<vmem>>, %arg4: memref<6x32x32xf32, #tpu.memory_space<vmem>>, %arg5: memref<4x32x64xf32, #tpu.memory_space<vmem>>, %arg6: memref<4x64x32xf32, #tpu.memory_space<vmem>>, %arg7: memref<2x16x32xf32, #tpu.memory_space<vmem>>, %arg8: memref<16x32xf32, #tpu.memory_space<vmem>>, %arg9: memref<16x32xf32, #tpu.memory_space<vmem>>) attributes {dimension_semantics = [], scalar_prefetch = 0 : i64, scratch_operands = 0 : i64, tpu.core_type = #tpu.core_type<tc>} {
    %c0 = arith.constant 0 : index
    %c0_0 = arith.constant 0 : index
    %0 = vector.load %arg1[%c0, %c0_0] : memref<16x32xf32, #tpu.memory_space<vmem>>, vector<16x32xf32>
    %c48 = arith.constant 48 : index
    %c0_1 = arith.constant 0 : index
    %1 = vector.load %arg2[%c48, %c0_1] : memref<64x128xf32, #tpu.memory_space<vmem>>, vector<16x16xf32>
    %c0_2 = arith.constant 0 : index
    %c0_3 = arith.constant 0 : index
    %2 = vector.load %arg0[%c0_2, %c0_3] : memref<16x32xf32, #tpu.memory_space<vmem>>, vector<16x32xf32>
    %3 = tpu.concatenate %2, %2, %0 in 1 : vector<16x32xf32>, vector<16x32xf32>, vector<16x32xf32> -> vector<16x96xf32>
    %c0_4 = arith.constant 0 : index
    %c0_5 = arith.constant 0 : index
    %c0_6 = arith.constant 0 : index
    %4 = vector.load %arg3[%c0_4, %c0_5, %c0_6] : memref<6x96x96xf32, #tpu.memory_space<vmem>>, vector<1x96x96xf32>
    %5 = vector.shape_cast %4 : vector<1x96x96xf32> to vector<96x96xf32>
    %cst = arith.constant dense<0.000000e+00> : vector<16x96xf32>
    %6 = tpu.matmul %3, %5, %cst {dimension_numbers = #tpu.dot_dimension_numbers<[1], [0], [0], [1], [0, 0, 1, 1], [], []>} : vector<16x96xf32>, vector<96x96xf32>, vector<16x96xf32> -> vector<16x96xf32>
    %c0_7 = arith.constant 0 : index
    %c0_8 = arith.constant 0 : index
    %7 = vector.load %arg2[%c0_7, %c0_8] : memref<64x128xf32, #tpu.memory_space<vmem>>, vector<1x96xf32>
    %8 = vector.broadcast %7 : vector<1x96xf32> to vector<16x96xf32>
    %9 = arith.addf %6, %8 : vector<16x96xf32>
    %10 = vector.extract_strided_slice %9 {offsets = [0, 0], sizes = [16, 8], strides = [1, 1]} : vector<16x96xf32> to vector<16x8xf32>
    %11 = vector.extract_strided_slice %9 {offsets = [0, 32], sizes = [16, 8], strides = [1, 1]} : vector<16x96xf32> to vector<16x8xf32>
    %12 = vector.extract_strided_slice %9 {offsets = [0, 64], sizes = [16, 8], strides = [1, 1]} : vector<16x96xf32> to vector<16x8xf32>
    "tpu.trace_start"() <{level = 10 : i32, message = "qd,kd->qk"}> : () -> ()
    %cst_9 = arith.constant dense<0.000000e+00> : vector<16x16xf32>
    %13 = tpu.matmul %10, %11, %cst_9 {dimension_numbers = #tpu.dot_dimension_numbers<[1], [1], [0], [0], [0, 0, 1, 0], [], []>} : vector<16x8xf32>, vector<16x8xf32>, vector<16x16xf32> -> vector<16x16xf32>
    "tpu.trace_stop"() : () -> ()
    %14 = arith.addf %13, %1 : vector<16x16xf32>
    %cst_10 = arith.constant dense<0xFF800000> : vector<16xf32>
    %15 = vector.multi_reduction <maximumf>, %14, %cst_10 [1] : vector<16x16xf32> to vector<16xf32>
    %16 = vector.shape_cast %15 : vector<16xf32> to vector<16x1xf32>
    %17 = vector.broadcast %16 : vector<16x1xf32> to vector<16x16xf32>
    %18 = arith.subf %14, %17 : vector<16x16xf32>
    %19 = math.exp %18 : vector<16x16xf32>
    %cst_11 = arith.constant dense<0.000000e+00> : vector<16xf32>
    %20 = vector.multi_reduction <add>, %19, %cst_11 [1] : vector<16x16xf32> to vector<16xf32>
    %21 = vector.shape_cast %20 : vector<16xf32> to vector<16x1xf32>
    %22 = tpu.reciprocal %21 {approx = true} : vector<16x1xf32> -> vector<16x1xf32>
    %23 = vector.broadcast %22 : vector<16x1xf32> to vector<16x16xf32>
    %24 = arith.mulf %19, %23 : vector<16x16xf32>
    %cst_12 = arith.constant dense<0.000000e+00> : vector<16x8xf32>
    %25 = tpu.matmul %24, %12, %cst_12 {dimension_numbers = #tpu.dot_dimension_numbers<[1], [0], [0], [1], [0, 0, 1, 1], [], []>} : vector<16x16xf32>, vector<16x8xf32>, vector<16x8xf32> -> vector<16x8xf32>
    %26 = vector.extract_strided_slice %9 {offsets = [0, 8], sizes = [16, 8], strides = [1, 1]} : vector<16x96xf32> to vector<16x8xf32>
    %27 = vector.extract_strided_slice %9 {offsets = [0, 40], sizes = [16, 8], strides = [1, 1]} : vector<16x96xf32> to vector<16x8xf32>
    %28 = vector.extract_strided_slice %9 {offsets = [0, 72], sizes = [16, 8], strides = [1, 1]} : vector<16x96xf32> to vector<16x8xf32>
    "tpu.trace_start"() <{level = 10 : i32, message = "qd,kd->qk"}> : () -> ()
    %cst_13 = arith.constant dense<0.000000e+00> : vector<16x16xf32>
    %29 = tpu.matmul %26, %27, %cst_13 {dimension_numbers = #tpu.dot_dimension_numbers<[1], [1], [0], [0], [0, 0, 1, 0], [], []>} : vector<16x8xf32>, vector<16x8xf32>, vector<16x16xf32> -> vector<16x16xf32>
    "tpu.trace_stop"() : () -> ()
    %30 = arith.addf %29, %1 : vector<16x16xf32>
    %cst_14 = arith.constant dense<0xFF800000> : vector<16xf32>
    %31 = vector.multi_reduction <maximumf>, %30, %cst_14 [1] : vector<16x16xf32> to vector<16xf32>
    %32 = vector.shape_cast %31 : vector<16xf32> to vector<16x1xf32>
    %33 = vector.broadcast %32 : vector<16x1xf32> to vector<16x16xf32>
    %34 = arith.subf %30, %33 : vector<16x16xf32>
    %35 = math.exp %34 : vector<16x16xf32>
    %cst_15 = arith.constant dense<0.000000e+00> : vector<16xf32>
    %36 = vector.multi_reduction <add>, %35, %cst_15 [1] : vector<16x16xf32> to vector<16xf32>
    %37 = vector.shape_cast %36 : vector<16xf32> to vector<16x1xf32>
    %38 = tpu.reciprocal %37 {approx = true} : vector<16x1xf32> -> vector<16x1xf32>
    %39 = vector.broadcast %38 : vector<16x1xf32> to vector<16x16xf32>
    %40 = arith.mulf %35, %39 : vector<16x16xf32>
    %cst_16 = arith.constant dense<0.000000e+00> : vector<16x8xf32>
    %41 = tpu.matmul %40, %28, %cst_16 {dimension_numbers = #tpu.dot_dimension_numbers<[1], [0], [0], [1], [0, 0, 1, 1], [], []>} : vector<16x16xf32>, vector<16x8xf32>, vector<16x8xf32> -> vector<16x8xf32>
    %42 = vector.extract_strided_slice %9 {offsets = [0, 16], sizes = [16, 8], strides = [1, 1]} : vector<16x96xf32> to vector<16x8xf32>
    %43 = vector.extract_strided_slice %9 {offsets = [0, 48], sizes = [16, 8], strides = [1, 1]} : vector<16x96xf32> to vector<16x8xf32>
    %44 = vector.extract_strided_slice %9 {offsets = [0, 80], sizes = [16, 8], strides = [1, 1]} : vector<16x96xf32> to vector<16x8xf32>
    "tpu.trace_start"() <{level = 10 : i32, message = "qd,kd->qk"}> : () -> ()
    %cst_17 = arith.constant dense<0.000000e+00> : vector<16x16xf32>
    %45 = tpu.matmul %42, %43, %cst_17 {dimension_numbers = #tpu.dot_dimension_numbers<[1], [1], [0], [0], [0, 0, 1, 0], [], []>} : vector<16x8xf32>, vector<16x8xf32>, vector<16x16xf32> -> vector<16x16xf32>
    "tpu.trace_stop"() : () -> ()
    %46 = arith.addf %45, %1 : vector<16x16xf32>
    %cst_18 = arith.constant dense<0xFF800000> : vector<16xf32>
    %47 = vector.multi_reduction <maximumf>, %46, %cst_18 [1] : vector<16x16xf32> to vector<16xf32>
    %48 = vector.shape_cast %47 : vector<16xf32> to vector<16x1xf32>
    %49 = vector.broadcast %48 : vector<16x1xf32> to vector<16x16xf32>
    %50 = arith.subf %46, %49 : vector<16x16xf32>
    %51 = math.exp %50 : vector<16x16xf32>
    %cst_19 = arith.constant dense<0.000000e+00> : vector<16xf32>
    %52 = vector.multi_reduction <add>, %51, %cst_19 [1] : vector<16x16xf32> to vector<16xf32>
    %53 = vector.shape_cast %52 : vector<16xf32> to vector<16x1xf32>
    %54 = tpu.reciprocal %53 {approx = true} : vector<16x1xf32> -> vector<16x1xf32>
    %55 = vector.broadcast %54 : vector<16x1xf32> to vector<16x16xf32>
    %56 = arith.mulf %51, %55 : vector<16x16xf32>
    %cst_20 = arith.constant dense<0.000000e+00> : vector<16x8xf32>
    %57 = tpu.matmul %56, %44, %cst_20 {dimension_numbers = #tpu.dot_dimension_numbers<[1], [0], [0], [1], [0, 0, 1, 1], [], []>} : vector<16x16xf32>, vector<16x8xf32>, vector<16x8xf32> -> vector<16x8xf32>
    %58 = vector.extract_strided_slice %9 {offsets = [0, 24], sizes = [16, 8], strides = [1, 1]} : vector<16x96xf32> to vector<16x8xf32>
    %59 = vector.extract_strided_slice %9 {offsets = [0, 56], sizes = [16, 8], strides = [1, 1]} : vector<16x96xf32> to vector<16x8xf32>
    %60 = vector.extract_strided_slice %9 {offsets = [0, 88], sizes = [16, 8], strides = [1, 1]} : vector<16x96xf32> to vector<16x8xf32>
    "tpu.trace_start"() <{level = 10 : i32, message = "qd,kd->qk"}> : () -> ()
    %cst_21 = arith.constant dense<0.000000e+00> : vector<16x16xf32>
    %61 = tpu.matmul %58, %59, %cst_21 {dimension_numbers = #tpu.dot_dimension_numbers<[1], [1], [0], [0], [0, 0, 1, 0], [], []>} : vector<16x8xf32>, vector<16x8xf32>, vector<16x16xf32> -> vector<16x16xf32>
    "tpu.trace_stop"() : () -> ()
    %62 = arith.addf %61, %1 : vector<16x16xf32>
    %cst_22 = arith.constant dense<0xFF800000> : vector<16xf32>
    %63 = vector.multi_reduction <maximumf>, %62, %cst_22 [1] : vector<16x16xf32> to vector<16xf32>
    %64 = vector.shape_cast %63 : vector<16xf32> to vector<16x1xf32>
    %65 = vector.broadcast %64 : vector<16x1xf32> to vector<16x16xf32>
    %66 = arith.subf %62, %65 : vector<16x16xf32>
    %67 = math.exp %66 : vector<16x16xf32>
    %cst_23 = arith.constant dense<0.000000e+00> : vector<16xf32>
    %68 = vector.multi_reduction <add>, %67, %cst_23 [1] : vector<16x16xf32> to vector<16xf32>
    %69 = vector.shape_cast %68 : vector<16xf32> to vector<16x1xf32>
    %70 = tpu.reciprocal %69 {approx = true} : vector<16x1xf32> -> vector<16x1xf32>
    %71 = vector.broadcast %70 : vector<16x1xf32> to vector<16x16xf32>
    %72 = arith.mulf %67, %71 : vector<16x16xf32>
    %cst_24 = arith.constant dense<0.000000e+00> : vector<16x8xf32>
    %73 = tpu.matmul %72, %60, %cst_24 {dimension_numbers = #tpu.dot_dimension_numbers<[1], [0], [0], [1], [0, 0, 1, 1], [], []>} : vector<16x16xf32>, vector<16x8xf32>, vector<16x8xf32> -> vector<16x8xf32>
    %74 = tpu.concatenate %25, %41, %57, %73 in 1 : vector<16x8xf32>, vector<16x8xf32>, vector<16x8xf32>, vector<16x8xf32> -> vector<16x32xf32>
    %c0_25 = arith.constant 0 : index
    %c0_26 = arith.constant 0 : index
    %c0_27 = arith.constant 0 : index
    %75 = vector.load %arg4[%c0_25, %c0_26, %c0_27] : memref<6x32x32xf32, #tpu.memory_space<vmem>>, vector<1x32x32xf32>
    %76 = vector.shape_cast %75 : vector<1x32x32xf32> to vector<32x32xf32>
    %cst_28 = arith.constant dense<0.000000e+00> : vector<16x32xf32>
    %77 = tpu.matmul %74, %76, %cst_28 {dimension_numbers = #tpu.dot_dimension_numbers<[1], [0], [0], [1], [0, 0, 1, 1], [], []>} : vector<16x32xf32>, vector<32x32xf32>, vector<16x32xf32> -> vector<16x32xf32>
    %c1 = arith.constant 1 : index
    %c0_29 = arith.constant 0 : index
    %78 = vector.load %arg2[%c1, %c0_29] : memref<64x128xf32, #tpu.memory_space<vmem>>, vector<1x32xf32>
    %79 = vector.broadcast %78 : vector<1x32xf32> to vector<16x32xf32>
    %80 = arith.addf %77, %79 : vector<16x32xf32>
    %81 = arith.addf %2, %80 : vector<16x32xf32>
    %cst_30 = arith.constant dense<0.000000e+00> : vector<16xf32>
    %82 = vector.multi_reduction <add>, %81, %cst_30 [1] : vector<16x32xf32> to vector<16xf32>
    %83 = vector.shape_cast %82 : vector<16xf32> to vector<16x1xf32>
    %cst_31 = arith.constant 3.200000e+01 : f32
    %84 = vector.broadcast %cst_31 : f32 to vector<16x1xf32>
    %85 = arith.divf %83, %84 : vector<16x1xf32>
    %86 = vector.broadcast %85 : vector<16x1xf32> to vector<16x32xf32>
    %87 = arith.subf %81, %86 : vector<16x32xf32>
    %88 = arith.mulf %87, %87 : vector<16x32xf32>
    %cst_32 = arith.constant dense<0.000000e+00> : vector<16xf32>
    %89 = vector.multi_reduction <add>, %88, %cst_32 [1] : vector<16x32xf32> to vector<16xf32>
    %90 = vector.shape_cast %89 : vector<16xf32> to vector<16x1xf32>
    %cst_33 = arith.constant 3.200000e+01 : f32
    %91 = vector.broadcast %cst_33 : f32 to vector<16x1xf32>
    %92 = arith.divf %90, %91 : vector<16x1xf32>
    %93 = vector.broadcast %85 : vector<16x1xf32> to vector<16x32xf32>
    %94 = arith.subf %81, %93 : vector<16x32xf32>
    %cst_34 = arith.constant 9.99999974E-6 : f32
    %95 = vector.broadcast %cst_34 : f32 to vector<16x1xf32>
    %96 = arith.addf %92, %95 : vector<16x1xf32>
    %97 = math.rsqrt %96 : vector<16x1xf32>
    %98 = vector.broadcast %97 : vector<16x1xf32> to vector<16x32xf32>
    %99 = arith.mulf %94, %98 : vector<16x32xf32>
    %c4 = arith.constant 4 : index
    %c0_35 = arith.constant 0 : index
    %100 = vector.load %arg2[%c4, %c0_35] : memref<64x128xf32, #tpu.memory_space<vmem>>, vector<1x32xf32>
    %101 = vector.broadcast %100 : vector<1x32xf32> to vector<16x32xf32>
    %102 = arith.mulf %99, %101 : vector<16x32xf32>
    %c5 = arith.constant 5 : index
    %c0_36 = arith.constant 0 : index
    %103 = vector.load %arg2[%c5, %c0_36] : memref<64x128xf32, #tpu.memory_space<vmem>>, vector<1x32xf32>
    %104 = vector.broadcast %103 : vector<1x32xf32> to vector<16x32xf32>
    %105 = arith.addf %102, %104 : vector<16x32xf32>
    %c0_37 = arith.constant 0 : index
    %c0_38 = arith.constant 0 : index
    %c0_39 = arith.constant 0 : index
    %106 = vector.load %arg5[%c0_37, %c0_38, %c0_39] : memref<4x32x64xf32, #tpu.memory_space<vmem>>, vector<1x32x64xf32>
    %107 = vector.shape_cast %106 : vector<1x32x64xf32> to vector<32x64xf32>
    %cst_40 = arith.constant dense<0.000000e+00> : vector<16x64xf32>
    %108 = tpu.matmul %105, %107, %cst_40 {dimension_numbers = #tpu.dot_dimension_numbers<[1], [0], [0], [1], [0, 0, 1, 1], [], []>} : vector<16x32xf32>, vector<32x64xf32>, vector<16x64xf32> -> vector<16x64xf32>
    %c2 = arith.constant 2 : index
    %c0_41 = arith.constant 0 : index
    %109 = vector.load %arg2[%c2, %c0_41] : memref<64x128xf32, #tpu.memory_space<vmem>>, vector<1x64xf32>
    %110 = vector.broadcast %109 : vector<1x64xf32> to vector<16x64xf32>
    %111 = arith.addf %108, %110 : vector<16x64xf32>
    %cst_42 = arith.constant 0.000000e+00 : f32
    %112 = vector.broadcast %cst_42 : f32 to vector<16x64xf32>
    %113 = arith.maximumf %111, %112 : vector<16x64xf32>
    %c0_43 = arith.constant 0 : index
    %c0_44 = arith.constant 0 : index
    %c0_45 = arith.constant 0 : index
    %114 = vector.load %arg6[%c0_43, %c0_44, %c0_45] : memref<4x64x32xf32, #tpu.memory_space<vmem>>, vector<1x64x32xf32>
    %115 = vector.shape_cast %114 : vector<1x64x32xf32> to vector<64x32xf32>
    %cst_46 = arith.constant dense<0.000000e+00> : vector<16x32xf32>
    %116 = tpu.matmul %113, %115, %cst_46 {dimension_numbers = #tpu.dot_dimension_numbers<[1], [0], [0], [1], [0, 0, 1, 1], [], []>} : vector<16x64xf32>, vector<64x32xf32>, vector<16x32xf32> -> vector<16x32xf32>
    %c3 = arith.constant 3 : index
    %c0_47 = arith.constant 0 : index
    %117 = vector.load %arg2[%c3, %c0_47] : memref<64x128xf32, #tpu.memory_space<vmem>>, vector<1x32xf32>
    %118 = vector.broadcast %117 : vector<1x32xf32> to vector<16x32xf32>
    %119 = arith.addf %116, %118 : vector<16x32xf32>
    %120 = arith.addf %105, %119 : vector<16x32xf32>
    %cst_48 = arith.constant dense<0.000000e+00> : vector<16xf32>
    %121 = vector.multi_reduction <add>, %120, %cst_48 [1] : vector<16x32xf32> to vector<16xf32>
    %122 = vector.shape_cast %121 : vector<16xf32> to vector<16x1xf32>
    %cst_49 = arith.constant 3.200000e+01 : f32
    %123 = vector.broadcast %cst_49 : f32 to vector<16x1xf32>
    %124 = arith.divf %122, %123 : vector<16x1xf32>
    %125 = vector.broadcast %124 : vector<16x1xf32> to vector<16x32xf32>
    %126 = arith.subf %120, %125 : vector<16x32xf32>
    %127 = arith.mulf %126, %126 : vector<16x32xf32>
    %cst_50 = arith.constant dense<0.000000e+00> : vector<16xf32>
    %128 = vector.multi_reduction <add>, %127, %cst_50 [1] : vector<16x32xf32> to vector<16xf32>
    %129 = vector.shape_cast %128 : vector<16xf32> to vector<16x1xf32>
    %cst_51 = arith.constant 3.200000e+01 : f32
    %130 = vector.broadcast %cst_51 : f32 to vector<16x1xf32>
    %131 = arith.divf %129, %130 : vector<16x1xf32>
    %132 = vector.broadcast %124 : vector<16x1xf32> to vector<16x32xf32>
    %133 = arith.subf %120, %132 : vector<16x32xf32>
    %cst_52 = arith.constant 9.99999974E-6 : f32
    %134 = vector.broadcast %cst_52 : f32 to vector<16x1xf32>
    %135 = arith.addf %131, %134 : vector<16x1xf32>
    %136 = math.rsqrt %135 : vector<16x1xf32>
    %137 = vector.broadcast %136 : vector<16x1xf32> to vector<16x32xf32>
    %138 = arith.mulf %133, %137 : vector<16x32xf32>
    %c6 = arith.constant 6 : index
    %c0_53 = arith.constant 0 : index
    %139 = vector.load %arg2[%c6, %c0_53] : memref<64x128xf32, #tpu.memory_space<vmem>>, vector<1x32xf32>
    %140 = vector.broadcast %139 : vector<1x32xf32> to vector<16x32xf32>
    %141 = arith.mulf %138, %140 : vector<16x32xf32>
    %c7 = arith.constant 7 : index
    %c0_54 = arith.constant 0 : index
    %142 = vector.load %arg2[%c7, %c0_54] : memref<64x128xf32, #tpu.memory_space<vmem>>, vector<1x32xf32>
    %143 = vector.broadcast %142 : vector<1x32xf32> to vector<16x32xf32>
    %144 = arith.addf %141, %143 : vector<16x32xf32>
    %145 = tpu.concatenate %144, %144, %0 in 1 : vector<16x32xf32>, vector<16x32xf32>, vector<16x32xf32> -> vector<16x96xf32>
    %c1_55 = arith.constant 1 : index
    %c0_56 = arith.constant 0 : index
    %c0_57 = arith.constant 0 : index
    %146 = vector.load %arg3[%c1_55, %c0_56, %c0_57] : memref<6x96x96xf32, #tpu.memory_space<vmem>>, vector<1x96x96xf32>
    %147 = vector.shape_cast %146 : vector<1x96x96xf32> to vector<96x96xf32>
    %cst_58 = arith.constant dense<0.000000e+00> : vector<16x96xf32>
    %148 = tpu.matmul %145, %147, %cst_58 {dimension_numbers = #tpu.dot_dimension_numbers<[1], [0], [0], [1], [0, 0, 1, 1], [], []>} : vector<16x96xf32>, vector<96x96xf32>, vector<16x96xf32> -> vector<16x96xf32>
    %c8 = arith.constant 8 : index
    %c0_59 = arith.constant 0 : index
    %149 = vector.load %arg2[%c8, %c0_59] : memref<64x128xf32, #tpu.memory_space<vmem>>, vector<1x96xf32>
    %150 = vector.broadcast %149 : vector<1x96xf32> to vector<16x96xf32>
    %151 = arith.addf %148, %150 : vector<16x96xf32>
    %152 = vector.extract_strided_slice %151 {offsets = [0, 0], sizes = [16, 8], strides = [1, 1]} : vector<16x96xf32> to vector<16x8xf32>
    %153 = vector.extract_strided_slice %151 {offsets = [0, 32], sizes = [16, 8], strides = [1, 1]} : vector<16x96xf32> to vector<16x8xf32>
    %154 = vector.extract_strided_slice %151 {offsets = [0, 64], sizes = [16, 8], strides = [1, 1]} : vector<16x96xf32> to vector<16x8xf32>
    "tpu.trace_start"() <{level = 10 : i32, message = "qd,kd->qk"}> : () -> ()
    %cst_60 = arith.constant dense<0.000000e+00> : vector<16x16xf32>
    %155 = tpu.matmul %152, %153, %cst_60 {dimension_numbers = #tpu.dot_dimension_numbers<[1], [1], [0], [0], [0, 0, 1, 0], [], []>} : vector<16x8xf32>, vector<16x8xf32>, vector<16x16xf32> -> vector<16x16xf32>
    "tpu.trace_stop"() : () -> ()
    %156 = arith.addf %155, %1 : vector<16x16xf32>
    %cst_61 = arith.constant dense<0xFF800000> : vector<16xf32>
    %157 = vector.multi_reduction <maximumf>, %156, %cst_61 [1] : vector<16x16xf32> to vector<16xf32>
    %158 = vector.shape_cast %157 : vector<16xf32> to vector<16x1xf32>
    %159 = vector.broadcast %158 : vector<16x1xf32> to vector<16x16xf32>
    %160 = arith.subf %156, %159 : vector<16x16xf32>
    %161 = math.exp %160 : vector<16x16xf32>
    %cst_62 = arith.constant dense<0.000000e+00> : vector<16xf32>
    %162 = vector.multi_reduction <add>, %161, %cst_62 [1] : vector<16x16xf32> to vector<16xf32>
    %163 = vector.shape_cast %162 : vector<16xf32> to vector<16x1xf32>
    %164 = tpu.reciprocal %163 {approx = true} : vector<16x1xf32> -> vector<16x1xf32>
    %165 = vector.broadcast %164 : vector<16x1xf32> to vector<16x16xf32>
    %166 = arith.mulf %161, %165 : vector<16x16xf32>
    %cst_63 = arith.constant dense<0.000000e+00> : vector<16x8xf32>
    %167 = tpu.matmul %166, %154, %cst_63 {dimension_numbers = #tpu.dot_dimension_numbers<[1], [0], [0], [1], [0, 0, 1, 1], [], []>} : vector<16x16xf32>, vector<16x8xf32>, vector<16x8xf32> -> vector<16x8xf32>
    %168 = vector.extract_strided_slice %151 {offsets = [0, 8], sizes = [16, 8], strides = [1, 1]} : vector<16x96xf32> to vector<16x8xf32>
    %169 = vector.extract_strided_slice %151 {offsets = [0, 40], sizes = [16, 8], strides = [1, 1]} : vector<16x96xf32> to vector<16x8xf32>
    %170 = vector.extract_strided_slice %151 {offsets = [0, 72], sizes = [16, 8], strides = [1, 1]} : vector<16x96xf32> to vector<16x8xf32>
    "tpu.trace_start"() <{level = 10 : i32, message = "qd,kd->qk"}> : () -> ()
    %cst_64 = arith.constant dense<0.000000e+00> : vector<16x16xf32>
    %171 = tpu.matmul %168, %169, %cst_64 {dimension_numbers = #tpu.dot_dimension_numbers<[1], [1], [0], [0], [0, 0, 1, 0], [], []>} : vector<16x8xf32>, vector<16x8xf32>, vector<16x16xf32> -> vector<16x16xf32>
    "tpu.trace_stop"() : () -> ()
    %172 = arith.addf %171, %1 : vector<16x16xf32>
    %cst_65 = arith.constant dense<0xFF800000> : vector<16xf32>
    %173 = vector.multi_reduction <maximumf>, %172, %cst_65 [1] : vector<16x16xf32> to vector<16xf32>
    %174 = vector.shape_cast %173 : vector<16xf32> to vector<16x1xf32>
    %175 = vector.broadcast %174 : vector<16x1xf32> to vector<16x16xf32>
    %176 = arith.subf %172, %175 : vector<16x16xf32>
    %177 = math.exp %176 : vector<16x16xf32>
    %cst_66 = arith.constant dense<0.000000e+00> : vector<16xf32>
    %178 = vector.multi_reduction <add>, %177, %cst_66 [1] : vector<16x16xf32> to vector<16xf32>
    %179 = vector.shape_cast %178 : vector<16xf32> to vector<16x1xf32>
    %180 = tpu.reciprocal %179 {approx = true} : vector<16x1xf32> -> vector<16x1xf32>
    %181 = vector.broadcast %180 : vector<16x1xf32> to vector<16x16xf32>
    %182 = arith.mulf %177, %181 : vector<16x16xf32>
    %cst_67 = arith.constant dense<0.000000e+00> : vector<16x8xf32>
    %183 = tpu.matmul %182, %170, %cst_67 {dimension_numbers = #tpu.dot_dimension_numbers<[1], [0], [0], [1], [0, 0, 1, 1], [], []>} : vector<16x16xf32>, vector<16x8xf32>, vector<16x8xf32> -> vector<16x8xf32>
    %184 = vector.extract_strided_slice %151 {offsets = [0, 16], sizes = [16, 8], strides = [1, 1]} : vector<16x96xf32> to vector<16x8xf32>
    %185 = vector.extract_strided_slice %151 {offsets = [0, 48], sizes = [16, 8], strides = [1, 1]} : vector<16x96xf32> to vector<16x8xf32>
    %186 = vector.extract_strided_slice %151 {offsets = [0, 80], sizes = [16, 8], strides = [1, 1]} : vector<16x96xf32> to vector<16x8xf32>
    "tpu.trace_start"() <{level = 10 : i32, message = "qd,kd->qk"}> : () -> ()
    %cst_68 = arith.constant dense<0.000000e+00> : vector<16x16xf32>
    %187 = tpu.matmul %184, %185, %cst_68 {dimension_numbers = #tpu.dot_dimension_numbers<[1], [1], [0], [0], [0, 0, 1, 0], [], []>} : vector<16x8xf32>, vector<16x8xf32>, vector<16x16xf32> -> vector<16x16xf32>
    "tpu.trace_stop"() : () -> ()
    %188 = arith.addf %187, %1 : vector<16x16xf32>
    %cst_69 = arith.constant dense<0xFF800000> : vector<16xf32>
    %189 = vector.multi_reduction <maximumf>, %188, %cst_69 [1] : vector<16x16xf32> to vector<16xf32>
    %190 = vector.shape_cast %189 : vector<16xf32> to vector<16x1xf32>
    %191 = vector.broadcast %190 : vector<16x1xf32> to vector<16x16xf32>
    %192 = arith.subf %188, %191 : vector<16x16xf32>
    %193 = math.exp %192 : vector<16x16xf32>
    %cst_70 = arith.constant dense<0.000000e+00> : vector<16xf32>
    %194 = vector.multi_reduction <add>, %193, %cst_70 [1] : vector<16x16xf32> to vector<16xf32>
    %195 = vector.shape_cast %194 : vector<16xf32> to vector<16x1xf32>
    %196 = tpu.reciprocal %195 {approx = true} : vector<16x1xf32> -> vector<16x1xf32>
    %197 = vector.broadcast %196 : vector<16x1xf32> to vector<16x16xf32>
    %198 = arith.mulf %193, %197 : vector<16x16xf32>
    %cst_71 = arith.constant dense<0.000000e+00> : vector<16x8xf32>
    %199 = tpu.matmul %198, %186, %cst_71 {dimension_numbers = #tpu.dot_dimension_numbers<[1], [0], [0], [1], [0, 0, 1, 1], [], []>} : vector<16x16xf32>, vector<16x8xf32>, vector<16x8xf32> -> vector<16x8xf32>
    %200 = vector.extract_strided_slice %151 {offsets = [0, 24], sizes = [16, 8], strides = [1, 1]} : vector<16x96xf32> to vector<16x8xf32>
    %201 = vector.extract_strided_slice %151 {offsets = [0, 56], sizes = [16, 8], strides = [1, 1]} : vector<16x96xf32> to vector<16x8xf32>
    %202 = vector.extract_strided_slice %151 {offsets = [0, 88], sizes = [16, 8], strides = [1, 1]} : vector<16x96xf32> to vector<16x8xf32>
    "tpu.trace_start"() <{level = 10 : i32, message = "qd,kd->qk"}> : () -> ()
    %cst_72 = arith.constant dense<0.000000e+00> : vector<16x16xf32>
    %203 = tpu.matmul %200, %201, %cst_72 {dimension_numbers = #tpu.dot_dimension_numbers<[1], [1], [0], [0], [0, 0, 1, 0], [], []>} : vector<16x8xf32>, vector<16x8xf32>, vector<16x16xf32> -> vector<16x16xf32>
    "tpu.trace_stop"() : () -> ()
    %204 = arith.addf %203, %1 : vector<16x16xf32>
    %cst_73 = arith.constant dense<0xFF800000> : vector<16xf32>
    %205 = vector.multi_reduction <maximumf>, %204, %cst_73 [1] : vector<16x16xf32> to vector<16xf32>
    %206 = vector.shape_cast %205 : vector<16xf32> to vector<16x1xf32>
    %207 = vector.broadcast %206 : vector<16x1xf32> to vector<16x16xf32>
    %208 = arith.subf %204, %207 : vector<16x16xf32>
    %209 = math.exp %208 : vector<16x16xf32>
    %cst_74 = arith.constant dense<0.000000e+00> : vector<16xf32>
    %210 = vector.multi_reduction <add>, %209, %cst_74 [1] : vector<16x16xf32> to vector<16xf32>
    %211 = vector.shape_cast %210 : vector<16xf32> to vector<16x1xf32>
    %212 = tpu.reciprocal %211 {approx = true} : vector<16x1xf32> -> vector<16x1xf32>
    %213 = vector.broadcast %212 : vector<16x1xf32> to vector<16x16xf32>
    %214 = arith.mulf %209, %213 : vector<16x16xf32>
    %cst_75 = arith.constant dense<0.000000e+00> : vector<16x8xf32>
    %215 = tpu.matmul %214, %202, %cst_75 {dimension_numbers = #tpu.dot_dimension_numbers<[1], [0], [0], [1], [0, 0, 1, 1], [], []>} : vector<16x16xf32>, vector<16x8xf32>, vector<16x8xf32> -> vector<16x8xf32>
    %216 = tpu.concatenate %167, %183, %199, %215 in 1 : vector<16x8xf32>, vector<16x8xf32>, vector<16x8xf32>, vector<16x8xf32> -> vector<16x32xf32>
    %c1_76 = arith.constant 1 : index
    %c0_77 = arith.constant 0 : index
    %c0_78 = arith.constant 0 : index
    %217 = vector.load %arg4[%c1_76, %c0_77, %c0_78] : memref<6x32x32xf32, #tpu.memory_space<vmem>>, vector<1x32x32xf32>
    %218 = vector.shape_cast %217 : vector<1x32x32xf32> to vector<32x32xf32>
    %cst_79 = arith.constant dense<0.000000e+00> : vector<16x32xf32>
    %219 = tpu.matmul %216, %218, %cst_79 {dimension_numbers = #tpu.dot_dimension_numbers<[1], [0], [0], [1], [0, 0, 1, 1], [], []>} : vector<16x32xf32>, vector<32x32xf32>, vector<16x32xf32> -> vector<16x32xf32>
    %c9 = arith.constant 9 : index
    %c0_80 = arith.constant 0 : index
    %220 = vector.load %arg2[%c9, %c0_80] : memref<64x128xf32, #tpu.memory_space<vmem>>, vector<1x32xf32>
    %221 = vector.broadcast %220 : vector<1x32xf32> to vector<16x32xf32>
    %222 = arith.addf %219, %221 : vector<16x32xf32>
    %223 = arith.addf %144, %222 : vector<16x32xf32>
    %cst_81 = arith.constant dense<0.000000e+00> : vector<16xf32>
    %224 = vector.multi_reduction <add>, %223, %cst_81 [1] : vector<16x32xf32> to vector<16xf32>
    %225 = vector.shape_cast %224 : vector<16xf32> to vector<16x1xf32>
    %cst_82 = arith.constant 3.200000e+01 : f32
    %226 = vector.broadcast %cst_82 : f32 to vector<16x1xf32>
    %227 = arith.divf %225, %226 : vector<16x1xf32>
    %228 = vector.broadcast %227 : vector<16x1xf32> to vector<16x32xf32>
    %229 = arith.subf %223, %228 : vector<16x32xf32>
    %230 = arith.mulf %229, %229 : vector<16x32xf32>
    %cst_83 = arith.constant dense<0.000000e+00> : vector<16xf32>
    %231 = vector.multi_reduction <add>, %230, %cst_83 [1] : vector<16x32xf32> to vector<16xf32>
    %232 = vector.shape_cast %231 : vector<16xf32> to vector<16x1xf32>
    %cst_84 = arith.constant 3.200000e+01 : f32
    %233 = vector.broadcast %cst_84 : f32 to vector<16x1xf32>
    %234 = arith.divf %232, %233 : vector<16x1xf32>
    %235 = vector.broadcast %227 : vector<16x1xf32> to vector<16x32xf32>
    %236 = arith.subf %223, %235 : vector<16x32xf32>
    %cst_85 = arith.constant 9.99999974E-6 : f32
    %237 = vector.broadcast %cst_85 : f32 to vector<16x1xf32>
    %238 = arith.addf %234, %237 : vector<16x1xf32>
    %239 = math.rsqrt %238 : vector<16x1xf32>
    %240 = vector.broadcast %239 : vector<16x1xf32> to vector<16x32xf32>
    %241 = arith.mulf %236, %240 : vector<16x32xf32>
    %c12 = arith.constant 12 : index
    %c0_86 = arith.constant 0 : index
    %242 = vector.load %arg2[%c12, %c0_86] : memref<64x128xf32, #tpu.memory_space<vmem>>, vector<1x32xf32>
    %243 = vector.broadcast %242 : vector<1x32xf32> to vector<16x32xf32>
    %244 = arith.mulf %241, %243 : vector<16x32xf32>
    %c13 = arith.constant 13 : index
    %c0_87 = arith.constant 0 : index
    %245 = vector.load %arg2[%c13, %c0_87] : memref<64x128xf32, #tpu.memory_space<vmem>>, vector<1x32xf32>
    %246 = vector.broadcast %245 : vector<1x32xf32> to vector<16x32xf32>
    %247 = arith.addf %244, %246 : vector<16x32xf32>
    %c1_88 = arith.constant 1 : index
    %c0_89 = arith.constant 0 : index
    %c0_90 = arith.constant 0 : index
    %248 = vector.load %arg5[%c1_88, %c0_89, %c0_90] : memref<4x32x64xf32, #tpu.memory_space<vmem>>, vector<1x32x64xf32>
    %249 = vector.shape_cast %248 : vector<1x32x64xf32> to vector<32x64xf32>
    %cst_91 = arith.constant dense<0.000000e+00> : vector<16x64xf32>
    %250 = tpu.matmul %247, %249, %cst_91 {dimension_numbers = #tpu.dot_dimension_numbers<[1], [0], [0], [1], [0, 0, 1, 1], [], []>} : vector<16x32xf32>, vector<32x64xf32>, vector<16x64xf32> -> vector<16x64xf32>
    %c10 = arith.constant 10 : index
    %c0_92 = arith.constant 0 : index
    %251 = vector.load %arg2[%c10, %c0_92] : memref<64x128xf32, #tpu.memory_space<vmem>>, vector<1x64xf32>
    %252 = vector.broadcast %251 : vector<1x64xf32> to vector<16x64xf32>
    %253 = arith.addf %250, %252 : vector<16x64xf32>
    %cst_93 = arith.constant 0.000000e+00 : f32
    %254 = vector.broadcast %cst_93 : f32 to vector<16x64xf32>
    %255 = arith.maximumf %253, %254 : vector<16x64xf32>
    %c1_94 = arith.constant 1 : index
    %c0_95 = arith.constant 0 : index
    %c0_96 = arith.constant 0 : index
    %256 = vector.load %arg6[%c1_94, %c0_95, %c0_96] : memref<4x64x32xf32, #tpu.memory_space<vmem>>, vector<1x64x32xf32>
    %257 = vector.shape_cast %256 : vector<1x64x32xf32> to vector<64x32xf32>
    %cst_97 = arith.constant dense<0.000000e+00> : vector<16x32xf32>
    %258 = tpu.matmul %255, %257, %cst_97 {dimension_numbers = #tpu.dot_dimension_numbers<[1], [0], [0], [1], [0, 0, 1, 1], [], []>} : vector<16x64xf32>, vector<64x32xf32>, vector<16x32xf32> -> vector<16x32xf32>
    %c11 = arith.constant 11 : index
    %c0_98 = arith.constant 0 : index
    %259 = vector.load %arg2[%c11, %c0_98] : memref<64x128xf32, #tpu.memory_space<vmem>>, vector<1x32xf32>
    %260 = vector.broadcast %259 : vector<1x32xf32> to vector<16x32xf32>
    %261 = arith.addf %258, %260 : vector<16x32xf32>
    %262 = arith.addf %247, %261 : vector<16x32xf32>
    %cst_99 = arith.constant dense<0.000000e+00> : vector<16xf32>
    %263 = vector.multi_reduction <add>, %262, %cst_99 [1] : vector<16x32xf32> to vector<16xf32>
    %264 = vector.shape_cast %263 : vector<16xf32> to vector<16x1xf32>
    %cst_100 = arith.constant 3.200000e+01 : f32
    %265 = vector.broadcast %cst_100 : f32 to vector<16x1xf32>
    %266 = arith.divf %264, %265 : vector<16x1xf32>
    %267 = vector.broadcast %266 : vector<16x1xf32> to vector<16x32xf32>
    %268 = arith.subf %262, %267 : vector<16x32xf32>
    %269 = arith.mulf %268, %268 : vector<16x32xf32>
    %cst_101 = arith.constant dense<0.000000e+00> : vector<16xf32>
    %270 = vector.multi_reduction <add>, %269, %cst_101 [1] : vector<16x32xf32> to vector<16xf32>
    %271 = vector.shape_cast %270 : vector<16xf32> to vector<16x1xf32>
    %cst_102 = arith.constant 3.200000e+01 : f32
    %272 = vector.broadcast %cst_102 : f32 to vector<16x1xf32>
    %273 = arith.divf %271, %272 : vector<16x1xf32>
    %274 = vector.broadcast %266 : vector<16x1xf32> to vector<16x32xf32>
    %275 = arith.subf %262, %274 : vector<16x32xf32>
    %cst_103 = arith.constant 9.99999974E-6 : f32
    %276 = vector.broadcast %cst_103 : f32 to vector<16x1xf32>
    %277 = arith.addf %273, %276 : vector<16x1xf32>
    %278 = math.rsqrt %277 : vector<16x1xf32>
    %279 = vector.broadcast %278 : vector<16x1xf32> to vector<16x32xf32>
    %280 = arith.mulf %275, %279 : vector<16x32xf32>
    %c14 = arith.constant 14 : index
    %c0_104 = arith.constant 0 : index
    %281 = vector.load %arg2[%c14, %c0_104] : memref<64x128xf32, #tpu.memory_space<vmem>>, vector<1x32xf32>
    %282 = vector.broadcast %281 : vector<1x32xf32> to vector<16x32xf32>
    %283 = arith.mulf %280, %282 : vector<16x32xf32>
    %c15 = arith.constant 15 : index
    %c0_105 = arith.constant 0 : index
    %284 = vector.load %arg2[%c15, %c0_105] : memref<64x128xf32, #tpu.memory_space<vmem>>, vector<1x32xf32>
    %285 = vector.broadcast %284 : vector<1x32xf32> to vector<16x32xf32>
    %286 = arith.addf %283, %285 : vector<16x32xf32>
    %c0_106 = arith.constant 0 : index
    %c0_107 = arith.constant 0 : index
    %287 = vector.load %arg9[%c0_106, %c0_107] : memref<16x32xf32, #tpu.memory_space<vmem>>, vector<16x32xf32>
    tpu.vector_store %arg9[%c0_106, %c0_107], %286 {strides = array<i32>} : memref<16x32xf32, #tpu.memory_space<vmem>>, vector<16x32xf32>,
    %c0_108 = arith.constant 0 : index
    %c0_109 = arith.constant 0 : index
    %c0_110 = arith.constant 0 : index
    %288 = vector.load %arg7[%c0_108, %c0_109, %c0_110] : memref<2x16x32xf32, #tpu.memory_space<vmem>>, vector<1x16x32xf32>
    %289 = vector.shape_cast %288 : vector<1x16x32xf32> to vector<16x32xf32>
    %290 = tpu.concatenate %289, %286, %0 in 1 : vector<16x32xf32>, vector<16x32xf32>, vector<16x32xf32> -> vector<16x96xf32>
    %c2_111 = arith.constant 2 : index
    %c0_112 = arith.constant 0 : index
    %c0_113 = arith.constant 0 : index
    %291 = vector.load %arg3[%c2_111, %c0_112, %c0_113] : memref<6x96x96xf32, #tpu.memory_space<vmem>>, vector<1x96x96xf32>
    %292 = vector.shape_cast %291 : vector<1x96x96xf32> to vector<96x96xf32>
    %cst_114 = arith.constant dense<0.000000e+00> : vector<16x96xf32>
    %293 = tpu.matmul %290, %292, %cst_114 {dimension_numbers = #tpu.dot_dimension_numbers<[1], [0], [0], [1], [0, 0, 1, 1], [], []>} : vector<16x96xf32>, vector<96x96xf32>, vector<16x96xf32> -> vector<16x96xf32>
    %c16 = arith.constant 16 : index
    %c0_115 = arith.constant 0 : index
    %294 = vector.load %arg2[%c16, %c0_115] : memref<64x128xf32, #tpu.memory_space<vmem>>, vector<1x96xf32>
    %295 = vector.broadcast %294 : vector<1x96xf32> to vector<16x96xf32>
    %296 = arith.addf %293, %295 : vector<16x96xf32>
    %297 = vector.extract_strided_slice %296 {offsets = [0, 0], sizes = [16, 8], strides = [1, 1]} : vector<16x96xf32> to vector<16x8xf32>
    %298 = vector.extract_strided_slice %296 {offsets = [0, 32], sizes = [16, 8], strides = [1, 1]} : vector<16x96xf32> to vector<16x8xf32>
    %299 = vector.extract_strided_slice %296 {offsets = [0, 64], sizes = [16, 8], strides = [1, 1]} : vector<16x96xf32> to vector<16x8xf32>
    "tpu.trace_start"() <{level = 10 : i32, message = "qd,kd->qk"}> : () -> ()
    %cst_116 = arith.constant dense<0.000000e+00> : vector<16x16xf32>
    %300 = tpu.matmul %297, %298, %cst_116 {dimension_numbers = #tpu.dot_dimension_numbers<[1], [1], [0], [0], [0, 0, 1, 0], [], []>} : vector<16x8xf32>, vector<16x8xf32>, vector<16x16xf32> -> vector<16x16xf32>
    "tpu.trace_stop"() : () -> ()
    %301 = arith.addf %300, %1 : vector<16x16xf32>
    %cst_117 = arith.constant dense<0xFF800000> : vector<16xf32>
    %302 = vector.multi_reduction <maximumf>, %301, %cst_117 [1] : vector<16x16xf32> to vector<16xf32>
    %303 = vector.shape_cast %302 : vector<16xf32> to vector<16x1xf32>
    %304 = vector.broadcast %303 : vector<16x1xf32> to vector<16x16xf32>
    %305 = arith.subf %301, %304 : vector<16x16xf32>
    %306 = math.exp %305 : vector<16x16xf32>
    %cst_118 = arith.constant dense<0.000000e+00> : vector<16xf32>
    %307 = vector.multi_reduction <add>, %306, %cst_118 [1] : vector<16x16xf32> to vector<16xf32>
    %308 = vector.shape_cast %307 : vector<16xf32> to vector<16x1xf32>
    %309 = tpu.reciprocal %308 {approx = true} : vector<16x1xf32> -> vector<16x1xf32>
    %310 = vector.broadcast %309 : vector<16x1xf32> to vector<16x16xf32>
    %311 = arith.mulf %306, %310 : vector<16x16xf32>
    %cst_119 = arith.constant dense<0.000000e+00> : vector<16x8xf32>
    %312 = tpu.matmul %311, %299, %cst_119 {dimension_numbers = #tpu.dot_dimension_numbers<[1], [0], [0], [1], [0, 0, 1, 1], [], []>} : vector<16x16xf32>, vector<16x8xf32>, vector<16x8xf32> -> vector<16x8xf32>
    %313 = vector.extract_strided_slice %296 {offsets = [0, 8], sizes = [16, 8], strides = [1, 1]} : vector<16x96xf32> to vector<16x8xf32>
    %314 = vector.extract_strided_slice %296 {offsets = [0, 40], sizes = [16, 8], strides = [1, 1]} : vector<16x96xf32> to vector<16x8xf32>
    %315 = vector.extract_strided_slice %296 {offsets = [0, 72], sizes = [16, 8], strides = [1, 1]} : vector<16x96xf32> to vector<16x8xf32>
    "tpu.trace_start"() <{level = 10 : i32, message = "qd,kd->qk"}> : () -> ()
    %cst_120 = arith.constant dense<0.000000e+00> : vector<16x16xf32>
    %316 = tpu.matmul %313, %314, %cst_120 {dimension_numbers = #tpu.dot_dimension_numbers<[1], [1], [0], [0], [0, 0, 1, 0], [], []>} : vector<16x8xf32>, vector<16x8xf32>, vector<16x16xf32> -> vector<16x16xf32>
    "tpu.trace_stop"() : () -> ()
    %317 = arith.addf %316, %1 : vector<16x16xf32>
    %cst_121 = arith.constant dense<0xFF800000> : vector<16xf32>
    %318 = vector.multi_reduction <maximumf>, %317, %cst_121 [1] : vector<16x16xf32> to vector<16xf32>
    %319 = vector.shape_cast %318 : vector<16xf32> to vector<16x1xf32>
    %320 = vector.broadcast %319 : vector<16x1xf32> to vector<16x16xf32>
    %321 = arith.subf %317, %320 : vector<16x16xf32>
    %322 = math.exp %321 : vector<16x16xf32>
    %cst_122 = arith.constant dense<0.000000e+00> : vector<16xf32>
    %323 = vector.multi_reduction <add>, %322, %cst_122 [1] : vector<16x16xf32> to vector<16xf32>
    %324 = vector.shape_cast %323 : vector<16xf32> to vector<16x1xf32>
    %325 = tpu.reciprocal %324 {approx = true} : vector<16x1xf32> -> vector<16x1xf32>
    %326 = vector.broadcast %325 : vector<16x1xf32> to vector<16x16xf32>
    %327 = arith.mulf %322, %326 : vector<16x16xf32>
    %cst_123 = arith.constant dense<0.000000e+00> : vector<16x8xf32>
    %328 = tpu.matmul %327, %315, %cst_123 {dimension_numbers = #tpu.dot_dimension_numbers<[1], [0], [0], [1], [0, 0, 1, 1], [], []>} : vector<16x16xf32>, vector<16x8xf32>, vector<16x8xf32> -> vector<16x8xf32>
    %329 = vector.extract_strided_slice %296 {offsets = [0, 16], sizes = [16, 8], strides = [1, 1]} : vector<16x96xf32> to vector<16x8xf32>
    %330 = vector.extract_strided_slice %296 {offsets = [0, 48], sizes = [16, 8], strides = [1, 1]} : vector<16x96xf32> to vector<16x8xf32>
    %331 = vector.extract_strided_slice %296 {offsets = [0, 80], sizes = [16, 8], strides = [1, 1]} : vector<16x96xf32> to vector<16x8xf32>
    "tpu.trace_start"() <{level = 10 : i32, message = "qd,kd->qk"}> : () -> ()
    %cst_124 = arith.constant dense<0.000000e+00> : vector<16x16xf32>
    %332 = tpu.matmul %329, %330, %cst_124 {dimension_numbers = #tpu.dot_dimension_numbers<[1], [1], [0], [0], [0, 0, 1, 0], [], []>} : vector<16x8xf32>, vector<16x8xf32>, vector<16x16xf32> -> vector<16x16xf32>
    "tpu.trace_stop"() : () -> ()
    %333 = arith.addf %332, %1 : vector<16x16xf32>
    %cst_125 = arith.constant dense<0xFF800000> : vector<16xf32>
    %334 = vector.multi_reduction <maximumf>, %333, %cst_125 [1] : vector<16x16xf32> to vector<16xf32>
    %335 = vector.shape_cast %334 : vector<16xf32> to vector<16x1xf32>
    %336 = vector.broadcast %335 : vector<16x1xf32> to vector<16x16xf32>
    %337 = arith.subf %333, %336 : vector<16x16xf32>
    %338 = math.exp %337 : vector<16x16xf32>
    %cst_126 = arith.constant dense<0.000000e+00> : vector<16xf32>
    %339 = vector.multi_reduction <add>, %338, %cst_126 [1] : vector<16x16xf32> to vector<16xf32>
    %340 = vector.shape_cast %339 : vector<16xf32> to vector<16x1xf32>
    %341 = tpu.reciprocal %340 {approx = true} : vector<16x1xf32> -> vector<16x1xf32>
    %342 = vector.broadcast %341 : vector<16x1xf32> to vector<16x16xf32>
    %343 = arith.mulf %338, %342 : vector<16x16xf32>
    %cst_127 = arith.constant dense<0.000000e+00> : vector<16x8xf32>
    %344 = tpu.matmul %343, %331, %cst_127 {dimension_numbers = #tpu.dot_dimension_numbers<[1], [0], [0], [1], [0, 0, 1, 1], [], []>} : vector<16x16xf32>, vector<16x8xf32>, vector<16x8xf32> -> vector<16x8xf32>
    %345 = vector.extract_strided_slice %296 {offsets = [0, 24], sizes = [16, 8], strides = [1, 1]} : vector<16x96xf32> to vector<16x8xf32>
    %346 = vector.extract_strided_slice %296 {offsets = [0, 56], sizes = [16, 8], strides = [1, 1]} : vector<16x96xf32> to vector<16x8xf32>
    %347 = vector.extract_strided_slice %296 {offsets = [0, 88], sizes = [16, 8], strides = [1, 1]} : vector<16x96xf32> to vector<16x8xf32>
    "tpu.trace_start"() <{level = 10 : i32, message = "qd,kd->qk"}> : () -> ()
    %cst_128 = arith.constant dense<0.000000e+00> : vector<16x16xf32>
    %348 = tpu.matmul %345, %346, %cst_128 {dimension_numbers = #tpu.dot_dimension_numbers<[1], [1], [0], [0], [0, 0, 1, 0], [], []>} : vector<16x8xf32>, vector<16x8xf32>, vector<16x16xf32> -> vector<16x16xf32>
    "tpu.trace_stop"() : () -> ()
    %349 = arith.addf %348, %1 : vector<16x16xf32>
    %cst_129 = arith.constant dense<0xFF800000> : vector<16xf32>
    %350 = vector.multi_reduction <maximumf>, %349, %cst_129 [1] : vector<16x16xf32> to vector<16xf32>
    %351 = vector.shape_cast %350 : vector<16xf32> to vector<16x1xf32>
    %352 = vector.broadcast %351 : vector<16x1xf32> to vector<16x16xf32>
    %353 = arith.subf %349, %352 : vector<16x16xf32>
    %354 = math.exp %353 : vector<16x16xf32>
    %cst_130 = arith.constant dense<0.000000e+00> : vector<16xf32>
    %355 = vector.multi_reduction <add>, %354, %cst_130 [1] : vector<16x16xf32> to vector<16xf32>
    %356 = vector.shape_cast %355 : vector<16xf32> to vector<16x1xf32>
    %357 = tpu.reciprocal %356 {approx = true} : vector<16x1xf32> -> vector<16x1xf32>
    %358 = vector.broadcast %357 : vector<16x1xf32> to vector<16x16xf32>
    %359 = arith.mulf %354, %358 : vector<16x16xf32>
    %cst_131 = arith.constant dense<0.000000e+00> : vector<16x8xf32>
    %360 = tpu.matmul %359, %347, %cst_131 {dimension_numbers = #tpu.dot_dimension_numbers<[1], [0], [0], [1], [0, 0, 1, 1], [], []>} : vector<16x16xf32>, vector<16x8xf32>, vector<16x8xf32> -> vector<16x8xf32>
    %361 = tpu.concatenate %312, %328, %344, %360 in 1 : vector<16x8xf32>, vector<16x8xf32>, vector<16x8xf32>, vector<16x8xf32> -> vector<16x32xf32>
    %c2_132 = arith.constant 2 : index
    %c0_133 = arith.constant 0 : index
    %c0_134 = arith.constant 0 : index
    %362 = vector.load %arg4[%c2_132, %c0_133, %c0_134] : memref<6x32x32xf32, #tpu.memory_space<vmem>>, vector<1x32x32xf32>
    %363 = vector.shape_cast %362 : vector<1x32x32xf32> to vector<32x32xf32>
    %cst_135 = arith.constant dense<0.000000e+00> : vector<16x32xf32>
    %364 = tpu.matmul %361, %363, %cst_135 {dimension_numbers = #tpu.dot_dimension_numbers<[1], [0], [0], [1], [0, 0, 1, 1], [], []>} : vector<16x32xf32>, vector<32x32xf32>, vector<16x32xf32> -> vector<16x32xf32>
    %c17 = arith.constant 17 : index
    %c0_136 = arith.constant 0 : index
    %365 = vector.load %arg2[%c17, %c0_136] : memref<64x128xf32, #tpu.memory_space<vmem>>, vector<1x32xf32>
    %366 = vector.broadcast %365 : vector<1x32xf32> to vector<16x32xf32>
    %367 = arith.addf %364, %366 : vector<16x32xf32>
    %368 = arith.addf %289, %367 : vector<16x32xf32>
    %cst_137 = arith.constant dense<0.000000e+00> : vector<16xf32>
    %369 = vector.multi_reduction <add>, %368, %cst_137 [1] : vector<16x32xf32> to vector<16xf32>
    %370 = vector.shape_cast %369 : vector<16xf32> to vector<16x1xf32>
    %cst_138 = arith.constant 3.200000e+01 : f32
    %371 = vector.broadcast %cst_138 : f32 to vector<16x1xf32>
    %372 = arith.divf %370, %371 : vector<16x1xf32>
    %373 = vector.broadcast %372 : vector<16x1xf32> to vector<16x32xf32>
    %374 = arith.subf %368, %373 : vector<16x32xf32>
    %375 = arith.mulf %374, %374 : vector<16x32xf32>
    %cst_139 = arith.constant dense<0.000000e+00> : vector<16xf32>
    %376 = vector.multi_reduction <add>, %375, %cst_139 [1] : vector<16x32xf32> to vector<16xf32>
    %377 = vector.shape_cast %376 : vector<16xf32> to vector<16x1xf32>
    %cst_140 = arith.constant 3.200000e+01 : f32
    %378 = vector.broadcast %cst_140 : f32 to vector<16x1xf32>
    %379 = arith.divf %377, %378 : vector<16x1xf32>
    %380 = vector.broadcast %372 : vector<16x1xf32> to vector<16x32xf32>
    %381 = arith.subf %368, %380 : vector<16x32xf32>
    %cst_141 = arith.constant 9.99999974E-6 : f32
    %382 = vector.broadcast %cst_141 : f32 to vector<16x1xf32>
    %383 = arith.addf %379, %382 : vector<16x1xf32>
    %384 = math.rsqrt %383 : vector<16x1xf32>
    %385 = vector.broadcast %384 : vector<16x1xf32> to vector<16x32xf32>
    %386 = arith.mulf %381, %385 : vector<16x32xf32>
    %c22 = arith.constant 22 : index
    %c0_142 = arith.constant 0 : index
    %387 = vector.load %arg2[%c22, %c0_142] : memref<64x128xf32, #tpu.memory_space<vmem>>, vector<1x32xf32>
    %388 = vector.broadcast %387 : vector<1x32xf32> to vector<16x32xf32>
    %389 = arith.mulf %386, %388 : vector<16x32xf32>
    %c23 = arith.constant 23 : index
    %c0_143 = arith.constant 0 : index
    %390 = vector.load %arg2[%c23, %c0_143] : memref<64x128xf32, #tpu.memory_space<vmem>>, vector<1x32xf32>
    %391 = vector.broadcast %390 : vector<1x32xf32> to vector<16x32xf32>
    %392 = arith.addf %389, %391 : vector<16x32xf32>
    %393 = tpu.concatenate %392, %286, %0 in 1 : vector<16x32xf32>, vector<16x32xf32>, vector<16x32xf32> -> vector<16x96xf32>
    %c3_144 = arith.constant 3 : index
    %c0_145 = arith.constant 0 : index
    %c0_146 = arith.constant 0 : index
    %394 = vector.load %arg3[%c3_144, %c0_145, %c0_146] : memref<6x96x96xf32, #tpu.memory_space<vmem>>, vector<1x96x96xf32>
    %395 = vector.shape_cast %394 : vector<1x96x96xf32> to vector<96x96xf32>
    %cst_147 = arith.constant dense<0.000000e+00> : vector<16x96xf32>
    %396 = tpu.matmul %393, %395, %cst_147 {dimension_numbers = #tpu.dot_dimension_numbers<[1], [0], [0], [1], [0, 0, 1, 1], [], []>} : vector<16x96xf32>, vector<96x96xf32>, vector<16x96xf32> -> vector<16x96xf32>
    %c18 = arith.constant 18 : index
    %c0_148 = arith.constant 0 : index
    %397 = vector.load %arg2[%c18, %c0_148] : memref<64x128xf32, #tpu.memory_space<vmem>>, vector<1x96xf32>
    %398 = vector.broadcast %397 : vector<1x96xf32> to vector<16x96xf32>
    %399 = arith.addf %396, %398 : vector<16x96xf32>
    %400 = vector.extract_strided_slice %399 {offsets = [0, 0], sizes = [16, 8], strides = [1, 1]} : vector<16x96xf32> to vector<16x8xf32>
    %401 = vector.extract_strided_slice %399 {offsets = [0, 32], sizes = [16, 8], strides = [1, 1]} : vector<16x96xf32> to vector<16x8xf32>
    %402 = vector.extract_strided_slice %399 {offsets = [0, 64], sizes = [16, 8], strides = [1, 1]} : vector<16x96xf32> to vector<16x8xf32>
    "tpu.trace_start"() <{level = 10 : i32, message = "qd,kd->qk"}> : () -> ()
    %cst_149 = arith.constant dense<0.000000e+00> : vector<16x16xf32>
    %403 = tpu.matmul %400, %401, %cst_149 {dimension_numbers = #tpu.dot_dimension_numbers<[1], [1], [0], [0], [0, 0, 1, 0], [], []>} : vector<16x8xf32>, vector<16x8xf32>, vector<16x16xf32> -> vector<16x16xf32>
    "tpu.trace_stop"() : () -> ()
    %404 = arith.addf %403, %1 : vector<16x16xf32>
    %cst_150 = arith.constant dense<0xFF800000> : vector<16xf32>
    %405 = vector.multi_reduction <maximumf>, %404, %cst_150 [1] : vector<16x16xf32> to vector<16xf32>
    %406 = vector.shape_cast %405 : vector<16xf32> to vector<16x1xf32>
    %407 = vector.broadcast %406 : vector<16x1xf32> to vector<16x16xf32>
    %408 = arith.subf %404, %407 : vector<16x16xf32>
    %409 = math.exp %408 : vector<16x16xf32>
    %cst_151 = arith.constant dense<0.000000e+00> : vector<16xf32>
    %410 = vector.multi_reduction <add>, %409, %cst_151 [1] : vector<16x16xf32> to vector<16xf32>
    %411 = vector.shape_cast %410 : vector<16xf32> to vector<16x1xf32>
    %412 = tpu.reciprocal %411 {approx = true} : vector<16x1xf32> -> vector<16x1xf32>
    %413 = vector.broadcast %412 : vector<16x1xf32> to vector<16x16xf32>
    %414 = arith.mulf %409, %413 : vector<16x16xf32>
    %cst_152 = arith.constant dense<0.000000e+00> : vector<16x8xf32>
    %415 = tpu.matmul %414, %402, %cst_152 {dimension_numbers = #tpu.dot_dimension_numbers<[1], [0], [0], [1], [0, 0, 1, 1], [], []>} : vector<16x16xf32>, vector<16x8xf32>, vector<16x8xf32> -> vector<16x8xf32>
    %416 = vector.extract_strided_slice %399 {offsets = [0, 8], sizes = [16, 8], strides = [1, 1]} : vector<16x96xf32> to vector<16x8xf32>
    %417 = vector.extract_strided_slice %399 {offsets = [0, 40], sizes = [16, 8], strides = [1, 1]} : vector<16x96xf32> to vector<16x8xf32>
    %418 = vector.extract_strided_slice %399 {offsets = [0, 72], sizes = [16, 8], strides = [1, 1]} : vector<16x96xf32> to vector<16x8xf32>
    "tpu.trace_start"() <{level = 10 : i32, message = "qd,kd->qk"}> : () -> ()
    %cst_153 = arith.constant dense<0.000000e+00> : vector<16x16xf32>
    %419 = tpu.matmul %416, %417, %cst_153 {dimension_numbers = #tpu.dot_dimension_numbers<[1], [1], [0], [0], [0, 0, 1, 0], [], []>} : vector<16x8xf32>, vector<16x8xf32>, vector<16x16xf32> -> vector<16x16xf32>
    "tpu.trace_stop"() : () -> ()
    %420 = arith.addf %419, %1 : vector<16x16xf32>
    %cst_154 = arith.constant dense<0xFF800000> : vector<16xf32>
    %421 = vector.multi_reduction <maximumf>, %420, %cst_154 [1] : vector<16x16xf32> to vector<16xf32>
    %422 = vector.shape_cast %421 : vector<16xf32> to vector<16x1xf32>
    %423 = vector.broadcast %422 : vector<16x1xf32> to vector<16x16xf32>
    %424 = arith.subf %420, %423 : vector<16x16xf32>
    %425 = math.exp %424 : vector<16x16xf32>
    %cst_155 = arith.constant dense<0.000000e+00> : vector<16xf32>
    %426 = vector.multi_reduction <add>, %425, %cst_155 [1] : vector<16x16xf32> to vector<16xf32>
    %427 = vector.shape_cast %426 : vector<16xf32> to vector<16x1xf32>
    %428 = tpu.reciprocal %427 {approx = true} : vector<16x1xf32> -> vector<16x1xf32>
    %429 = vector.broadcast %428 : vector<16x1xf32> to vector<16x16xf32>
    %430 = arith.mulf %425, %429 : vector<16x16xf32>
    %cst_156 = arith.constant dense<0.000000e+00> : vector<16x8xf32>
    %431 = tpu.matmul %430, %418, %cst_156 {dimension_numbers = #tpu.dot_dimension_numbers<[1], [0], [0], [1], [0, 0, 1, 1], [], []>} : vector<16x16xf32>, vector<16x8xf32>, vector<16x8xf32> -> vector<16x8xf32>
    %432 = vector.extract_strided_slice %399 {offsets = [0, 16], sizes = [16, 8], strides = [1, 1]} : vector<16x96xf32> to vector<16x8xf32>
    %433 = vector.extract_strided_slice %399 {offsets = [0, 48], sizes = [16, 8], strides = [1, 1]} : vector<16x96xf32> to vector<16x8xf32>
    %434 = vector.extract_strided_slice %399 {offsets = [0, 80], sizes = [16, 8], strides = [1, 1]} : vector<16x96xf32> to vector<16x8xf32>
    "tpu.trace_start"() <{level = 10 : i32, message = "qd,kd->qk"}> : () -> ()
    %cst_157 = arith.constant dense<0.000000e+00> : vector<16x16xf32>
    %435 = tpu.matmul %432, %433, %cst_157 {dimension_numbers = #tpu.dot_dimension_numbers<[1], [1], [0], [0], [0, 0, 1, 0], [], []>} : vector<16x8xf32>, vector<16x8xf32>, vector<16x16xf32> -> vector<16x16xf32>
    "tpu.trace_stop"() : () -> ()
    %436 = arith.addf %435, %1 : vector<16x16xf32>
    %cst_158 = arith.constant dense<0xFF800000> : vector<16xf32>
    %437 = vector.multi_reduction <maximumf>, %436, %cst_158 [1] : vector<16x16xf32> to vector<16xf32>
    %438 = vector.shape_cast %437 : vector<16xf32> to vector<16x1xf32>
    %439 = vector.broadcast %438 : vector<16x1xf32> to vector<16x16xf32>
    %440 = arith.subf %436, %439 : vector<16x16xf32>
    %441 = math.exp %440 : vector<16x16xf32>
    %cst_159 = arith.constant dense<0.000000e+00> : vector<16xf32>
    %442 = vector.multi_reduction <add>, %441, %cst_159 [1] : vector<16x16xf32> to vector<16xf32>
    %443 = vector.shape_cast %442 : vector<16xf32> to vector<16x1xf32>
    %444 = tpu.reciprocal %443 {approx = true} : vector<16x1xf32> -> vector<16x1xf32>
    %445 = vector.broadcast %444 : vector<16x1xf32> to vector<16x16xf32>
    %446 = arith.mulf %441, %445 : vector<16x16xf32>
    %cst_160 = arith.constant dense<0.000000e+00> : vector<16x8xf32>
    %447 = tpu.matmul %446, %434, %cst_160 {dimension_numbers = #tpu.dot_dimension_numbers<[1], [0], [0], [1], [0, 0, 1, 1], [], []>} : vector<16x16xf32>, vector<16x8xf32>, vector<16x8xf32> -> vector<16x8xf32>
    %448 = vector.extract_strided_slice %399 {offsets = [0, 24], sizes = [16, 8], strides = [1, 1]} : vector<16x96xf32> to vector<16x8xf32>
    %449 = vector.extract_strided_slice %399 {offsets = [0, 56], sizes = [16, 8], strides = [1, 1]} : vector<16x96xf32> to vector<16x8xf32>
    %450 = vector.extract_strided_slice %399 {offsets = [0, 88], sizes = [16, 8], strides = [1, 1]} : vector<16x96xf32> to vector<16x8xf32>
    "tpu.trace_start"() <{level = 10 : i32, message = "qd,kd->qk"}> : () -> ()
    %cst_161 = arith.constant dense<0.000000e+00> : vector<16x16xf32>
    %451 = tpu.matmul %448, %449, %cst_161 {dimension_numbers = #tpu.dot_dimension_numbers<[1], [1], [0], [0], [0, 0, 1, 0], [], []>} : vector<16x8xf32>, vector<16x8xf32>, vector<16x16xf32> -> vector<16x16xf32>
    "tpu.trace_stop"() : () -> ()
    %452 = arith.addf %451, %1 : vector<16x16xf32>
    %cst_162 = arith.constant dense<0xFF800000> : vector<16xf32>
    %453 = vector.multi_reduction <maximumf>, %452, %cst_162 [1] : vector<16x16xf32> to vector<16xf32>
    %454 = vector.shape_cast %453 : vector<16xf32> to vector<16x1xf32>
    %455 = vector.broadcast %454 : vector<16x1xf32> to vector<16x16xf32>
    %456 = arith.subf %452, %455 : vector<16x16xf32>
    %457 = math.exp %456 : vector<16x16xf32>
    %cst_163 = arith.constant dense<0.000000e+00> : vector<16xf32>
    %458 = vector.multi_reduction <add>, %457, %cst_163 [1] : vector<16x16xf32> to vector<16xf32>
    %459 = vector.shape_cast %458 : vector<16xf32> to vector<16x1xf32>
    %460 = tpu.reciprocal %459 {approx = true} : vector<16x1xf32> -> vector<16x1xf32>
    %461 = vector.broadcast %460 : vector<16x1xf32> to vector<16x16xf32>
    %462 = arith.mulf %457, %461 : vector<16x16xf32>
    %cst_164 = arith.constant dense<0.000000e+00> : vector<16x8xf32>
    %463 = tpu.matmul %462, %450, %cst_164 {dimension_numbers = #tpu.dot_dimension_numbers<[1], [0], [0], [1], [0, 0, 1, 1], [], []>} : vector<16x16xf32>, vector<16x8xf32>, vector<16x8xf32> -> vector<16x8xf32>
    %464 = tpu.concatenate %415, %431, %447, %463 in 1 : vector<16x8xf32>, vector<16x8xf32>, vector<16x8xf32>, vector<16x8xf32> -> vector<16x32xf32>
    %c3_165 = arith.constant 3 : index
    %c0_166 = arith.constant 0 : index
    %c0_167 = arith.constant 0 : index
    %465 = vector.load %arg4[%c3_165, %c0_166, %c0_167] : memref<6x32x32xf32, #tpu.memory_space<vmem>>, vector<1x32x32xf32>
    %466 = vector.shape_cast %465 : vector<1x32x32xf32> to vector<32x32xf32>
    %cst_168 = arith.constant dense<0.000000e+00> : vector<16x32xf32>
    %467 = tpu.matmul %464, %466, %cst_168 {dimension_numbers = #tpu.dot_dimension_numbers<[1], [0], [0], [1], [0, 0, 1, 1], [], []>} : vector<16x32xf32>, vector<32x32xf32>, vector<16x32xf32> -> vector<16x32xf32>
    %c19 = arith.constant 19 : index
    %c0_169 = arith.constant 0 : index
    %468 = vector.load %arg2[%c19, %c0_169] : memref<64x128xf32, #tpu.memory_space<vmem>>, vector<1x32xf32>
    %469 = vector.broadcast %468 : vector<1x32xf32> to vector<16x32xf32>
    %470 = arith.addf %467, %469 : vector<16x32xf32>
    %471 = arith.addf %392, %470 : vector<16x32xf32>
    %cst_170 = arith.constant dense<0.000000e+00> : vector<16xf32>
    %472 = vector.multi_reduction <add>, %471, %cst_170 [1] : vector<16x32xf32> to vector<16xf32>
    %473 = vector.shape_cast %472 : vector<16xf32> to vector<16x1xf32>
    %cst_171 = arith.constant 3.200000e+01 : f32
    %474 = vector.broadcast %cst_171 : f32 to vector<16x1xf32>
    %475 = arith.divf %473, %474 : vector<16x1xf32>
    %476 = vector.broadcast %475 : vector<16x1xf32> to vector<16x32xf32>
    %477 = arith.subf %471, %476 : vector<16x32xf32>
    %478 = arith.mulf %477, %477 : vector<16x32xf32>
    %cst_172 = arith.constant dense<0.000000e+00> : vector<16xf32>
    %479 = vector.multi_reduction <add>, %478, %cst_172 [1] : vector<16x32xf32> to vector<16xf32>
    %480 = vector.shape_cast %479 : vector<16xf32> to vector<16x1xf32>
    %cst_173 = arith.constant 3.200000e+01 : f32
    %481 = vector.broadcast %cst_173 : f32 to vector<16x1xf32>
    %482 = arith.divf %480, %481 : vector<16x1xf32>
    %483 = vector.broadcast %475 : vector<16x1xf32> to vector<16x32xf32>
    %484 = arith.subf %471, %483 : vector<16x32xf32>
    %cst_174 = arith.constant 9.99999974E-6 : f32
    %485 = vector.broadcast %cst_174 : f32 to vector<16x1xf32>
    %486 = arith.addf %482, %485 : vector<16x1xf32>
    %487 = math.rsqrt %486 : vector<16x1xf32>
    %488 = vector.broadcast %487 : vector<16x1xf32> to vector<16x32xf32>
    %489 = arith.mulf %484, %488 : vector<16x32xf32>
    %c24 = arith.constant 24 : index
    %c0_175 = arith.constant 0 : index
    %490 = vector.load %arg2[%c24, %c0_175] : memref<64x128xf32, #tpu.memory_space<vmem>>, vector<1x32xf32>
    %491 = vector.broadcast %490 : vector<1x32xf32> to vector<16x32xf32>
    %492 = arith.mulf %489, %491 : vector<16x32xf32>
    %c25 = arith.constant 25 : index
    %c0_176 = arith.constant 0 : index
    %493 = vector.load %arg2[%c25, %c0_176] : memref<64x128xf32, #tpu.memory_space<vmem>>, vector<1x32xf32>
    %494 = vector.broadcast %493 : vector<1x32xf32> to vector<16x32xf32>
    %495 = arith.addf %492, %494 : vector<16x32xf32>
    %c2_177 = arith.constant 2 : index
    %c0_178 = arith.constant 0 : index
    %c0_179 = arith.constant 0 : index
    %496 = vector.load %arg5[%c2_177, %c0_178, %c0_179] : memref<4x32x64xf32, #tpu.memory_space<vmem>>, vector<1x32x64xf32>
    %497 = vector.shape_cast %496 : vector<1x32x64xf32> to vector<32x64xf32>
    %cst_180 = arith.constant dense<0.000000e+00> : vector<16x64xf32>
    %498 = tpu.matmul %495, %497, %cst_180 {dimension_numbers = #tpu.dot_dimension_numbers<[1], [0], [0], [1], [0, 0, 1, 1], [], []>} : vector<16x32xf32>, vector<32x64xf32>, vector<16x64xf32> -> vector<16x64xf32>
    %c20 = arith.constant 20 : index
    %c0_181 = arith.constant 0 : index
    %499 = vector.load %arg2[%c20, %c0_181] : memref<64x128xf32, #tpu.memory_space<vmem>>, vector<1x64xf32>
    %500 = vector.broadcast %499 : vector<1x64xf32> to vector<16x64xf32>
    %501 = arith.addf %498, %500 : vector<16x64xf32>
    %cst_182 = arith.constant 0.000000e+00 : f32
    %502 = vector.broadcast %cst_182 : f32 to vector<16x64xf32>
    %503 = arith.maximumf %501, %502 : vector<16x64xf32>
    %c2_183 = arith.constant 2 : index
    %c0_184 = arith.constant 0 : index
    %c0_185 = arith.constant 0 : index
    %504 = vector.load %arg6[%c2_183, %c0_184, %c0_185] : memref<4x64x32xf32, #tpu.memory_space<vmem>>, vector<1x64x32xf32>
    %505 = vector.shape_cast %504 : vector<1x64x32xf32> to vector<64x32xf32>
    %cst_186 = arith.constant dense<0.000000e+00> : vector<16x32xf32>
    %506 = tpu.matmul %503, %505, %cst_186 {dimension_numbers = #tpu.dot_dimension_numbers<[1], [0], [0], [1], [0, 0, 1, 1], [], []>} : vector<16x64xf32>, vector<64x32xf32>, vector<16x32xf32> -> vector<16x32xf32>
    %c21 = arith.constant 21 : index
    %c0_187 = arith.constant 0 : index
    %507 = vector.load %arg2[%c21, %c0_187] : memref<64x128xf32, #tpu.memory_space<vmem>>, vector<1x32xf32>
    %508 = vector.broadcast %507 : vector<1x32xf32> to vector<16x32xf32>
    %509 = arith.addf %506, %508 : vector<16x32xf32>
    %510 = arith.addf %495, %509 : vector<16x32xf32>
    %cst_188 = arith.constant dense<0.000000e+00> : vector<16xf32>
    %511 = vector.multi_reduction <add>, %510, %cst_188 [1] : vector<16x32xf32> to vector<16xf32>
    %512 = vector.shape_cast %511 : vector<16xf32> to vector<16x1xf32>
    %cst_189 = arith.constant 3.200000e+01 : f32
    %513 = vector.broadcast %cst_189 : f32 to vector<16x1xf32>
    %514 = arith.divf %512, %513 : vector<16x1xf32>
    %515 = vector.broadcast %514 : vector<16x1xf32> to vector<16x32xf32>
    %516 = arith.subf %510, %515 : vector<16x32xf32>
    %517 = arith.mulf %516, %516 : vector<16x32xf32>
    %cst_190 = arith.constant dense<0.000000e+00> : vector<16xf32>
    %518 = vector.multi_reduction <add>, %517, %cst_190 [1] : vector<16x32xf32> to vector<16xf32>
    %519 = vector.shape_cast %518 : vector<16xf32> to vector<16x1xf32>
    %cst_191 = arith.constant 3.200000e+01 : f32
    %520 = vector.broadcast %cst_191 : f32 to vector<16x1xf32>
    %521 = arith.divf %519, %520 : vector<16x1xf32>
    %522 = vector.broadcast %514 : vector<16x1xf32> to vector<16x32xf32>
    %523 = arith.subf %510, %522 : vector<16x32xf32>
    %cst_192 = arith.constant 9.99999974E-6 : f32
    %524 = vector.broadcast %cst_192 : f32 to vector<16x1xf32>
    %525 = arith.addf %521, %524 : vector<16x1xf32>
    %526 = math.rsqrt %525 : vector<16x1xf32>
    %527 = vector.broadcast %526 : vector<16x1xf32> to vector<16x32xf32>
    %528 = arith.mulf %523, %527 : vector<16x32xf32>
    %c26 = arith.constant 26 : index
    %c0_193 = arith.constant 0 : index
    %529 = vector.load %arg2[%c26, %c0_193] : memref<64x128xf32, #tpu.memory_space<vmem>>, vector<1x32xf32>
    %530 = vector.broadcast %529 : vector<1x32xf32> to vector<16x32xf32>
    %531 = arith.mulf %528, %530 : vector<16x32xf32>
    %c27 = arith.constant 27 : index
    %c0_194 = arith.constant 0 : index
    %532 = vector.load %arg2[%c27, %c0_194] : memref<64x128xf32, #tpu.memory_space<vmem>>, vector<1x32xf32>
    %533 = vector.broadcast %532 : vector<1x32xf32> to vector<16x32xf32>
    %534 = arith.addf %531, %533 : vector<16x32xf32>
    %c1_195 = arith.constant 1 : index
    %c0_196 = arith.constant 0 : index
    %c0_197 = arith.constant 0 : index
    %535 = vector.load %arg7[%c1_195, %c0_196, %c0_197] : memref<2x16x32xf32, #tpu.memory_space<vmem>>, vector<1x16x32xf32>
    %536 = vector.shape_cast %535 : vector<1x16x32xf32> to vector<16x32xf32>
    %537 = tpu.concatenate %536, %286, %0 in 1 : vector<16x32xf32>, vector<16x32xf32>, vector<16x32xf32> -> vector<16x96xf32>
    %c4_198 = arith.constant 4 : index
    %c0_199 = arith.constant 0 : index
    %c0_200 = arith.constant 0 : index
    %538 = vector.load %arg3[%c4_198, %c0_199, %c0_200] : memref<6x96x96xf32, #tpu.memory_space<vmem>>, vector<1x96x96xf32>
    %539 = vector.shape_cast %538 : vector<1x96x96xf32> to vector<96x96xf32>
    %cst_201 = arith.constant dense<0.000000e+00> : vector<16x96xf32>
    %540 = tpu.matmul %537, %539, %cst_201 {dimension_numbers = #tpu.dot_dimension_numbers<[1], [0], [0], [1], [0, 0, 1, 1], [], []>} : vector<16x96xf32>, vector<96x96xf32>, vector<16x96xf32> -> vector<16x96xf32>
    %c28 = arith.constant 28 : index
    %c0_202 = arith.constant 0 : index
    %541 = vector.load %arg2[%c28, %c0_202] : memref<64x128xf32, #tpu.memory_space<vmem>>, vector<1x96xf32>
    %542 = vector.broadcast %541 : vector<1x96xf32> to vector<16x96xf32>
    %543 = arith.addf %540, %542 : vector<16x96xf32>
    %544 = vector.extract_strided_slice %543 {offsets = [0, 0], sizes = [16, 8], strides = [1, 1]} : vector<16x96xf32> to vector<16x8xf32>
    %545 = vector.extract_strided_slice %543 {offsets = [0, 32], sizes = [16, 8], strides = [1, 1]} : vector<16x96xf32> to vector<16x8xf32>
    %546 = vector.extract_strided_slice %543 {offsets = [0, 64], sizes = [16, 8], strides = [1, 1]} : vector<16x96xf32> to vector<16x8xf32>
    "tpu.trace_start"() <{level = 10 : i32, message = "qd,kd->qk"}> : () -> ()
    %cst_203 = arith.constant dense<0.000000e+00> : vector<16x16xf32>
    %547 = tpu.matmul %544, %545, %cst_203 {dimension_numbers = #tpu.dot_dimension_numbers<[1], [1], [0], [0], [0, 0, 1, 0], [], []>} : vector<16x8xf32>, vector<16x8xf32>, vector<16x16xf32> -> vector<16x16xf32>
    "tpu.trace_stop"() : () -> ()
    %548 = arith.addf %547, %1 : vector<16x16xf32>
    %cst_204 = arith.constant dense<0xFF800000> : vector<16xf32>
    %549 = vector.multi_reduction <maximumf>, %548, %cst_204 [1] : vector<16x16xf32> to vector<16xf32>
    %550 = vector.shape_cast %549 : vector<16xf32> to vector<16x1xf32>
    %551 = vector.broadcast %550 : vector<16x1xf32> to vector<16x16xf32>
    %552 = arith.subf %548, %551 : vector<16x16xf32>
    %553 = math.exp %552 : vector<16x16xf32>
    %cst_205 = arith.constant dense<0.000000e+00> : vector<16xf32>
    %554 = vector.multi_reduction <add>, %553, %cst_205 [1] : vector<16x16xf32> to vector<16xf32>
    %555 = vector.shape_cast %554 : vector<16xf32> to vector<16x1xf32>
    %556 = tpu.reciprocal %555 {approx = true} : vector<16x1xf32> -> vector<16x1xf32>
    %557 = vector.broadcast %556 : vector<16x1xf32> to vector<16x16xf32>
    %558 = arith.mulf %553, %557 : vector<16x16xf32>
    %cst_206 = arith.constant dense<0.000000e+00> : vector<16x8xf32>
    %559 = tpu.matmul %558, %546, %cst_206 {dimension_numbers = #tpu.dot_dimension_numbers<[1], [0], [0], [1], [0, 0, 1, 1], [], []>} : vector<16x16xf32>, vector<16x8xf32>, vector<16x8xf32> -> vector<16x8xf32>
    %560 = vector.extract_strided_slice %543 {offsets = [0, 8], sizes = [16, 8], strides = [1, 1]} : vector<16x96xf32> to vector<16x8xf32>
    %561 = vector.extract_strided_slice %543 {offsets = [0, 40], sizes = [16, 8], strides = [1, 1]} : vector<16x96xf32> to vector<16x8xf32>
    %562 = vector.extract_strided_slice %543 {offsets = [0, 72], sizes = [16, 8], strides = [1, 1]} : vector<16x96xf32> to vector<16x8xf32>
    "tpu.trace_start"() <{level = 10 : i32, message = "qd,kd->qk"}> : () -> ()
    %cst_207 = arith.constant dense<0.000000e+00> : vector<16x16xf32>
    %563 = tpu.matmul %560, %561, %cst_207 {dimension_numbers = #tpu.dot_dimension_numbers<[1], [1], [0], [0], [0, 0, 1, 0], [], []>} : vector<16x8xf32>, vector<16x8xf32>, vector<16x16xf32> -> vector<16x16xf32>
    "tpu.trace_stop"() : () -> ()
    %564 = arith.addf %563, %1 : vector<16x16xf32>
    %cst_208 = arith.constant dense<0xFF800000> : vector<16xf32>
    %565 = vector.multi_reduction <maximumf>, %564, %cst_208 [1] : vector<16x16xf32> to vector<16xf32>
    %566 = vector.shape_cast %565 : vector<16xf32> to vector<16x1xf32>
    %567 = vector.broadcast %566 : vector<16x1xf32> to vector<16x16xf32>
    %568 = arith.subf %564, %567 : vector<16x16xf32>
    %569 = math.exp %568 : vector<16x16xf32>
    %cst_209 = arith.constant dense<0.000000e+00> : vector<16xf32>
    %570 = vector.multi_reduction <add>, %569, %cst_209 [1] : vector<16x16xf32> to vector<16xf32>
    %571 = vector.shape_cast %570 : vector<16xf32> to vector<16x1xf32>
    %572 = tpu.reciprocal %571 {approx = true} : vector<16x1xf32> -> vector<16x1xf32>
    %573 = vector.broadcast %572 : vector<16x1xf32> to vector<16x16xf32>
    %574 = arith.mulf %569, %573 : vector<16x16xf32>
    %cst_210 = arith.constant dense<0.000000e+00> : vector<16x8xf32>
    %575 = tpu.matmul %574, %562, %cst_210 {dimension_numbers = #tpu.dot_dimension_numbers<[1], [0], [0], [1], [0, 0, 1, 1], [], []>} : vector<16x16xf32>, vector<16x8xf32>, vector<16x8xf32> -> vector<16x8xf32>
    %576 = vector.extract_strided_slice %543 {offsets = [0, 16], sizes = [16, 8], strides = [1, 1]} : vector<16x96xf32> to vector<16x8xf32>
    %577 = vector.extract_strided_slice %543 {offsets = [0, 48], sizes = [16, 8], strides = [1, 1]} : vector<16x96xf32> to vector<16x8xf32>
    %578 = vector.extract_strided_slice %543 {offsets = [0, 80], sizes = [16, 8], strides = [1, 1]} : vector<16x96xf32> to vector<16x8xf32>
    "tpu.trace_start"() <{level = 10 : i32, message = "qd,kd->qk"}> : () -> ()
    %cst_211 = arith.constant dense<0.000000e+00> : vector<16x16xf32>
    %579 = tpu.matmul %576, %577, %cst_211 {dimension_numbers = #tpu.dot_dimension_numbers<[1], [1], [0], [0], [0, 0, 1, 0], [], []>} : vector<16x8xf32>, vector<16x8xf32>, vector<16x16xf32> -> vector<16x16xf32>
    "tpu.trace_stop"() : () -> ()
    %580 = arith.addf %579, %1 : vector<16x16xf32>
    %cst_212 = arith.constant dense<0xFF800000> : vector<16xf32>
    %581 = vector.multi_reduction <maximumf>, %580, %cst_212 [1] : vector<16x16xf32> to vector<16xf32>
    %582 = vector.shape_cast %581 : vector<16xf32> to vector<16x1xf32>
    %583 = vector.broadcast %582 : vector<16x1xf32> to vector<16x16xf32>
    %584 = arith.subf %580, %583 : vector<16x16xf32>
    %585 = math.exp %584 : vector<16x16xf32>
    %cst_213 = arith.constant dense<0.000000e+00> : vector<16xf32>
    %586 = vector.multi_reduction <add>, %585, %cst_213 [1] : vector<16x16xf32> to vector<16xf32>
    %587 = vector.shape_cast %586 : vector<16xf32> to vector<16x1xf32>
    %588 = tpu.reciprocal %587 {approx = true} : vector<16x1xf32> -> vector<16x1xf32>
    %589 = vector.broadcast %588 : vector<16x1xf32> to vector<16x16xf32>
    %590 = arith.mulf %585, %589 : vector<16x16xf32>
    %cst_214 = arith.constant dense<0.000000e+00> : vector<16x8xf32>
    %591 = tpu.matmul %590, %578, %cst_214 {dimension_numbers = #tpu.dot_dimension_numbers<[1], [0], [0], [1], [0, 0, 1, 1], [], []>} : vector<16x16xf32>, vector<16x8xf32>, vector<16x8xf32> -> vector<16x8xf32>
    %592 = vector.extract_strided_slice %543 {offsets = [0, 24], sizes = [16, 8], strides = [1, 1]} : vector<16x96xf32> to vector<16x8xf32>
    %593 = vector.extract_strided_slice %543 {offsets = [0, 56], sizes = [16, 8], strides = [1, 1]} : vector<16x96xf32> to vector<16x8xf32>
    %594 = vector.extract_strided_slice %543 {offsets = [0, 88], sizes = [16, 8], strides = [1, 1]} : vector<16x96xf32> to vector<16x8xf32>
    "tpu.trace_start"() <{level = 10 : i32, message = "qd,kd->qk"}> : () -> ()
    %cst_215 = arith.constant dense<0.000000e+00> : vector<16x16xf32>
    %595 = tpu.matmul %592, %593, %cst_215 {dimension_numbers = #tpu.dot_dimension_numbers<[1], [1], [0], [0], [0, 0, 1, 0], [], []>} : vector<16x8xf32>, vector<16x8xf32>, vector<16x16xf32> -> vector<16x16xf32>
    "tpu.trace_stop"() : () -> ()
    %596 = arith.addf %595, %1 : vector<16x16xf32>
    %cst_216 = arith.constant dense<0xFF800000> : vector<16xf32>
    %597 = vector.multi_reduction <maximumf>, %596, %cst_216 [1] : vector<16x16xf32> to vector<16xf32>
    %598 = vector.shape_cast %597 : vector<16xf32> to vector<16x1xf32>
    %599 = vector.broadcast %598 : vector<16x1xf32> to vector<16x16xf32>
    %600 = arith.subf %596, %599 : vector<16x16xf32>
    %601 = math.exp %600 : vector<16x16xf32>
    %cst_217 = arith.constant dense<0.000000e+00> : vector<16xf32>
    %602 = vector.multi_reduction <add>, %601, %cst_217 [1] : vector<16x16xf32> to vector<16xf32>
    %603 = vector.shape_cast %602 : vector<16xf32> to vector<16x1xf32>
    %604 = tpu.reciprocal %603 {approx = true} : vector<16x1xf32> -> vector<16x1xf32>
    %605 = vector.broadcast %604 : vector<16x1xf32> to vector<16x16xf32>
    %606 = arith.mulf %601, %605 : vector<16x16xf32>
    %cst_218 = arith.constant dense<0.000000e+00> : vector<16x8xf32>
    %607 = tpu.matmul %606, %594, %cst_218 {dimension_numbers = #tpu.dot_dimension_numbers<[1], [0], [0], [1], [0, 0, 1, 1], [], []>} : vector<16x16xf32>, vector<16x8xf32>, vector<16x8xf32> -> vector<16x8xf32>
    %608 = tpu.concatenate %559, %575, %591, %607 in 1 : vector<16x8xf32>, vector<16x8xf32>, vector<16x8xf32>, vector<16x8xf32> -> vector<16x32xf32>
    %c4_219 = arith.constant 4 : index
    %c0_220 = arith.constant 0 : index
    %c0_221 = arith.constant 0 : index
    %609 = vector.load %arg4[%c4_219, %c0_220, %c0_221] : memref<6x32x32xf32, #tpu.memory_space<vmem>>, vector<1x32x32xf32>
    %610 = vector.shape_cast %609 : vector<1x32x32xf32> to vector<32x32xf32>
    %cst_222 = arith.constant dense<0.000000e+00> : vector<16x32xf32>
    %611 = tpu.matmul %608, %610, %cst_222 {dimension_numbers = #tpu.dot_dimension_numbers<[1], [0], [0], [1], [0, 0, 1, 1], [], []>} : vector<16x32xf32>, vector<32x32xf32>, vector<16x32xf32> -> vector<16x32xf32>
    %c29 = arith.constant 29 : index
    %c0_223 = arith.constant 0 : index
    %612 = vector.load %arg2[%c29, %c0_223] : memref<64x128xf32, #tpu.memory_space<vmem>>, vector<1x32xf32>
    %613 = vector.broadcast %612 : vector<1x32xf32> to vector<16x32xf32>
    %614 = arith.addf %611, %613 : vector<16x32xf32>
    %615 = arith.addf %536, %614 : vector<16x32xf32>
    %cst_224 = arith.constant dense<0.000000e+00> : vector<16xf32>
    %616 = vector.multi_reduction <add>, %615, %cst_224 [1] : vector<16x32xf32> to vector<16xf32>
    %617 = vector.shape_cast %616 : vector<16xf32> to vector<16x1xf32>
    %cst_225 = arith.constant 3.200000e+01 : f32
    %618 = vector.broadcast %cst_225 : f32 to vector<16x1xf32>
    %619 = arith.divf %617, %618 : vector<16x1xf32>
    %620 = vector.broadcast %619 : vector<16x1xf32> to vector<16x32xf32>
    %621 = arith.subf %615, %620 : vector<16x32xf32>
    %622 = arith.mulf %621, %621 : vector<16x32xf32>
    %cst_226 = arith.constant dense<0.000000e+00> : vector<16xf32>
    %623 = vector.multi_reduction <add>, %622, %cst_226 [1] : vector<16x32xf32> to vector<16xf32>
    %624 = vector.shape_cast %623 : vector<16xf32> to vector<16x1xf32>
    %cst_227 = arith.constant 3.200000e+01 : f32
    %625 = vector.broadcast %cst_227 : f32 to vector<16x1xf32>
    %626 = arith.divf %624, %625 : vector<16x1xf32>
    %627 = vector.broadcast %619 : vector<16x1xf32> to vector<16x32xf32>
    %628 = arith.subf %615, %627 : vector<16x32xf32>
    %cst_228 = arith.constant 9.99999974E-6 : f32
    %629 = vector.broadcast %cst_228 : f32 to vector<16x1xf32>
    %630 = arith.addf %626, %629 : vector<16x1xf32>
    %631 = math.rsqrt %630 : vector<16x1xf32>
    %632 = vector.broadcast %631 : vector<16x1xf32> to vector<16x32xf32>
    %633 = arith.mulf %628, %632 : vector<16x32xf32>
    %c34 = arith.constant 34 : index
    %c0_229 = arith.constant 0 : index
    %634 = vector.load %arg2[%c34, %c0_229] : memref<64x128xf32, #tpu.memory_space<vmem>>, vector<1x32xf32>
    %635 = vector.broadcast %634 : vector<1x32xf32> to vector<16x32xf32>
    %636 = arith.mulf %633, %635 : vector<16x32xf32>
    %c35 = arith.constant 35 : index
    %c0_230 = arith.constant 0 : index
    %637 = vector.load %arg2[%c35, %c0_230] : memref<64x128xf32, #tpu.memory_space<vmem>>, vector<1x32xf32>
    %638 = vector.broadcast %637 : vector<1x32xf32> to vector<16x32xf32>
    %639 = arith.addf %636, %638 : vector<16x32xf32>
    %640 = tpu.concatenate %639, %534, %0 in 1 : vector<16x32xf32>, vector<16x32xf32>, vector<16x32xf32> -> vector<16x96xf32>
    %c5_231 = arith.constant 5 : index
    %c0_232 = arith.constant 0 : index
    %c0_233 = arith.constant 0 : index
    %641 = vector.load %arg3[%c5_231, %c0_232, %c0_233] : memref<6x96x96xf32, #tpu.memory_space<vmem>>, vector<1x96x96xf32>
    %642 = vector.shape_cast %641 : vector<1x96x96xf32> to vector<96x96xf32>
    %cst_234 = arith.constant dense<0.000000e+00> : vector<16x96xf32>
    %643 = tpu.matmul %640, %642, %cst_234 {dimension_numbers = #tpu.dot_dimension_numbers<[1], [0], [0], [1], [0, 0, 1, 1], [], []>} : vector<16x96xf32>, vector<96x96xf32>, vector<16x96xf32> -> vector<16x96xf32>
    %c30 = arith.constant 30 : index
    %c0_235 = arith.constant 0 : index
    %644 = vector.load %arg2[%c30, %c0_235] : memref<64x128xf32, #tpu.memory_space<vmem>>, vector<1x96xf32>
    %645 = vector.broadcast %644 : vector<1x96xf32> to vector<16x96xf32>
    %646 = arith.addf %643, %645 : vector<16x96xf32>
    %647 = vector.extract_strided_slice %646 {offsets = [0, 0], sizes = [16, 8], strides = [1, 1]} : vector<16x96xf32> to vector<16x8xf32>
    %648 = vector.extract_strided_slice %646 {offsets = [0, 32], sizes = [16, 8], strides = [1, 1]} : vector<16x96xf32> to vector<16x8xf32>
    %649 = vector.extract_strided_slice %646 {offsets = [0, 64], sizes = [16, 8], strides = [1, 1]} : vector<16x96xf32> to vector<16x8xf32>
    "tpu.trace_start"() <{level = 10 : i32, message = "qd,kd->qk"}> : () -> ()
    %cst_236 = arith.constant dense<0.000000e+00> : vector<16x16xf32>
    %650 = tpu.matmul %647, %648, %cst_236 {dimension_numbers = #tpu.dot_dimension_numbers<[1], [1], [0], [0], [0, 0, 1, 0], [], []>} : vector<16x8xf32>, vector<16x8xf32>, vector<16x16xf32> -> vector<16x16xf32>
    "tpu.trace_stop"() : () -> ()
    %651 = arith.addf %650, %1 : vector<16x16xf32>
    %cst_237 = arith.constant dense<0xFF800000> : vector<16xf32>
    %652 = vector.multi_reduction <maximumf>, %651, %cst_237 [1] : vector<16x16xf32> to vector<16xf32>
    %653 = vector.shape_cast %652 : vector<16xf32> to vector<16x1xf32>
    %654 = vector.broadcast %653 : vector<16x1xf32> to vector<16x16xf32>
    %655 = arith.subf %651, %654 : vector<16x16xf32>
    %656 = math.exp %655 : vector<16x16xf32>
    %cst_238 = arith.constant dense<0.000000e+00> : vector<16xf32>
    %657 = vector.multi_reduction <add>, %656, %cst_238 [1] : vector<16x16xf32> to vector<16xf32>
    %658 = vector.shape_cast %657 : vector<16xf32> to vector<16x1xf32>
    %659 = tpu.reciprocal %658 {approx = true} : vector<16x1xf32> -> vector<16x1xf32>
    %660 = vector.broadcast %659 : vector<16x1xf32> to vector<16x16xf32>
    %661 = arith.mulf %656, %660 : vector<16x16xf32>
    %cst_239 = arith.constant dense<0.000000e+00> : vector<16x8xf32>
    %662 = tpu.matmul %661, %649, %cst_239 {dimension_numbers = #tpu.dot_dimension_numbers<[1], [0], [0], [1], [0, 0, 1, 1], [], []>} : vector<16x16xf32>, vector<16x8xf32>, vector<16x8xf32> -> vector<16x8xf32>
    %663 = vector.extract_strided_slice %646 {offsets = [0, 8], sizes = [16, 8], strides = [1, 1]} : vector<16x96xf32> to vector<16x8xf32>
    %664 = vector.extract_strided_slice %646 {offsets = [0, 40], sizes = [16, 8], strides = [1, 1]} : vector<16x96xf32> to vector<16x8xf32>
    %665 = vector.extract_strided_slice %646 {offsets = [0, 72], sizes = [16, 8], strides = [1, 1]} : vector<16x96xf32> to vector<16x8xf32>
    "tpu.trace_start"() <{level = 10 : i32, message = "qd,kd->qk"}> : () -> ()
    %cst_240 = arith.constant dense<0.000000e+00> : vector<16x16xf32>
    %666 = tpu.matmul %663, %664, %cst_240 {dimension_numbers = #tpu.dot_dimension_numbers<[1], [1], [0], [0], [0, 0, 1, 0], [], []>} : vector<16x8xf32>, vector<16x8xf32>, vector<16x16xf32> -> vector<16x16xf32>
    "tpu.trace_stop"() : () -> ()
    %667 = arith.addf %666, %1 : vector<16x16xf32>
    %cst_241 = arith.constant dense<0xFF800000> : vector<16xf32>
    %668 = vector.multi_reduction <maximumf>, %667, %cst_241 [1] : vector<16x16xf32> to vector<16xf32>
    %669 = vector.shape_cast %668 : vector<16xf32> to vector<16x1xf32>
    %670 = vector.broadcast %669 : vector<16x1xf32> to vector<16x16xf32>
    %671 = arith.subf %667, %670 : vector<16x16xf32>
    %672 = math.exp %671 : vector<16x16xf32>
    %cst_242 = arith.constant dense<0.000000e+00> : vector<16xf32>
    %673 = vector.multi_reduction <add>, %672, %cst_242 [1] : vector<16x16xf32> to vector<16xf32>
    %674 = vector.shape_cast %673 : vector<16xf32> to vector<16x1xf32>
    %675 = tpu.reciprocal %674 {approx = true} : vector<16x1xf32> -> vector<16x1xf32>
    %676 = vector.broadcast %675 : vector<16x1xf32> to vector<16x16xf32>
    %677 = arith.mulf %672, %676 : vector<16x16xf32>
    %cst_243 = arith.constant dense<0.000000e+00> : vector<16x8xf32>
    %678 = tpu.matmul %677, %665, %cst_243 {dimension_numbers = #tpu.dot_dimension_numbers<[1], [0], [0], [1], [0, 0, 1, 1], [], []>} : vector<16x16xf32>, vector<16x8xf32>, vector<16x8xf32> -> vector<16x8xf32>
    %679 = vector.extract_strided_slice %646 {offsets = [0, 16], sizes = [16, 8], strides = [1, 1]} : vector<16x96xf32> to vector<16x8xf32>
    %680 = vector.extract_strided_slice %646 {offsets = [0, 48], sizes = [16, 8], strides = [1, 1]} : vector<16x96xf32> to vector<16x8xf32>
    %681 = vector.extract_strided_slice %646 {offsets = [0, 80], sizes = [16, 8], strides = [1, 1]} : vector<16x96xf32> to vector<16x8xf32>
    "tpu.trace_start"() <{level = 10 : i32, message = "qd,kd->qk"}> : () -> ()
    %cst_244 = arith.constant dense<0.000000e+00> : vector<16x16xf32>
    %682 = tpu.matmul %679, %680, %cst_244 {dimension_numbers = #tpu.dot_dimension_numbers<[1], [1], [0], [0], [0, 0, 1, 0], [], []>} : vector<16x8xf32>, vector<16x8xf32>, vector<16x16xf32> -> vector<16x16xf32>
    "tpu.trace_stop"() : () -> ()
    %683 = arith.addf %682, %1 : vector<16x16xf32>
    %cst_245 = arith.constant dense<0xFF800000> : vector<16xf32>
    %684 = vector.multi_reduction <maximumf>, %683, %cst_245 [1] : vector<16x16xf32> to vector<16xf32>
    %685 = vector.shape_cast %684 : vector<16xf32> to vector<16x1xf32>
    %686 = vector.broadcast %685 : vector<16x1xf32> to vector<16x16xf32>
    %687 = arith.subf %683, %686 : vector<16x16xf32>
    %688 = math.exp %687 : vector<16x16xf32>
    %cst_246 = arith.constant dense<0.000000e+00> : vector<16xf32>
    %689 = vector.multi_reduction <add>, %688, %cst_246 [1] : vector<16x16xf32> to vector<16xf32>
    %690 = vector.shape_cast %689 : vector<16xf32> to vector<16x1xf32>
    %691 = tpu.reciprocal %690 {approx = true} : vector<16x1xf32> -> vector<16x1xf32>
    %692 = vector.broadcast %691 : vector<16x1xf32> to vector<16x16xf32>
    %693 = arith.mulf %688, %692 : vector<16x16xf32>
    %cst_247 = arith.constant dense<0.000000e+00> : vector<16x8xf32>
    %694 = tpu.matmul %693, %681, %cst_247 {dimension_numbers = #tpu.dot_dimension_numbers<[1], [0], [0], [1], [0, 0, 1, 1], [], []>} : vector<16x16xf32>, vector<16x8xf32>, vector<16x8xf32> -> vector<16x8xf32>
    %695 = vector.extract_strided_slice %646 {offsets = [0, 24], sizes = [16, 8], strides = [1, 1]} : vector<16x96xf32> to vector<16x8xf32>
    %696 = vector.extract_strided_slice %646 {offsets = [0, 56], sizes = [16, 8], strides = [1, 1]} : vector<16x96xf32> to vector<16x8xf32>
    %697 = vector.extract_strided_slice %646 {offsets = [0, 88], sizes = [16, 8], strides = [1, 1]} : vector<16x96xf32> to vector<16x8xf32>
    "tpu.trace_start"() <{level = 10 : i32, message = "qd,kd->qk"}> : () -> ()
    %cst_248 = arith.constant dense<0.000000e+00> : vector<16x16xf32>
    %698 = tpu.matmul %695, %696, %cst_248 {dimension_numbers = #tpu.dot_dimension_numbers<[1], [1], [0], [0], [0, 0, 1, 0], [], []>} : vector<16x8xf32>, vector<16x8xf32>, vector<16x16xf32> -> vector<16x16xf32>
    "tpu.trace_stop"() : () -> ()
    %699 = arith.addf %698, %1 : vector<16x16xf32>
    %cst_249 = arith.constant dense<0xFF800000> : vector<16xf32>
    %700 = vector.multi_reduction <maximumf>, %699, %cst_249 [1] : vector<16x16xf32> to vector<16xf32>
    %701 = vector.shape_cast %700 : vector<16xf32> to vector<16x1xf32>
    %702 = vector.broadcast %701 : vector<16x1xf32> to vector<16x16xf32>
    %703 = arith.subf %699, %702 : vector<16x16xf32>
    %704 = math.exp %703 : vector<16x16xf32>
    %cst_250 = arith.constant dense<0.000000e+00> : vector<16xf32>
    %705 = vector.multi_reduction <add>, %704, %cst_250 [1] : vector<16x16xf32> to vector<16xf32>
    %706 = vector.shape_cast %705 : vector<16xf32> to vector<16x1xf32>
    %707 = tpu.reciprocal %706 {approx = true} : vector<16x1xf32> -> vector<16x1xf32>
    %708 = vector.broadcast %707 : vector<16x1xf32> to vector<16x16xf32>
    %709 = arith.mulf %704, %708 : vector<16x16xf32>
    %cst_251 = arith.constant dense<0.000000e+00> : vector<16x8xf32>
    %710 = tpu.matmul %709, %697, %cst_251 {dimension_numbers = #tpu.dot_dimension_numbers<[1], [0], [0], [1], [0, 0, 1, 1], [], []>} : vector<16x16xf32>, vector<16x8xf32>, vector<16x8xf32> -> vector<16x8xf32>
    %711 = tpu.concatenate %662, %678, %694, %710 in 1 : vector<16x8xf32>, vector<16x8xf32>, vector<16x8xf32>, vector<16x8xf32> -> vector<16x32xf32>
    %c5_252 = arith.constant 5 : index
    %c0_253 = arith.constant 0 : index
    %c0_254 = arith.constant 0 : index
    %712 = vector.load %arg4[%c5_252, %c0_253, %c0_254] : memref<6x32x32xf32, #tpu.memory_space<vmem>>, vector<1x32x32xf32>
    %713 = vector.shape_cast %712 : vector<1x32x32xf32> to vector<32x32xf32>
    %cst_255 = arith.constant dense<0.000000e+00> : vector<16x32xf32>
    %714 = tpu.matmul %711, %713, %cst_255 {dimension_numbers = #tpu.dot_dimension_numbers<[1], [0], [0], [1], [0, 0, 1, 1], [], []>} : vector<16x32xf32>, vector<32x32xf32>, vector<16x32xf32> -> vector<16x32xf32>
    %c31 = arith.constant 31 : index
    %c0_256 = arith.constant 0 : index
    %715 = vector.load %arg2[%c31, %c0_256] : memref<64x128xf32, #tpu.memory_space<vmem>>, vector<1x32xf32>
    %716 = vector.broadcast %715 : vector<1x32xf32> to vector<16x32xf32>
    %717 = arith.addf %714, %716 : vector<16x32xf32>
    %718 = arith.addf %639, %717 : vector<16x32xf32>
    %cst_257 = arith.constant dense<0.000000e+00> : vector<16xf32>
    %719 = vector.multi_reduction <add>, %718, %cst_257 [1] : vector<16x32xf32> to vector<16xf32>
    %720 = vector.shape_cast %719 : vector<16xf32> to vector<16x1xf32>
    %cst_258 = arith.constant 3.200000e+01 : f32
    %721 = vector.broadcast %cst_258 : f32 to vector<16x1xf32>
    %722 = arith.divf %720, %721 : vector<16x1xf32>
    %723 = vector.broadcast %722 : vector<16x1xf32> to vector<16x32xf32>
    %724 = arith.subf %718, %723 : vector<16x32xf32>
    %725 = arith.mulf %724, %724 : vector<16x32xf32>
    %cst_259 = arith.constant dense<0.000000e+00> : vector<16xf32>
    %726 = vector.multi_reduction <add>, %725, %cst_259 [1] : vector<16x32xf32> to vector<16xf32>
    %727 = vector.shape_cast %726 : vector<16xf32> to vector<16x1xf32>
    %cst_260 = arith.constant 3.200000e+01 : f32
    %728 = vector.broadcast %cst_260 : f32 to vector<16x1xf32>
    %729 = arith.divf %727, %728 : vector<16x1xf32>
    %730 = vector.broadcast %722 : vector<16x1xf32> to vector<16x32xf32>
    %731 = arith.subf %718, %730 : vector<16x32xf32>
    %cst_261 = arith.constant 9.99999974E-6 : f32
    %732 = vector.broadcast %cst_261 : f32 to vector<16x1xf32>
    %733 = arith.addf %729, %732 : vector<16x1xf32>
    %734 = math.rsqrt %733 : vector<16x1xf32>
    %735 = vector.broadcast %734 : vector<16x1xf32> to vector<16x32xf32>
    %736 = arith.mulf %731, %735 : vector<16x32xf32>
    %c36 = arith.constant 36 : index
    %c0_262 = arith.constant 0 : index
    %737 = vector.load %arg2[%c36, %c0_262] : memref<64x128xf32, #tpu.memory_space<vmem>>, vector<1x32xf32>
    %738 = vector.broadcast %737 : vector<1x32xf32> to vector<16x32xf32>
    %739 = arith.mulf %736, %738 : vector<16x32xf32>
    %c37 = arith.constant 37 : index
    %c0_263 = arith.constant 0 : index
    %740 = vector.load %arg2[%c37, %c0_263] : memref<64x128xf32, #tpu.memory_space<vmem>>, vector<1x32xf32>
    %741 = vector.broadcast %740 : vector<1x32xf32> to vector<16x32xf32>
    %742 = arith.addf %739, %741 : vector<16x32xf32>
    %c3_264 = arith.constant 3 : index
    %c0_265 = arith.constant 0 : index
    %c0_266 = arith.constant 0 : index
    %743 = vector.load %arg5[%c3_264, %c0_265, %c0_266] : memref<4x32x64xf32, #tpu.memory_space<vmem>>, vector<1x32x64xf32>
    %744 = vector.shape_cast %743 : vector<1x32x64xf32> to vector<32x64xf32>
    %cst_267 = arith.constant dense<0.000000e+00> : vector<16x64xf32>
    %745 = tpu.matmul %742, %744, %cst_267 {dimension_numbers = #tpu.dot_dimension_numbers<[1], [0], [0], [1], [0, 0, 1, 1], [], []>} : vector<16x32xf32>, vector<32x64xf32>, vector<16x64xf32> -> vector<16x64xf32>
    %c32 = arith.constant 32 : index
    %c0_268 = arith.constant 0 : index
    %746 = vector.load %arg2[%c32, %c0_268] : memref<64x128xf32, #tpu.memory_space<vmem>>, vector<1x64xf32>
    %747 = vector.broadcast %746 : vector<1x64xf32> to vector<16x64xf32>
    %748 = arith.addf %745, %747 : vector<16x64xf32>
    %cst_269 = arith.constant 0.000000e+00 : f32
    %749 = vector.broadcast %cst_269 : f32 to vector<16x64xf32>
    %750 = arith.maximumf %748, %749 : vector<16x64xf32>
    %c3_270 = arith.constant 3 : index
    %c0_271 = arith.constant 0 : index
    %c0_272 = arith.constant 0 : index
    %751 = vector.load %arg6[%c3_270, %c0_271, %c0_272] : memref<4x64x32xf32, #tpu.memory_space<vmem>>, vector<1x64x32xf32>
    %752 = vector.shape_cast %751 : vector<1x64x32xf32> to vector<64x32xf32>
    %cst_273 = arith.constant dense<0.000000e+00> : vector<16x32xf32>
    %753 = tpu.matmul %750, %752, %cst_273 {dimension_numbers = #tpu.dot_dimension_numbers<[1], [0], [0], [1], [0, 0, 1, 1], [], []>} : vector<16x64xf32>, vector<64x32xf32>, vector<16x32xf32> -> vector<16x32xf32>
    %c33 = arith.constant 33 : index
    %c0_274 = arith.constant 0 : index
    %754 = vector.load %arg2[%c33, %c0_274] : memref<64x128xf32, #tpu.memory_space<vmem>>, vector<1x32xf32>
    %755 = vector.broadcast %754 : vector<1x32xf32> to vector<16x32xf32>
    %756 = arith.addf %753, %755 : vector<16x32xf32>
    %757 = arith.addf %742, %756 : vector<16x32xf32>
    %cst_275 = arith.constant dense<0.000000e+00> : vector<16xf32>
    %758 = vector.multi_reduction <add>, %757, %cst_275 [1] : vector<16x32xf32> to vector<16xf32>
    %759 = vector.shape_cast %758 : vector<16xf32> to vector<16x1xf32>
    %cst_276 = arith.constant 3.200000e+01 : f32
    %760 = vector.broadcast %cst_276 : f32 to vector<16x1xf32>
    %761 = arith.divf %759, %760 : vector<16x1xf32>
    %762 = vector.broadcast %761 : vector<16x1xf32> to vector<16x32xf32>
    %763 = arith.subf %757, %762 : vector<16x32xf32>
    %764 = arith.mulf %763, %763 : vector<16x32xf32>
    %cst_277 = arith.constant dense<0.000000e+00> : vector<16xf32>
    %765 = vector.multi_reduction <add>, %764, %cst_277 [1] : vector<16x32xf32> to vector<16xf32>
    %766 = vector.shape_cast %765 : vector<16xf32> to vector<16x1xf32>
    %cst_278 = arith.constant 3.200000e+01 : f32
    %767 = vector.broadcast %cst_278 : f32 to vector<16x1xf32>
    %768 = arith.divf %766, %767 : vector<16x1xf32>
    %769 = vector.broadcast %761 : vector<16x1xf32> to vector<16x32xf32>
    %770 = arith.subf %757, %769 : vector<16x32xf32>
    %cst_279 = arith.constant 9.99999974E-6 : f32
    %771 = vector.broadcast %cst_279 : f32 to vector<16x1xf32>
    %772 = arith.addf %768, %771 : vector<16x1xf32>
    %773 = math.rsqrt %772 : vector<16x1xf32>
    %774 = vector.broadcast %773 : vector<16x1xf32> to vector<16x32xf32>
    %775 = arith.mulf %770, %774 : vector<16x32xf32>
    %c38 = arith.constant 38 : index
    %c0_280 = arith.constant 0 : index
    %776 = vector.load %arg2[%c38, %c0_280] : memref<64x128xf32, #tpu.memory_space<vmem>>, vector<1x32xf32>
    %777 = vector.broadcast %776 : vector<1x32xf32> to vector<16x32xf32>
    %778 = arith.mulf %775, %777 : vector<16x32xf32>
    %c39 = arith.constant 39 : index
    %c0_281 = arith.constant 0 : index
    %779 = vector.load %arg2[%c39, %c0_281] : memref<64x128xf32, #tpu.memory_space<vmem>>, vector<1x32xf32>
    %780 = vector.broadcast %779 : vector<1x32xf32> to vector<16x32xf32>
    %781 = arith.addf %778, %780 : vector<16x32xf32>
    %cst_282 = arith.constant dense<0.000000e+00> : vector<16xf32>
    %782 = vector.multi_reduction <add>, %781, %cst_282 [1] : vector<16x32xf32> to vector<16xf32>
    %783 = vector.shape_cast %782 : vector<16xf32> to vector<16x1xf32>
    %cst_283 = arith.constant 3.200000e+01 : f32
    %784 = vector.broadcast %cst_283 : f32 to vector<16x1xf32>
    %785 = arith.divf %783, %784 : vector<16x1xf32>
    %786 = vector.broadcast %785 : vector<16x1xf32> to vector<16x32xf32>
    %787 = arith.subf %781, %786 : vector<16x32xf32>
    %788 = arith.mulf %787, %787 : vector<16x32xf32>
    %cst_284 = arith.constant dense<0.000000e+00> : vector<16xf32>
    %789 = vector.multi_reduction <add>, %788, %cst_284 [1] : vector<16x32xf32> to vector<16xf32>
    %790 = vector.shape_cast %789 : vector<16xf32> to vector<16x1xf32>
    %cst_285 = arith.constant 3.200000e+01 : f32
    %791 = vector.broadcast %cst_285 : f32 to vector<16x1xf32>
    %792 = arith.divf %790, %791 : vector<16x1xf32>
    %793 = vector.broadcast %785 : vector<16x1xf32> to vector<16x32xf32>
    %794 = arith.subf %781, %793 : vector<16x32xf32>
    %cst_286 = arith.constant 9.99999974E-6 : f32
    %795 = vector.broadcast %cst_286 : f32 to vector<16x1xf32>
    %796 = arith.addf %792, %795 : vector<16x1xf32>
    %797 = math.rsqrt %796 : vector<16x1xf32>
    %798 = vector.broadcast %797 : vector<16x1xf32> to vector<16x32xf32>
    %799 = arith.mulf %794, %798 : vector<16x32xf32>
    %c40 = arith.constant 40 : index
    %c0_287 = arith.constant 0 : index
    %800 = vector.load %arg2[%c40, %c0_287] : memref<64x128xf32, #tpu.memory_space<vmem>>, vector<1x32xf32>
    %801 = vector.broadcast %800 : vector<1x32xf32> to vector<16x32xf32>
    %802 = arith.mulf %799, %801 : vector<16x32xf32>
    %c41 = arith.constant 41 : index
    %c0_288 = arith.constant 0 : index
    %803 = vector.load %arg2[%c41, %c0_288] : memref<64x128xf32, #tpu.memory_space<vmem>>, vector<1x32xf32>
    %804 = vector.broadcast %803 : vector<1x32xf32> to vector<16x32xf32>
    %805 = arith.addf %802, %804 : vector<16x32xf32>
    %c0_289 = arith.constant 0 : index
    %c0_290 = arith.constant 0 : index
    %806 = vector.load %arg8[%c0_289, %c0_290] : memref<16x32xf32, #tpu.memory_space<vmem>>, vector<16x32xf32>
    tpu.vector_store %arg8[%c0_289, %c0_290], %805 {strides = array<i32>} : memref<16x32xf32, #tpu.memory_space<vmem>>, vector<16x32xf32>,
    return
  }
}

</mosaic_0001>

<bundles_post_ra>
// kernel: transformer_forward.1
= control target key start
LH: loop header
LB: loop body
LE: loop exit
PB: predicated region body
PF: predicated region fallthrough
CT: control target
= control target key end

     0   :  { %15 = vsyncpa [#allocation3], 0  ;;  %s6255_s0 = inlined_call_operand.vmem [shape: f32[16,32], index: 0, kind: input, shape index: {}]   ;;  %s6256_s1 = inlined_call_operand.vmem [shape: f32[16,32], index: 1, kind: input, shape index: {}]   ;;  %s6257_s2 = inlined_call_operand.vmem [shape: f32[64,128], index: 2, kind: input, shape index: {}]   ;;  %s6258_s3 = inlined_call_operand.hbm [shape: f32[6,96,96], index: 3, kind: input, shape index: {}]   ;;  %s6259_s4 = inlined_call_operand.vmem [shape: f32[6,32,32], index: 4, kind: input, shape index: {}]   ;;  %s6260_s5 = inlined_call_operand.vmem [shape: f32[4,32,64], index: 5, kind: input, shape index: {}]   ;;  %s6261_s6 = inlined_call_operand.vmem [shape: f32[4,64,32], index: 6, kind: input, shape index: {}]   ;;  %s6262_s7 = inlined_call_operand.hbm [shape: f32[2,16,32], index: 7, kind: input, shape index: {}]   ;;  %s6263_s8 = inlined_call_operand.hbm [shape: f32[16,32], index: 8, kind: output, shape index: {0}]   ;;  %s6264_s9 = inlined_call_operand.hbm [shape: f32[16,32], index: 9, kind: output, shape index: {1}]  }
   0x1   :  { %16 = vsyncpa [#allocation6], 0 }
   0x2   :  { %17 = vsyncpa [#allocation4], 0 }
   0x3   :  { %18 = vsyncpa [#allocation9], 0  ;;  %s29_s11 = sshll.u32 %s6258_s3, 4  ;;  %s4818_s12 = smov [#allocation2]   ;;  %s30_s11 = int_to_ptr.hbm [resolvable:$true] %s29_s11 }
   0x4   :  { %s31_s13 = sshll.u32 %s4818_s12, 4  ;;  %s48_s16 = sshll.u32 %s6262_s7, 4  ;;  %s32_s13 = int_to_ptr.vmem [resolvable:$true] %s31_s13  ;;  %s49_s16 = int_to_ptr.hbm [resolvable:$true] %s48_s16 }
   0x5   :  { %s4819_s17 = smov 128   ;;  %s4820_s18 = smov 8  }
   0x6   :  { %37 = dma.hbm_to_vmem [thread:$0]  %s30_s11, 9216, %s32_s13, [#allocation3], %s4819_s17, %s4819_s17, %s4820_s18  }
   0x7   :  { %s4821_s19 = smov [#allocation5]  }
   0x8   :  { %s50_s20 = sshll.u32 %s4821_s19, 4  ;;  %s51_s20 = int_to_ptr.vmem [resolvable:$true] %s50_s20 }
   0x9   :  { %56 = dma.hbm_to_vmem [thread:$0]  %s49_s16, 512, %s51_s20, [#allocation6], %s4819_s17, %s4819_s17, %s4820_s18  }
   0xa   :  { %4810 = dma.done.wait [#allocation3], 9216  }
   0xb   :  { %4811 = vsyncadd [#allocation3], 4294958080 }
   0xc   :  { %4812 = dma.done.wait [#allocation6], 512  }
   0xd   :  { %4813 = vsyncadd [#allocation6], 4294966784  ;;  %v4904_v0 = vld [vmem:[%s6255_s0] sm:$0xff]  ;;  %v4909_v1 = vld [vmem:[%s6255_s0 + $0x8] sm:$0xff]  ;;  %s4822_s23 = smov 32   ;;  %s4823_s0 = smov 64  }
   0xe   :  { %73 = vrot.lane.b32.xlu0 %v4904_v0, %s4822_s23  ;;  %75 = vrot.lane.b32.xlu1 %v4909_v1, %s4822_s23  ;;  %v104_v2 = vld [vmem:[#allocation2 + $0x58] sm:$0xff]  ;;  %v103_v3 = vld [vmem:[#allocation2 + $0x50] sm:$0xff]  ;;  %v102_v4 = vld [vmem:[#allocation2 + $0x48] sm:$0xff]  ;;  %vm87_vm0 = vcmask 261120   ;;  %vm90_vm1 = vcmask 523264   ;;  %vm107_vm2 = vcmask 785408  }
   0xf   :  { %118 = vmatpush.msra.mxu0 %v104_v2  ;;  %v101_v5 = vld [vmem:[#allocation2 + $0x40] sm:$0xff]  ;;  %v66_v7 = vld [vmem:[%s6256_s1 + $0x8] sm:$0xff]  ;;  %v100_v8 = vld [vmem:[#allocation2 + $0x38] sm:$0xff]  ;;  %s4824_s29 = smov 88   ;;  %s4825_s30 = smov 96   ;;  %vm143_vm3 = vcmask 64512  }
  0x10   :  { %v65_v6 = vld [vmem:[%s6256_s1] sm:$0xff]  ;;  %v99_v9 = vld [vmem:[#allocation2 + $0x30] sm:$0xff]  ;;  %v98_v10 = vld [vmem:[#allocation2 + $0x28] sm:$0xff]  ;;  %s4826_s10 = smov 120   ;;  %vm175_vm4 = vcmask 130048   ;;  %s4827_s15 = smov 80  }
  0x11   :  { %119 = vmatpush.msra.mxu0 %v103_v3  ;;  %v97_v11 = vld [vmem:[#allocation2 + $0x20] sm:$0xff]  ;;  %v96_v12 = vld [vmem:[#allocation2 + $0x18] sm:$0xff]  ;;  %v95_v13 = vld [vmem:[#allocation2 + $0x10] sm:$0xff]  ;;  %s4828_s16 = smov 56   ;;  %s4829_s19 = smov 112   ;;  %vm549_vm5 = vcmask 195584  }
  0x12   :  { %v94_v14 = vld [vmem:[#allocation2 + $0x8] sm:$0xff]  ;;  %v93_v15 = vld [vmem:[#allocation2] sm:$0xff]  ;;  %v4963_v35 = vld [vmem:[%s6257_s2 + $0x30] sm:$0xff]  ;;  %s4830_s20 = smov 72   ;;  %s4831_s3 = smov 104  }
  0x13   :  { %120 = vmatpush.msra.mxu0 %v102_v4  ;;  %v4428_v24 = vld [vmem:[%s6257_s2] ss:$0 sm:$0xff]  ;;  %v4970_v39 = vld [vmem:[%s6257_s2 + $0x38] sm:$0xff]  ;;  %s4832_s7 = smov 48   ;;  %s4833_s21 = smov 40  }
  0x14   :  { %s4834_s22 = smov 16   ;;  %s4835_s24 = smov 24  }
  0x15   :  { %121 = vmatpush.msra.mxu0 %v101_v5 }
  0x16   :  { %81 = vrot.lane.b32.xlu0 %v65_v6, %s4823_s0  ;;  %83 = vrot.lane.b32.xlu1 %v66_v7, %s4823_s0 }
  0x17   :  { %122 = vmatpush.msra.mxu0 %v100_v8 }
  0x19   :  { %123 = vmatpush.msra.mxu0 %v99_v9 }
  0x1b   :  { %124 = vmatpush.msra.mxu0 %v98_v10 }
  0x1d   :  { %125 = vmatpush.msra.mxu0 %v97_v11 }
  0x1f   :  { %126 = vmatpush.msra.mxu0 %v96_v12 }
  0x21   :  { %127 = vmatpush.msra.mxu0 %v95_v13 }
  0x23   :  { %128 = vmatpush.msra.mxu0 %v94_v14 }
  0x25   :  { %129 = vmatpush.msra.mxu0 %v93_v15 }
  0x80   :  { %v74_v16 = vpop.permute.xlu0 %73  ;;  %v76_v17 = vpop.permute.xlu1 %75 }
  0x81   :  { %v88_v18 = vsel %vm87_vm0, %v4904_v0, %v74_v16  ;;  %v89_v21 = vsel %vm87_vm0, %v4909_v1, %v76_v17 }
  0x88   :  { %v4925_v19 = vpop.permute.xlu0 %81  ;;  %v4932_v22 = vpop.permute.xlu1 %83 }
  0x89   :  { %v91_v20 = vsel %vm90_vm1, %v88_v18, %v4925_v19  ;;  %v92_v23 = vsel %vm90_vm1, %v89_v21, %v4932_v22 }
  0x8a   :  { %4047 = vmatmul.msk.f32.vlgmr.msra.gmra.mxu0 %vm107_vm2, %v91_v20 }
  0x92   :  { %4048 = vmatmul.msk.f32.gmra.mxu0 %vm107_vm2, %v92_v23 }
 0x107   :  { %v131_v25 = vpop.f32.mrf.mxu0 }
 0x108   :  { %v132_v26 = vadd.f32 %v4428_v24, %v131_v25 }
 0x10a   :  { %237 = vrot.lane.b32.xlu1 %v132_v26, %s4824_s29 }
 0x10f   :  { %v134_v27 = vpop.f32.mrf.mxu0 }
 0x110   :  { %v4941_v28 = vadd.f32 %v4428_v24, %v134_v27 }
 0x112   :  { %239 = vrot.lane.b32.xlu0 %v4941_v28, %s4824_s29  ;;  %141 = vrot.lane.b32.xlu2 %v4941_v28, %s4825_s30  ;;  %v4981_v49 = vpack.i.bf16 %v132_v26, %v4941_v28 }
 0x11a   :  { %235 = vrot.lane.b32.xlu0 %v4941_v28, %s4826_s10  ;;  %139 = vrot.lane.b32.xlu2 %v132_v26, %s4825_s30 }
 0x122   :  { %233 = vrot.lane.b32.xlu2 %v132_v26, %s4826_s10 }
 0x16c   :  { %v142_v29 = vpop.permute.xlu2 %141 }
 0x16d   :  { %4049 = vmatpush.xpose.msk.msra.mxu1 %vm143_vm3, %v142_v29 }
 0x174   :  { %v140_v30 = vpop.permute.xlu2 %139 }
 0x175   :  { %4050 = vmatpush.xpose.msk.msra.mxu1 %vm143_vm3, %v140_v30 }
 0x178   :  { %4051 = vmatmul.msk.f32.vlgmr.msra.gmra.mxu1 %vm143_vm3, %v132_v26 }
 0x17c   :  { %v238_v32 = vpop.permute.xlu1 %237  ;;  %v234_v33 = vpop.permute.xlu2 %233 }
 0x180   :  { %4052 = vmatmul.msk.f32.gmra.mxu1 %vm143_vm3, %v4941_v28 }
 0x184   :  { %v240_v31 = vpop.permute.xlu0 %239 }
 0x185   :  { %4055 = vmatpush.xpose.msk.msra.mxu3 %vm143_vm3, %v240_v31 }
 0x189   :  { %4056 = vmatpush.xpose.msk.msra.mxu3 %vm143_vm3, %v238_v32 }
 0x18c   :  { %4057 = vmatmul.msk.f32.vlgmr.msra.gmra.mxu3 %vm143_vm3, %v234_v33  ;;  %v236_v34 = vpop.permute.xlu0 %235 }
 0x194   :  { %4058 = vmatmul.msk.f32.gmra.mxu3 %vm143_vm3, %v236_v34 }
 0x1f5   :  { %v169_v36 = vpop.f32.mrf.mxu1 }
 0x1f6   :  { %v170_v37 = vadd.f32 %v169_v36, %v4963_v35 }
 0x1f8   :  { %v176_v38 = vsel %vm175_vm4, %v170_v37, -inf }
 0x1f9   :  { %177 = vmax.xlane.f32.xlu1 %v176_v38 }
 0x1fd   :  { %v172_v40 = vpop.f32.mrf.mxu1 }
 0x1fe   :  { %v173_v41 = vadd.f32 %v172_v40, %v4970_v39 }
 0x200   :  { %v179_v42 = vsel %vm175_vm4, %v173_v41, -inf }
 0x201   :  { %180 = vmax.xlane.f32.xlu2 %v179_v42 }
 0x20f   :  { %v266_v43 = vpop.f32.mrf.mxu3 }
 0x210   :  { %v267_v44 = vadd.f32 %v266_v43, %v4963_v35 }
 0x212   :  { %335 = vrot.lane.b32.xlu1 %v4941_v28, %s4827_s15  ;;  %v272_v45 = vsel %vm175_vm4, %v267_v44, -inf }
 0x213   :  { %273 = vmax.xlane.f32.xlu0 %v272_v45 }
 0x217   :  { %v269_v46 = vpop.f32.mrf.mxu3 }
 0x218   :  { %v270_v47 = vadd.f32 %v269_v46, %v4970_v39 }
 0x21a   :  { %v275_v48 = vsel %vm175_vm4, %v270_v47, -inf }
 0x21b   :  { %276 = vmax.xlane.f32.xlu2 %v275_v48 }
 0x227   :  { %4314 = vrot.lane.b32.xlu0 %v4981_v49, %s4828_s16 }
 0x22f   :  { %333 = vrot.lane.b32.xlu0 %v132_v26, %s4827_s15 }
 0x233   :  { %4309 = vrot.lane.b32.xlu2 %v4981_v49, %s4823_s0 }
 0x237   :  { %329 = vrot.lane.b32.xlu0 %v132_v26, %s4829_s19 }
 0x23b   :  { %431 = vrot.lane.b32.xlu2 %v4941_v28, %s4830_s20 }
 0x243   :  { %429 = vrot.lane.b32.xlu2 %v132_v26, %s4830_s20 }
 0x24b   :  { %425 = vrot.lane.b32.xlu2 %v132_v26, %s4831_s3 }
 0x26c   :  { %v178_v50 = vpop.xlane.xlu1 %177 }
 0x26d   :  { %v182_v51 = vsub.f32 %v170_v37, %v178_v50 }
 0x26f   :  { %v184_v52 = vmul.f32 1.442695, %v182_v51 }
 0x271   :  { %4470 = vpow2.f32 %v184_v52 }
 0x274   :  { %v181_v53 = vpop.xlane.xlu2 %180 }
 0x275   :  { %v183_v54 = vsub.f32 %v173_v41, %v181_v53 }
 0x277   :  { %v4471_v55 = vpop.eup %4470  ;;  %v186_v56 = vmul.f32 1.442695, %v183_v54 }
 0x278   :  { %v188_v57 = vsel %vm175_vm4, %v4471_v55, 0.0 }
 0x279   :  { %4472 = vpow2.f32 %v186_v56  ;;  %189 = vadd.xlane.f32.xlu1 %v188_v57 }
 0x27f   :  { %v4473_v58 = vpop.eup %4472 }
 0x280   :  { %v191_v59 = vsel %vm175_vm4, %v4473_v58, 0.0 }
 0x281   :  { %192 = vadd.xlane.f32.xlu0 %v191_v59 }
 0x284   :  { %v336_v60 = vpop.permute.xlu1 %335 }
 0x285   :  { %4061 = vmatpush.xpose.msk.msrb.mxu1 %vm143_vm3, %v336_v60 }
 0x286   :  { %v274_v61 = vpop.xlane.xlu0 %273 }
 0x287   :  { %v278_v62 = vsub.f32 %v267_v44, %v274_v61 }
 0x289   :  { %v280_v63 = vmul.f32 1.442695, %v278_v62 }
 0x28b   :  { %4474 = vpow2.f32 %v280_v63 }
 0x28e   :  { %v277_v2 = vpop.xlane.xlu2 %276 }
 0x28f   :  { %v279_v3 = vsub.f32 %v270_v47, %v277_v2 }
 0x291   :  { %v4475_v4 = vpop.eup %4474  ;;  %v282_v5 = vmul.f32 1.442695, %v279_v3 }
 0x292   :  { %v284_v6 = vsel %vm175_vm4, %v4475_v4, 0.0 }
 0x293   :  { %4476 = vpow2.f32 %v282_v5  ;;  %285 = vadd.xlane.f32.xlu1 %v284_v6 }
 0x295   :  { %427 = vrot.lane.b32.xlu0 %v4941_v28, %s4831_s3 }
 0x296   :  { %v4310_v7 = vpop.permute.xlu2 %4309 }
 0x297   :  { %v4311_v8 = vunpack.i.l.bf16 %v4310_v7  ;;  %v4312_v11 = vunpack.i.h.bf16 %v4310_v7 }
 0x299   :  { %v4477_v9 = vpop.eup %4476  ;;  %v4315_v10 = vpop.permute.xlu0 %4314  ;;  %224 = vmatpush.msra.mxu2 %v4311_v8 }
 0x29a   :  { %v287_v12 = vsel %vm175_vm4, %v4477_v9, 0.0  ;;  %v4316_v13 = vunpack.i.l.bf16 %v4315_v10  ;;  %v4317_v14 = vunpack.i.h.bf16 %v4315_v10 }
 0x29b   :  { %288 = vadd.xlane.f32.xlu1 %v287_v12  ;;  %225 = vmatpush.msra.mxu2 %v4312_v11 }
 0x29d   :  { %320 = vmatpush.msrb.mxu2 %v4316_v13 }
 0x29e   :  { %v432_v18 = vpop.permute.xlu2 %431 }
 0x29f   :  { %321 = vmatpush.msrb.mxu2 %v4317_v14 }
 0x2a1   :  { %v334_v15 = vpop.permute.xlu0 %333 }
 0x2a2   :  { %4062 = vmatpush.xpose.msk.msrb.mxu1 %vm143_vm3, %v334_v15 }
 0x2a6   :  { %v430_v24 = vpop.permute.xlu2 %429 }
 0x2a9   :  { %v330_v16 = vpop.permute.xlu0 %329 }
 0x2aa   :  { %4063 = vmatmul.msk.f32.vlgmr.msrb.gmra.mxu1 %vm143_vm3, %v330_v16 }
 0x2ae   :  { %v426_v33 = vpop.permute.xlu2 %425 }
 0x2b4   :  { %331 = vrot.lane.b32.xlu1 %v4941_v28, %s4829_s19 }
 0x2ec   :  { %v190_v17 = vpop.xlane.xlu1 %189 }
 0x2ed   :  { %4478 = vrcp.f32 %v190_v17 }
 0x2f3   :  { %v4479_v20 = vpop.eup %4478 }
 0x2f4   :  { %v193_v21 = vpop.xlane.xlu0 %192  ;;  %v196_v23 = vmul.f32 %v4479_v20, %v4471_v55 }
 0x2f5   :  { %4480 = vrcp.f32 %v193_v21 }
 0x2f6   :  { %4053 = vmatmul.msk.f32.vlgmr.msra.gmra.mxu2 %vm175_vm4, %v196_v23 }
 0x2f7   :  { %4067 = vmatpush.xpose.msk.msra.mxu2 %vm143_vm3, %v432_v18 }
 0x2fb   :  { %v4481_v25 = vpop.eup %4480  ;;  %4068 = vmatpush.xpose.msk.msra.mxu2 %vm143_vm3, %v430_v24 }
 0x2fc   :  { %v197_v26 = vmul.f32 %v4481_v25, %v4473_v58 }
 0x2fe   :  { %4054 = vmatmul.msk.f32.gmra.mxu2 %vm175_vm4, %v197_v26 }
 0x306   :  { %v286_v27 = vpop.xlane.xlu1 %285 }
 0x307   :  { %4482 = vrcp.f32 %v286_v27  ;;  %v428_v36 = vpop.permute.xlu0 %427 }
 0x30d   :  { %v4483_v28 = vpop.eup %4482 }
 0x30e   :  { %v289_v29 = vpop.xlane.xlu1 %288  ;;  %v292_v30 = vmul.f32 %v4483_v28, %v4475_v4 }
 0x30f   :  { %4484 = vrcp.f32 %v289_v29 }
 0x310   :  { %4059 = vmatmul.msk.f32.vlgmr.msrb.gmra.mxu2 %vm175_vm4, %v292_v30 }
 0x315   :  { %v4485_v31 = vpop.eup %4484 }
 0x316   :  { %v293_v32 = vmul.f32 %v4485_v31, %v4477_v9 }
 0x318   :  { %4060 = vmatmul.msk.f32.gmra.mxu2 %vm175_vm4, %v293_v32 }
 0x320   :  { %4069 = vmatmul.msk.f32.vlgmr.msra.gmra.mxu2 %vm143_vm3, %v426_v33 }
 0x326   :  { %v332_v34 = vpop.permute.xlu1 %331 }
 0x327   :  { %v362_v37 = vpop.f32.mrf.mxu1  ;;  %4064 = vmatmul.msk.f32.gmra.mxu1 %vm143_vm3, %v332_v34 }
 0x328   :  { %v363_v38 = vadd.f32 %v362_v37, %v4963_v35  ;;  %4070 = vmatmul.msk.f32.gmra.mxu2 %vm143_vm3, %v428_v36  ;;  %v555_v37 = vld [vmem:[%s6259_s4 + $0x18] sm:$0xff] }
 0x329   :  { %576 = vmatpush.msra.mxu1 %v555_v37 }
 0x32a   :  { %v368_v40 = vsel %vm175_vm4, %v363_v38, -inf }
 0x32b   :  { %369 = vmax.xlane.f32.xlu2 %v368_v40  ;;  %v553_v40 = vld [vmem:[%s6259_s4 + $0x8] sm:$0xff] }
 0x379   :  { %v5015_v41 = vpop.f32.mrf.mxu2 }
 0x381   :  { %v5017_v42 = vpop.f32.mrf.mxu2 }
 0x393   :  { %v323_v43 = vpop.f32.mrf.mxu2 }
 0x39b   :  { %v326_v44 = vpop.f32.mrf.mxu2 }
 0x39e   :  { %v370_v45 = vpop.xlane.xlu2 %369 }
 0x39f   :  { %v374_v46 = vsub.f32 %v363_v38, %v370_v45  ;;  %v554_v38 = vld [vmem:[%s6259_s4 + $0x10] sm:$0xff] }
 0x3a0   :  { %577 = vmatpush.msra.mxu1 %v554_v38 }
 0x3a1   :  { %v376_v47 = vmul.f32 1.442695, %v374_v46 }
 0x3a2   :  { %578 = vmatpush.msra.mxu1 %v553_v40 }
 0x3a3   :  { %v458_v48 = vpop.f32.mrf.mxu2  ;;  %4486 = vpow2.f32 %v376_v47 }
 0x3a4   :  { %v459_v50 = vadd.f32 %v458_v48, %v4963_v35  ;;  %v365_v51 = vpop.f32.mrf.mxu1 }
 0x3a5   :  { %v366_v52 = vadd.f32 %v365_v51, %v4970_v39 }
 0x3a6   :  { %v464_v53 = vsel %vm175_vm4, %v459_v50, -inf }
 0x3a7   :  { %465 = vmax.xlane.f32.xlu1 %v464_v53  ;;  %v371_v54 = vsel %vm175_vm4, %v366_v52, -inf }
 0x3a8   :  { %372 = vmax.xlane.f32.xlu0 %v371_v54 }
 0x3a9   :  { %v4487_v55 = vpop.eup %4486 }
 0x3aa   :  { %v380_v59 = vsel %vm175_vm4, %v4487_v55, 0.0 }
 0x3ab   :  { %v461_v56 = vpop.f32.mrf.mxu2 }
 0x3ac   :  { %v462_v57 = vadd.f32 %v461_v56, %v4970_v39 }
 0x3ae   :  { %v467_v58 = vsel %vm175_vm4, %v462_v57, -inf }
 0x3af   :  { %468 = vmax.xlane.f32.xlu2 %v467_v58  ;;  %381 = vadd.xlane.f32.xlu1 %v380_v59 }
 0x3bc   :  { %4319 = vrot.lane.b32.xlu0 %v4981_v49, %s4832_s7 }
 0x3c4   :  { %523 = vrot.lane.b32.xlu0 %v323_v43, %s4820_s18  ;;  %v552_v43 = vld [vmem:[%s6259_s4] sm:$0xff] }
 0x3c5   :  { %579 = vmatpush.msra.mxu1 %v552_v43 }
 0x41a   :  { %v466_v60 = vpop.xlane.xlu1 %465 }
 0x41b   :  { %v470_v61 = vsub.f32 %v459_v50, %v466_v60  ;;  %v373_v62 = vpop.xlane.xlu0 %372 }
 0x41c   :  { %v375_v63 = vsub.f32 %v366_v52, %v373_v62 }
 0x41d   :  { %v472_v2 = vmul.f32 1.442695, %v470_v61 }
 0x41e   :  { %v378_v3 = vmul.f32 1.442695, %v375_v63 }
 0x41f   :  { %4488 = vpow2.f32 %v472_v2  ;;  %v4836_v2 = vmov 32.0  }
 0x420   :  { %4490 = vpow2.f32 %v378_v3 }
 0x422   :  { %v469_v4 = vpop.xlane.xlu2 %468  ;;  %v382_v9 = vpop.xlane.xlu1 %381 }
 0x423   :  { %v471_v5 = vsub.f32 %v462_v57, %v469_v4 }
 0x425   :  { %v4489_v6 = vpop.eup %4488  ;;  %v474_v7 = vmul.f32 1.442695, %v471_v5 }
 0x426   :  { %v4491_v8 = vpop.eup %4490  ;;  %v476_v10 = vsel %vm175_vm4, %v4489_v6, 0.0 }
 0x427   :  { %4492 = vpow2.f32 %v474_v7  ;;  %477 = vadd.xlane.f32.xlu2 %v476_v10  ;;  %v383_v11 = vsel %vm175_vm4, %v4491_v8, 0.0 }
 0x428   :  { %384 = vadd.xlane.f32.xlu1 %v383_v11  ;;  %4494 = vrcp.f32 %v382_v9 }
 0x42d   :  { %v4493_v12 = vpop.eup %4492 }
 0x42e   :  { %v4320_v13 = vpop.permute.xlu0 %4319  ;;  %v479_v14 = vsel %vm175_vm4, %v4493_v12, 0.0  ;;  %v4495_v15 = vpop.eup %4494 }
 0x42f   :  { %v4321_v16 = vunpack.i.l.bf16 %v4320_v13  ;;  %v4322_v17 = vunpack.i.h.bf16 %v4320_v13  ;;  %v388_v18 = vmul.f32 %v4495_v15, %v4487_v55 }
 0x430   :  { %480 = vadd.xlane.f32.xlu1 %v479_v14 }
 0x431   :  { %416 = vmatpush.msrb.mxu3 %v4321_v16 }
 0x433   :  { %417 = vmatpush.msrb.mxu3 %v4322_v17  ;;  %v651_v17 = vld [vmem:[%s6260_s5 + $0x18] sm:$0xff] }
 0x434   :  { %4065 = vmatmul.msk.f32.vlgmr.msrb.gmra.mxu3 %vm175_vm4, %v388_v18  ;;  %v650_v18 = vld [vmem:[%s6260_s5 + $0x10] sm:$0xff] }
 0x435   :  { %672 = vmatpush.msra.mxu3 %v651_v17 }
 0x437   :  { %673 = vmatpush.msra.mxu3 %v650_v18 }
 0x43f   :  { %4324 = vrot.lane.b32.xlu2 %v4981_v49, %s4833_s21 }
 0x447   :  { %525 = vrot.lane.b32.xlu2 %v326_v44, %s4820_s18  ;;  %v524_v44 = vpop.permute.xlu0 %523 }
 0x448   :  { %v545_v46 = vsel %vm143_vm3, %v5015_v41, %v524_v44  ;;  %v4429_v41 = vld [vmem:[%s6257_s2 + $0x1] ss:$0 sm:$0xff]  ;;  %v4430_v44 = vld [vmem:[%s6257_s2 + $0x4] ss:$0 sm:$0xff] }
 0x49a   :  { %v478_v20 = vpop.xlane.xlu2 %477 }
 0x49b   :  { %v385_v21 = vpop.xlane.xlu1 %384 }
 0x49c   :  { %4496 = vrcp.f32 %v385_v21  ;;  %v648_v21 = vld [vmem:[%s6260_s5] sm:$0xff] }
 0x49d   :  { %4498 = vrcp.f32 %v478_v20  ;;  %v649_v20 = vld [vmem:[%s6260_s5 + $0x8] sm:$0xff] }
 0x49e   :  { %674 = vmatpush.msra.mxu3 %v649_v20 }
 0x4a0   :  { %675 = vmatpush.msra.mxu3 %v648_v21 }
 0x4a2   :  { %v4497_v23 = vpop.eup %4496  ;;  %v4325_v24 = vpop.permute.xlu2 %4324 }
 0x4a3   :  { %v4499_v25 = vpop.eup %4498  ;;  %v481_v26 = vpop.xlane.xlu1 %480  ;;  %v389_v27 = vmul.f32 %v4497_v23, %v4491_v8  ;;  %v4326_v28 = vunpack.i.l.bf16 %v4325_v24  ;;  %v4327_v29 = vunpack.i.h.bf16 %v4325_v24 }
 0x4a4   :  { %4500 = vrcp.f32 %v481_v26  ;;  %v484_v30 = vmul.f32 %v4499_v25, %v4489_v6  ;;  %v692_v26 = vld [vmem:[%s6261_s6 + $0x38] sm:$0xff] }
 0x4a5   :  { %4066 = vmatmul.msk.f32.gmra.mxu3 %vm175_vm4, %v389_v27  ;;  %512 = vmatpush.msrb.mxu0 %v4326_v28  ;;  %4502 = vrcp.f32 %v4836_v2  ;;  %v691_v27 = vld [vmem:[%s6261_s6 + $0x30] sm:$0xff]  ;;  %v690_v28 = vld [vmem:[%s6261_s6 + $0x28] sm:$0xff] }
 0x4a6   :  { %709 = vmatpush.msrb.mxu2 %v692_v26 }
 0x4a7   :  { %513 = vmatpush.msrb.mxu0 %v4327_v29 }
 0x4a8   :  { %4071 = vmatmul.msk.f32.vlgmr.msrb.gmra.mxu0 %vm175_vm4, %v484_v30  ;;  %710 = vmatpush.msrb.mxu2 %v691_v27 }
 0x4aa   :  { %v4501_v49 = vpop.eup %4500  ;;  %v526_v50 = vpop.permute.xlu2 %525  ;;  %711 = vmatpush.msrb.mxu2 %v690_v28 }
 0x4ab   :  { %v485_v31 = vmul.f32 %v4501_v49, %v4493_v12  ;;  %v546_v52 = vsel %vm143_vm3, %v5017_v42, %v526_v50  ;;  %v4503_v3 = vpop.eup %4502  ;;  %v689_v49 = vld [vmem:[%s6261_s6 + $0x20] sm:$0xff] }
 0x4ac   :  { %v596_v4 = vmul.f32 32.0, %v4503_v3  ;;  %vm600_vm6 = vweird.f32 %v4503_v3  ;;  %712 = vmatpush.msrb.mxu2 %v689_v49  ;;  %v4431_v50 = vld [vmem:[%s6257_s2 + $0x5] ss:$0 sm:$0xff]  ;;  %v800_v49 = vld [vmem:[#allocation2 + $0xa8] sm:$0xff] }
 0x4ae   :  { %v597_v5 = vsub.f32 1.0, %v596_v4 }
 0x4b0   :  { %4072 = vmatmul.msk.f32.gmra.mxu0 %vm175_vm4, %v485_v31  ;;  %v598_v6 = vmul.f32 %v4503_v3, %v597_v5 }
 0x4b2   :  { %v599_v7 = vadd.f32 %v4503_v3, %v598_v6  ;;  %v4433_v6 = vld [vmem:[%s6257_s2 + $0x3] ss:$0 sm:$0xff] }
 0x4b4   :  { %v5072_v8 = vsel %vm600_vm6, %v4503_v3, %v599_v7 }
 0x4b7   :  { %v419_v32 = vpop.f32.mrf.mxu3 }
 0x4b8   :  { %531 = vrot.lane.b32.xlu1 %v419_v32, %s4834_s22 }
 0x525   :  { %v515_v33 = vpop.f32.mrf.mxu0 }
 0x526   :  { %539 = vrot.lane.b32.xlu0 %v515_v33, %s4835_s24 }
 0x528   :  { %v422_v34 = vpop.f32.mrf.mxu3 }
 0x52a   :  { %v532_v45 = vpop.permute.xlu1 %531 }
 0x52b   :  { %v547_v47 = vsel %vm175_vm4, %v545_v46, %v532_v45 }
 0x52d   :  { %v518_v36 = vpop.f32.mrf.mxu0 }
 0x52e   :  { %533 = vrot.lane.b32.xlu0 %v422_v34, %s4834_s22  ;;  %541 = vrot.lane.b32.xlu2 %v518_v36, %s4835_s24  ;;  %v688_v34 = vld [vmem:[%s6261_s6 + $0x18] sm:$0xff] }
 0x52f   :  { %713 = vmatpush.msrb.mxu2 %v688_v34 }
 0x588   :  { %v542_v54 = vpop.permute.xlu2 %541 }
 0x598   :  { %v540_v48 = vpop.permute.xlu0 %539 }
 0x599   :  { %v550_v51 = vsel %vm549_vm5, %v547_v47, %v540_v48 }
 0x59a   :  { %4073 = vmatmul.msk.f32.vlgmr.msra.gmra.mxu1 %vm87_vm0, %v550_v51 }
 0x5a0   :  { %v534_v53 = vpop.permute.xlu0 %533 }
 0x5a1   :  { %v548_v55 = vsel %vm175_vm4, %v546_v52, %v534_v53 }
 0x5a2   :  { %v551_v56 = vsel %vm549_vm5, %v548_v55, %v542_v54 }
 0x5a3   :  { %4074 = vmatmul.msk.f32.gmra.mxu1 %vm87_vm0, %v551_v56 }
 0x617   :  { %v581_v57 = vpop.f32.mrf.mxu1 }
 0x618   :  { %v582_v58 = vadd.f32 %v4429_v41, %v581_v57 }
 0x61a   :  { %v587_v59 = vadd.f32 %v582_v58, %v4904_v0 }
 0x61c   :  { %v589_v60 = vsel %vm87_vm0, %v587_v59, 0.0 }
 0x61d   :  { %590 = vadd.xlane.f32.xlu0 %v589_v60  ;;  %v686_v60 = vld [vmem:[%s6261_s6 + $0x8] sm:$0xff] }
 0x620   :  { %v584_v42 = vpop.f32.mrf.mxu1 }
 0x621   :  { %v585_v61 = vadd.f32 %v4429_v41, %v584_v42  ;;  %v685_v42 = vld [vmem:[%s6261_s6] sm:$0xff] }
 0x623   :  { %v588_v62 = vadd.f32 %v585_v61, %v4909_v1  ;;  %v4432_v61 = vld [vmem:[%s6257_s2 + $0x2] ss:$0 sm:$0xff] }
 0x625   :  { %v592_v63 = vsel %vm87_vm0, %v588_v62, 0.0 }
 0x626   :  { %593 = vadd.xlane.f32.xlu1 %v592_v63 }
 0x690   :  { %v591_v0 = vpop.xlane.xlu0 %590 }
 0x691   :  { %v602_v9 = vmul.f32 %v5072_v8, %v591_v0 }
 0x693   :  { %v604_v10 = vsub.f32 %v587_v59, %v602_v9  ;;  %v687_v59 = vld [vmem:[%s6261_s6 + $0x10] sm:$0xff] }
 0x694   :  { %714 = vmatpush.msrb.mxu2 %v687_v59 }
 0x695   :  { %v606_v11 = vmul.f32 %v604_v10, %v604_v10 }
 0x696   :  { %715 = vmatpush.msrb.mxu2 %v686_v60 }
 0x697   :  { %v608_v1 = vsel %vm87_vm0, %v606_v11, 0.0 }
 0x698   :  { %609 = vadd.xlane.f32.xlu2 %v608_v1  ;;  %716 = vmatpush.msrb.mxu2 %v685_v42 }
 0x699   :  { %v594_v12 = vpop.xlane.xlu1 %593 }
 0x69a   :  { %v603_v13 = vmul.f32 %v5072_v8, %v594_v12 }
 0x69c   :  { %v605_v14 = vsub.f32 %v588_v62, %v603_v13 }
 0x69e   :  { %v607_v15 = vmul.f32 %v605_v14, %v605_v14 }
 0x6a0   :  { %v611_v16 = vsel %vm87_vm0, %v607_v15, 0.0 }
 0x6a1   :  { %612 = vadd.xlane.f32.xlu0 %v611_v16 }
 0x70b   :  { %v610_v23 = vpop.xlane.xlu2 %609 }
 0x70c   :  { %v614_v24 = vmul.f32 %v610_v23, %v5072_v8 }
 0x70e   :  { %v616_v25 = vadd.f32 1e-05, %v614_v24 }
 0x710   :  { %4504 = vrsqrt.f32 %v616_v25  ;;  %vm624_vm8 = vweird.f32 %v616_v25 }
 0x714   :  { %v613_v29 = vpop.xlane.xlu0 %612 }
 0x715   :  { %v615_v30 = vmul.f32 %v613_v29, %v5072_v8  ;;  %v802_v29 = vld [vmem:[#allocation2 + $0xb8] sm:$0xff] }
 0x716   :  { %v4505_v31 = vpop.eup %4504  ;;  %815 = vmatpush.msra.mxu0 %v802_v29 }
 0x717   :  { %v619_v32 = vmul.f32 %v4505_v31, %v616_v25  ;;  %v617_v33 = vadd.f32 1e-05, %v615_v30  ;;  %vm625_vm7 = vweird.f32 %v4505_v31  ;;  %v801_v30 = vld [vmem:[#allocation2 + $0xb0] sm:$0xff] }
 0x718   :  { %vm626_vm9 = vmor %vm624_vm8, %vm625_vm7  ;;  %816 = vmatpush.msra.mxu0 %v801_v30 }
 0x719   :  { %v620_v36 = vmul.f32 %v4505_v31, %v619_v32  ;;  %4506 = vrsqrt.f32 %v617_v33  ;;  %vm634_vm11 = vweird.f32 %v617_v33 }
 0x71a   :  { %817 = vmatpush.msra.mxu0 %v800_v49 }
 0x71b   :  { %v621_v37 = vmul.f32 0.5, %v620_v36 }
 0x71d   :  { %v622_v38 = vsub.f32 1.5, %v621_v37 }
 0x71f   :  { %v4507_v40 = vpop.eup %4506  ;;  %v623_v43 = vmul.f32 %v4505_v31, %v622_v38  ;;  %v798_v38 = vld [vmem:[#allocation2 + $0x98] sm:$0xff] }
 0x720   :  { %v629_v45 = vmul.f32 %v4507_v40, %v617_v33  ;;  %vm635_vm10 = vweird.f32 %v4507_v40  ;;  %v799_v33 = vld [vmem:[#allocation2 + $0xa0] sm:$0xff] }
 0x721   :  { %v627_v46 = vsel %vm626_vm9, %v4505_v31, %v623_v43  ;;  %vm636_vm12 = vmor %vm634_vm11, %vm635_vm10  ;;  %818 = vmatpush.msra.mxu0 %v799_v33  ;;  %v797_v43 = vld [vmem:[#allocation2 + $0x90] sm:$0xff] }
 0x722   :  { %v638_v47 = vmul.f32 %v627_v46, %v604_v10  ;;  %v630_v48 = vmul.f32 %v4507_v40, %v629_v45  ;;  %v796_v45 = vld [vmem:[#allocation2 + $0x88] sm:$0xff] }
 0x723   :  { %819 = vmatpush.msra.mxu0 %v798_v38 }
 0x724   :  { %v642_v51 = vmul.f32 %v4430_v44, %v638_v47  ;;  %v631_v52 = vmul.f32 0.5, %v630_v48  ;;  %v795_v47 = vld [vmem:[#allocation2 + $0x80] sm:$0xff] }
 0x725   :  { %820 = vmatpush.msra.mxu0 %v797_v43 }
 0x726   :  { %v632_v53 = vsub.f32 1.5, %v631_v52  ;;  %v646_v54 = vadd.f32 %v4431_v50, %v642_v51  ;;  %v794_v51 = vld [vmem:[#allocation2 + $0x78] sm:$0xff] }
 0x727   :  { %821 = vmatpush.msra.mxu0 %v796_v45 }
 0x728   :  { %v633_v55 = vmul.f32 %v4507_v40, %v632_v53  ;;  %4075 = vmatmul.msk.f32.vlgmr.msra.gmra.mxu3 %vm87_vm0, %v646_v54  ;;  %v4434_v53 = vld [vmem:[%s6257_s2 + $0x6] ss:$0 sm:$0xff] }
 0x729   :  { %822 = vmatpush.msra.mxu0 %v795_v47 }
 0x72a   :  { %v637_v56 = vsel %vm636_vm12, %v4507_v40, %v633_v55  ;;  %v793_v55 = vld [vmem:[#allocation2 + $0x70] sm:$0xff] }
 0x72b   :  { %v639_v41 = vmul.f32 %v637_v56, %v605_v14  ;;  %823 = vmatpush.msra.mxu0 %v794_v51 }
 0x72d   :  { %v643_v57 = vmul.f32 %v4430_v44, %v639_v41  ;;  %824 = vmatpush.msra.mxu0 %v793_v55 }
 0x72f   :  { %v647_v58 = vadd.f32 %v4431_v50, %v643_v57  ;;  %v4435_v57 = vld [vmem:[%s6257_s2 + $0x7] ss:$0 sm:$0xff] }
 0x731   :  { %4076 = vmatmul.msk.f32.gmra.mxu3 %vm87_vm0, %v647_v58 }
 0x7ab   :  { %v677_v62 = vpop.f32.mrf.mxu3 }
 0x7ac   :  { %v678_v63 = vadd.f32 %v4432_v61, %v677_v62 }
 0x7ae   :  { %v683_v2 = vmax.f32 %v678_v63, 0.0 }
 0x7b0   :  { %4077 = vmatmul.msk.f32.vlgmr.msrb.gmra.mxu2 %vm90_vm1, %v683_v2 }
 0x7b4   :  { %v680_v3 = vpop.f32.mrf.mxu3 }
 0x7b5   :  { %v681_v4 = vadd.f32 %v4432_v61, %v680_v3 }
 0x7b7   :  { %v684_v5 = vmax.f32 %v681_v4, 0.0 }
 0x7b9   :  { %4078 = vmatmul.msk.f32.gmra.mxu2 %vm90_vm1, %v684_v5  ;;  %v791_v5 = vld [vmem:[#allocation2 + $0x60] sm:$0xff] }
 0x833   :  { %v718_v7 = vpop.f32.mrf.mxu2 }
 0x834   :  { %v719_v0 = vadd.f32 %v4433_v6, %v718_v7 }
 0x836   :  { %v724_v9 = vadd.f32 %v719_v0, %v646_v54 }
 0x838   :  { %v726_v10 = vsel %vm87_vm0, %v724_v9, 0.0 }
 0x839   :  { %727 = vadd.xlane.f32.xlu1 %v726_v10 }
 0x83c   :  { %v721_v11 = vpop.f32.mrf.mxu2 }
 0x83d   :  { %v722_v1 = vadd.f32 %v4433_v6, %v721_v11 }
 0x83f   :  { %v725_v12 = vadd.f32 %v722_v1, %v647_v58  ;;  %v792_v58 = vld [vmem:[#allocation2 + $0x68] sm:$0xff] }
 0x840   :  { %825 = vmatpush.msra.mxu0 %v792_v58  ;;  %v4436_v1 = vld [vmem:[%s6257_s2 + $0x8] ss:$0 sm:$0xff] }
 0x841   :  { %v729_v13 = vsel %vm87_vm0, %v725_v12, 0.0 }
 0x842   :  { %730 = vadd.xlane.f32.xlu2 %v729_v13  ;;  %826 = vmatpush.msra.mxu0 %v791_v5 }
 0x8ac   :  { %v728_v14 = vpop.xlane.xlu1 %727 }
 0x8ad   :  { %v732_v15 = vmul.f32 %v728_v14, %v5072_v8 }
 0x8af   :  { %v734_v16 = vsub.f32 %v724_v9, %v732_v15 }
 0x8b1   :  { %v736_v17 = vmul.f32 %v734_v16, %v734_v16 }
 0x8b3   :  { %v738_v18 = vsel %vm87_vm0, %v736_v17, 0.0 }
 0x8b4   :  { %739 = vadd.xlane.f32.xlu0 %v738_v18 }
 0x8b5   :  { %v731_v20 = vpop.xlane.xlu2 %730 }
 0x8b6   :  { %v733_v21 = vmul.f32 %v731_v20, %v5072_v8 }
 0x8b8   :  { %v735_v23 = vsub.f32 %v725_v12, %v733_v21 }
 0x8ba   :  { %v737_v24 = vmul.f32 %v735_v23, %v735_v23 }
 0x8bc   :  { %v741_v25 = vsel %vm87_vm0, %v737_v24, 0.0 }
 0x8bd   :  { %742 = vadd.xlane.f32.xlu1 %v741_v25 }
 0x927   :  { %v740_v26 = vpop.xlane.xlu0 %739 }
 0x928   :  { %v744_v27 = vmul.f32 %v740_v26, %v5072_v8 }
 0x92a   :  { %v746_v28 = vadd.f32 1e-05, %v744_v27 }
 0x92c   :  { %4508 = vrsqrt.f32 %v746_v28  ;;  %vm754_vm14 = vweird.f32 %v746_v28 }
 0x930   :  { %v743_v31 = vpop.xlane.xlu1 %742 }
 0x931   :  { %v745_v32 = vmul.f32 %v743_v31, %v5072_v8 }
 0x932   :  { %v4509_v34 = vpop.eup %4508 }
 0x933   :  { %v749_v36 = vmul.f32 %v4509_v34, %v746_v28  ;;  %v747_v37 = vadd.f32 1e-05, %v745_v32  ;;  %vm755_vm13 = vweird.f32 %v4509_v34 }
 0x934   :  { %vm756_vm15 = vmor %vm754_vm14, %vm755_vm13 }
 0x935   :  { %v750_v40 = vmul.f32 %v4509_v34, %v749_v36  ;;  %4510 = vrsqrt.f32 %v747_v37  ;;  %vm764_vm7 = vweird.f32 %v747_v37 }
 0x937   :  { %v751_v44 = vmul.f32 0.5, %v750_v40 }
 0x939   :  { %v752_v46 = vsub.f32 1.5, %v751_v44 }
 0x93b   :  { %v4511_v48 = vpop.eup %4510  ;;  %v753_v50 = vmul.f32 %v4509_v34, %v752_v46 }
 0x93c   :  { %v759_v52 = vmul.f32 %v4511_v48, %v747_v37  ;;  %vm765_vm6 = vweird.f32 %v4511_v48 }
 0x93d   :  { %v757_v54 = vsel %vm756_vm15, %v4509_v34, %v753_v50  ;;  %vm766_vm8 = vmor %vm764_vm7, %vm765_vm6 }
 0x93e   :  { %v760_v56 = vmul.f32 %v4511_v48, %v759_v52  ;;  %v768_v41 = vmul.f32 %v757_v54, %v734_v16 }
 0x940   :  { %v761_v59 = vmul.f32 0.5, %v760_v56  ;;  %v772_v60 = vmul.f32 %v4434_v53, %v768_v41 }
 0x942   :  { %v762_v42 = vsub.f32 1.5, %v761_v59  ;;  %v5146_v61 = vadd.f32 %v4435_v57, %v772_v60 }
 0x944   :  { %v763_v62 = vmul.f32 %v4511_v48, %v762_v42  ;;  %780 = vrot.lane.b32.xlu2 %v5146_v61, %s4822_s23 }
 0x946   :  { %v767_v63 = vsel %vm766_vm8, %v4511_v48, %v763_v62 }
 0x947   :  { %v769_v2 = vmul.f32 %v767_v63, %v735_v23 }
 0x949   :  { %v773_v3 = vmul.f32 %v4434_v53, %v769_v2  ;;  %v5214_v2 = vld [vmem:[%s6257_s2 + $0x38] sm:$0xff] }
 0x94b   :  { %v5150_v4 = vadd.f32 %v4435_v57, %v773_v3 }
 0x94d   :  { %782 = vrot.lane.b32.xlu0 %v5150_v4, %s4822_s23 }
 0x99e   :  { %v781_v6 = vpop.permute.xlu2 %780 }
 0x99f   :  { %v786_v7 = vsel %vm87_vm0, %v5146_v61, %v781_v6  ;;  %v5221_v6 = vld [vmem:[%s6257_s2 + $0x30] sm:$0xff] }
 0x9a0   :  { %v788_v0 = vsel %vm90_vm1, %v786_v7, %v4925_v19 }
 0x9a1   :  { %4079 = vmatmul.msk.f32.vlgmr.msra.gmra.mxu0 %vm107_vm2, %v788_v0 }
 0x9bf   :  { %v783_v9 = vpop.permute.xlu0 %782 }
 0x9c0   :  { %v787_v10 = vsel %vm87_vm0, %v5150_v4, %v783_v9 }
 0x9c1   :  { %v789_v11 = vsel %vm90_vm1, %v787_v10, %v4932_v22 }
 0x9c2   :  { %4080 = vmatmul.msk.f32.gmra.mxu0 %vm107_vm2, %v789_v11 }
 0xa1e   :  { %v828_v12 = vpop.f32.mrf.mxu0 }
 0xa1f   :  { %v829_v13 = vadd.f32 %v4436_v1, %v828_v12 }
 0xa21   :  { %836 = vrot.lane.b32.xlu0 %v829_v13, %s4825_s30 }
 0xa29   :  { %932 = vrot.lane.b32.xlu0 %v829_v13, %s4824_s29 }
 0xa3f   :  { %v831_v14 = vpop.f32.mrf.mxu0 }
 0xa40   :  { %v832_v15 = vadd.f32 %v4436_v1, %v831_v14 }
 0xa42   :  { %1126 = vrot.lane.b32.xlu0 %v832_v15, %s4830_s20  ;;  %838 = vrot.lane.b32.xlu1 %v832_v15, %s4825_s30  ;;  %v5181_v26 = vpack.i.bf16 %v829_v13, %v832_v15 }
 0xa4a   :  { %1024 = vrot.lane.b32.xlu0 %v829_v13, %s4829_s19 }
 0xa93   :  { %v837_v17 = vpop.permute.xlu0 %836 }
 0xa9b   :  { %v933_v29 = vpop.permute.xlu0 %932 }
 0xab4   :  { %v839_v16 = vpop.permute.xlu1 %838  ;;  %v1127_v36 = vpop.permute.xlu0 %1126 }
 0xab5   :  { %4081 = vmatpush.xpose.msk.msrb.mxu1 %vm143_vm3, %v839_v16 }
 0xab9   :  { %4082 = vmatpush.xpose.msk.msrb.mxu1 %vm143_vm3, %v837_v17 }
 0xabc   :  { %4083 = vmatmul.msk.f32.vlgmr.msrb.gmra.mxu1 %vm143_vm3, %v829_v13  ;;  %v1025_v52 = vpop.permute.xlu0 %1024 }
 0xac4   :  { %4084 = vmatmul.msk.f32.gmra.mxu1 %vm143_vm3, %v832_v15 }
 0xb39   :  { %v865_v18 = vpop.f32.mrf.mxu1 }
 0xb3a   :  { %v866_v20 = vadd.f32 %v865_v18, %v4963_v35 }
 0xb3c   :  { %v871_v21 = vsel %vm175_vm4, %v866_v20, -inf }
 0xb3d   :  { %872 = vmax.xlane.f32.xlu2 %v871_v21 }
 0xb41   :  { %v868_v23 = vpop.f32.mrf.mxu1 }
 0xb42   :  { %v869_v24 = vadd.f32 %v868_v23, %v4970_v39 }
 0xb44   :  { %v874_v25 = vsel %vm175_vm4, %v869_v24, -inf }
 0xb45   :  { %875 = vmax.xlane.f32.xlu1 %v874_v25 }
 0xb55   :  { %934 = vrot.lane.b32.xlu2 %v832_v15, %s4824_s29 }
 0xb5d   :  { %928 = vrot.lane.b32.xlu2 %v829_v13, %s4826_s10 }
 0xb5e   :  { %4329 = vrot.lane.b32.xlu1 %v5181_v26, %s4823_s0 }
 0xb65   :  { %1030 = vrot.lane.b32.xlu2 %v832_v15, %s4827_s15 }
 0xb66   :  { %930 = vrot.lane.b32.xlu1 %v832_v15, %s4826_s10 }
 0xb6d   :  { %1124 = vrot.lane.b32.xlu2 %v829_v13, %s4830_s20 }
 0xb6e   :  { %1028 = vrot.lane.b32.xlu1 %v829_v13, %s4827_s15 }
 0xb75   :  { %1026 = vrot.lane.b32.xlu2 %v832_v15, %s4829_s19 }
 0xb76   :  { %1120 = vrot.lane.b32.xlu1 %v829_v13, %s4831_s3 }
 0xbb0   :  { %v873_v39 = vpop.xlane.xlu2 %872 }
 0xbb1   :  { %v877_v27 = vsub.f32 %v866_v20, %v873_v39 }
 0xbb3   :  { %v879_v28 = vmul.f32 1.442695, %v877_v27 }
 0xbb5   :  { %4512 = vpow2.f32 %v879_v28 }
 0xbb8   :  { %v876_v30 = vpop.xlane.xlu1 %875  ;;  %v935_v49 = vpop.permute.xlu2 %934 }
 0xbb9   :  { %v878_v31 = vsub.f32 %v869_v24, %v876_v30  ;;  %4087 = vmatpush.xpose.msk.msra.mxu2 %vm143_vm3, %v935_v49 }
 0xbbb   :  { %v4513_v32 = vpop.eup %4512  ;;  %v881_v33 = vmul.f32 1.442695, %v878_v31 }
 0xbbc   :  { %v883_v34 = vsel %vm175_vm4, %v4513_v32, 0.0 }
 0xbbd   :  { %4514 = vpow2.f32 %v881_v33  ;;  %884 = vadd.xlane.f32.xlu0 %v883_v34  ;;  %4088 = vmatpush.xpose.msk.msra.mxu2 %vm143_vm3, %v933_v29 }
 0xbc0   :  { %v929_v37 = vpop.permute.xlu2 %928 }
 0xbc1   :  { %4099 = vmatpush.xpose.msk.msrb.mxu2 %vm143_vm3, %v1127_v36 }
 0xbc2   :  { %4089 = vmatmul.msk.f32.vlgmr.msra.gmra.mxu2 %vm143_vm3, %v929_v37 }
 0xbc3   :  { %v4515_v38 = vpop.eup %4514 }
 0xbc4   :  { %v886_v40 = vsel %vm175_vm4, %v4515_v38, 0.0 }
 0xbc5   :  { %887 = vadd.xlane.f32.xlu0 %v886_v40 }
 0xbc8   :  { %v1031_v43 = vpop.permute.xlu2 %1030 }
 0xbd0   :  { %v4330_v44 = vpop.permute.xlu1 %4329  ;;  %v1125_v45 = vpop.permute.xlu2 %1124 }
 0xbd1   :  { %v4331_v46 = vunpack.i.l.bf16 %v4330_v44  ;;  %4100 = vmatpush.xpose.msk.msrb.mxu2 %vm143_vm3, %v1125_v45  ;;  %v4332_v47 = vunpack.i.h.bf16 %v4330_v44 }
 0xbd3   :  { %919 = vmatpush.msrb.mxu3 %v4331_v46 }
 0xbd5   :  { %920 = vmatpush.msrb.mxu3 %v4332_v47 }
 0xbd7   :  { %4093 = vmatpush.xpose.msk.msra.mxu3 %vm143_vm3, %v1031_v43 }
 0xbd8   :  { %v931_v48 = vpop.permute.xlu1 %930  ;;  %v1027_v62 = vpop.permute.xlu2 %1026 }
 0xbd9   :  { %1122 = vrot.lane.b32.xlu0 %v832_v15, %s4831_s3  ;;  %4090 = vmatmul.msk.f32.gmra.mxu2 %vm143_vm3, %v931_v48 }
 0xbe0   :  { %v1029_v50 = vpop.permute.xlu1 %1028 }
 0xbe1   :  { %4094 = vmatpush.xpose.msk.msra.mxu3 %vm143_vm3, %v1029_v50 }
 0xbe8   :  { %v1121_v51 = vpop.permute.xlu1 %1120 }
 0xbe9   :  { %4101 = vmatmul.msk.f32.vlgmr.msrb.gmra.mxu2 %vm143_vm3, %v1121_v51 }
 0xc30   :  { %v885_v53 = vpop.xlane.xlu0 %884 }
 0xc31   :  { %4516 = vrcp.f32 %v885_v53 }
 0xc37   :  { %v4517_v54 = vpop.eup %4516 }
 0xc38   :  { %v891_v55 = vmul.f32 %v4517_v54, %v4513_v32  ;;  %v888_v56 = vpop.xlane.xlu0 %887 }
 0xc39   :  { %4518 = vrcp.f32 %v888_v56 }
 0xc3a   :  { %4085 = vmatmul.msk.f32.vlgmr.msrb.gmra.mxu3 %vm175_vm4, %v891_v55 }
 0xc3f   :  { %v4519_v41 = vpop.eup %4518 }
 0xc40   :  { %v892_v57 = vmul.f32 %v4519_v41, %v4515_v38 }
 0xc42   :  { %4086 = vmatmul.msk.f32.gmra.mxu3 %vm175_vm4, %v892_v57 }
 0xc45   :  { %v961_v58 = vpop.f32.mrf.mxu2 }
 0xc46   :  { %v962_v59 = vadd.f32 %v961_v58, %v4963_v35 }
 0xc48   :  { %v967_v60 = vsel %vm175_vm4, %v962_v59, -inf }
 0xc49   :  { %968 = vmax.xlane.f32.xlu1 %v967_v60 }
 0xc4a   :  { %4095 = vmatmul.msk.f32.vlgmr.msra.gmra.mxu3 %vm143_vm3, %v1025_v52 }
 0xc4b   :  { %v1123_v42 = vpop.permute.xlu0 %1122 }
 0xc4c   :  { %4102 = vmatmul.msk.f32.gmra.mxu2 %vm143_vm3, %v1123_v42 }
 0xc52   :  { %4096 = vmatmul.msk.f32.gmra.mxu3 %vm143_vm3, %v1027_v62 }
 0xc5c   :  { %v964_v63 = vpop.f32.mrf.mxu2 }
 0xc5d   :  { %v965_v3 = vadd.f32 %v5214_v2, %v964_v63 }
 0xc5f   :  { %v970_v35 = vsel %vm175_vm4, %v965_v3, -inf }
 0xc60   :  { %971 = vmax.xlane.f32.xlu2 %v970_v35 }
 0xc6c   :  { %v1153_v5 = vpop.f32.mrf.mxu2 }
 0xc6d   :  { %v1154_v7 = vadd.f32 %v5221_v6, %v1153_v5 }
 0xc6f   :  { %v1159_v0 = vsel %vm175_vm4, %v1154_v7, -inf }
 0xc70   :  { %1160 = vmax.xlane.f32.xlu2 %v1159_v0 }
 0xcbc   :  { %v969_v9 = vpop.xlane.xlu1 %968 }
 0xcbd   :  { %v973_v10 = vsub.f32 %v962_v59, %v969_v9  ;;  %v5225_v11 = vpop.f32.mrf.mxu3 }
 0xcbf   :  { %v975_v1 = vmul.f32 1.442695, %v973_v10 }
 0xcc1   :  { %4520 = vpow2.f32 %v975_v1 }
 0xcc5   :  { %v5227_v12 = vpop.f32.mrf.mxu3 }
 0xcc7   :  { %v4521_v13 = vpop.eup %4520 }
 0xcc8   :  { %v979_v14 = vsel %vm175_vm4, %v4521_v13, 0.0 }
 0xcc9   :  { %980 = vadd.xlane.f32.xlu2 %v979_v14 }
 0xccd   :  { %v1057_v15 = vpop.f32.mrf.mxu3 }
 0xcce   :  { %v1058_v16 = vadd.f32 %v5221_v6, %v1057_v15 }
 0xccf   :  { %v1156_v18 = vpop.f32.mrf.mxu2 }
 0xcd0   :  { %v1063_v17 = vsel %vm175_vm4, %v1058_v16, -inf  ;;  %v1157_v21 = vadd.f32 %v5214_v2, %v1156_v18 }
 0xcd1   :  { %1064 = vmax.xlane.f32.xlu0 %v1063_v17 }
 0xcd2   :  { %v1162_v28 = vsel %vm175_vm4, %v1157_v21, -inf }
 0xcd3   :  { %v972_v20 = vpop.xlane.xlu2 %971 }
 0xcd4   :  { %v974_v23 = vsub.f32 %v965_v3, %v972_v20 }
 0xcd5   :  { %v1060_v24 = vpop.f32.mrf.mxu3 }
 0xcd6   :  { %v977_v25 = vmul.f32 1.442695, %v974_v23  ;;  %v1061_v39 = vadd.f32 %v5214_v2, %v1060_v24 }
 0xcd8   :  { %4522 = vpow2.f32 %v977_v25  ;;  %v1066_v27 = vsel %vm175_vm4, %v1061_v39, -inf }
 0xcd9   :  { %1067 = vmax.xlane.f32.xlu1 %v1066_v27  ;;  %1163 = vmax.xlane.f32.xlu0 %v1162_v28 }
 0xcde   :  { %v4523_v29 = vpop.eup %4522 }
 0xcdf   :  { %v982_v30 = vsel %vm175_vm4, %v4523_v29, 0.0 }
 0xce1   :  { %983 = vadd.xlane.f32.xlu0 %v982_v30  ;;  %v4107_v30 = vld [vmem:[%s6259_s4 + $0x30] sm:$0xff] }
 0xce3   :  { %v1161_v49 = vpop.xlane.xlu2 %1160 }
 0xce4   :  { %v1165_v31 = vsub.f32 %v1154_v7, %v1161_v49  ;;  %v4106_v49 = vld [vmem:[%s6259_s4 + $0x28] sm:$0xff] }
 0xce6   :  { %v1167_v32 = vmul.f32 1.442695, %v1165_v31  ;;  %v4105_v31 = vld [vmem:[%s6259_s4 + $0x20] sm:$0xff] }
 0xce8   :  { %4524 = vpow2.f32 %v1167_v32 }
 0xcee   :  { %v4525_v33 = vpop.eup %4524 }
 0xcef   :  { %v1171_v34 = vsel %vm175_vm4, %v4525_v33, 0.0 }
 0xcf0   :  { %1172 = vadd.xlane.f32.xlu0 %v1171_v34 }
 0xcf2   :  { %4334 = vrot.lane.b32.xlu1 %v5181_v26, %s4828_s16 }
 0xcfa   :  { %4344 = vrot.lane.b32.xlu1 %v5181_v26, %s4833_s21 }
 0xd3c   :  { %v981_v53 = vpop.xlane.xlu2 %980 }
 0xd44   :  { %v1065_v36 = vpop.xlane.xlu0 %1064 }
 0xd45   :  { %v1069_v37 = vsub.f32 %v1058_v16, %v1065_v36 }
 0xd47   :  { %v1071_v38 = vmul.f32 1.442695, %v1069_v37 }
 0xd49   :  { %4526 = vpow2.f32 %v1071_v38 }
 0xd4c   :  { %v1068_v40 = vpop.xlane.xlu1 %1067  ;;  %v1164_v43 = vpop.xlane.xlu0 %1163 }
 0xd4d   :  { %v1070_v44 = vsub.f32 %v1061_v39, %v1068_v40  ;;  %v1166_v47 = vsub.f32 %v1157_v21, %v1164_v43 }
 0xd4f   :  { %v4527_v45 = vpop.eup %4526  ;;  %v1073_v46 = vmul.f32 1.442695, %v1070_v44  ;;  %v1169_v50 = vmul.f32 1.442695, %v1166_v47 }
 0xd50   :  { %v1075_v48 = vsel %vm175_vm4, %v4527_v45, 0.0 }
 0xd51   :  { %4528 = vpow2.f32 %v1073_v46  ;;  %1076 = vadd.xlane.f32.xlu2 %v1075_v48 }
 0xd52   :  { %4530 = vpow2.f32 %v1169_v50 }
 0xd53   :  { %4532 = vrcp.f32 %v981_v53 }
 0xd54   :  { %v984_v56 = vpop.xlane.xlu0 %983 }
 0xd55   :  { %4534 = vrcp.f32 %v984_v56 }
 0xd57   :  { %v4529_v51 = vpop.eup %4528 }
 0xd58   :  { %v1078_v52 = vsel %vm175_vm4, %v4529_v51, 0.0  ;;  %v4531_v54 = vpop.eup %4530 }
 0xd59   :  { %1079 = vadd.xlane.f32.xlu0 %v1078_v52  ;;  %v1174_v55 = vsel %vm175_vm4, %v4531_v54, 0.0  ;;  %v4533_v57 = vpop.eup %4532 }
 0xd5a   :  { %v987_v60 = vmul.f32 %v4533_v57, %v4521_v13 }
 0xd5b   :  { %v4535_v63 = vpop.eup %4534 }
 0xd5c   :  { %v988_v5 = vmul.f32 %v4535_v63, %v4523_v29  ;;  %v4108_v29 = vld [vmem:[%s6259_s4 + $0x38] sm:$0xff] }
 0xd5d   :  { %1271 = vmatpush.msrb.mxu3 %v4108_v29 }
 0xd5f   :  { %1272 = vmatpush.msrb.mxu3 %v4107_v30 }
 0xd61   :  { %1175 = vadd.xlane.f32.xlu0 %v1174_v55  ;;  %1273 = vmatpush.msrb.mxu3 %v4106_v49  ;;  %v4439_v49 = vld [vmem:[%s6257_s2 + $0xd] ss:$0 sm:$0xff] }
 0xd63   :  { %v1173_v42 = vpop.xlane.xlu0 %1172  ;;  %1274 = vmatpush.msrb.mxu3 %v4105_v31 }
 0xd64   :  { %v4335_v41 = vpop.permute.xlu1 %4334  ;;  %4536 = vrcp.f32 %v1173_v42 }
 0xd65   :  { %v4336_v58 = vunpack.i.l.bf16 %v4335_v41  ;;  %v4337_v59 = vunpack.i.h.bf16 %v4335_v41 }
 0xd67   :  { %1015 = vmatpush.msra.mxu1 %v4336_v58 }
 0xd69   :  { %1016 = vmatpush.msra.mxu1 %v4337_v59  ;;  %4339 = vrot.lane.b32.xlu2 %v5181_v26, %s4832_s7 }
 0xd6a   :  { %4091 = vmatmul.msk.f32.vlgmr.msra.gmra.mxu1 %vm175_vm4, %v987_v60  ;;  %v4537_v7 = vpop.eup %4536 }
 0xd6b   :  { %v1179_v0 = vmul.f32 %v4537_v7, %v4525_v33 }
 0xd6c   :  { %v4345_v62 = vpop.permute.xlu1 %4344 }
 0xd6d   :  { %v4346_v3 = vunpack.i.l.bf16 %v4345_v62  ;;  %v4347_v35 = vunpack.i.h.bf16 %v4345_v62 }
 0xd6f   :  { %1207 = vmatpush.msrb.mxu1 %v4346_v3  ;;  %v4113_v3 = vld [vmem:[%s6260_s5 + $0x30] sm:$0xff] }
 0xd71   :  { %1208 = vmatpush.msrb.mxu1 %v4347_v35  ;;  %v4112_v35 = vld [vmem:[%s6260_s5 + $0x28] sm:$0xff] }
 0xd72   :  { %4092 = vmatmul.msk.f32.gmra.mxu1 %vm175_vm4, %v988_v5  ;;  %v4111_v5 = vld [vmem:[%s6260_s5 + $0x20] sm:$0xff] }
 0xd7a   :  { %4103 = vmatmul.msk.f32.vlgmr.msrb.gmra.mxu1 %vm175_vm4, %v1179_v0 }
 0xdc4   :  { %v1077_v9 = vpop.xlane.xlu2 %1076 }
 0xdc5   :  { %4538 = vrcp.f32 %v1077_v9 }
 0xdcb   :  { %v4539_v1 = vpop.eup %4538 }
 0xdcc   :  { %v4340_v26 = vpop.permute.xlu2 %4339  ;;  %v1080_v10 = vpop.xlane.xlu0 %1079  ;;  %v1083_v15 = vmul.f32 %v4539_v1, %v4527_v45  ;;  %v4122_v1 = vld [vmem:[%s6261_s6 + $0x68] sm:$0xff] }
 0xdcd   :  { %v4341_v13 = vunpack.i.l.bf16 %v4340_v26  ;;  %v4342_v14 = vunpack.i.h.bf16 %v4340_v26  ;;  %4540 = vrcp.f32 %v1080_v10  ;;  %v4124_v26 = vld [vmem:[%s6261_s6 + $0x78] sm:$0xff]  ;;  %v4123_v10 = vld [vmem:[%s6261_s6 + $0x70] sm:$0xff] }
 0xdce   :  { %1399 = vmatpush.msra.mxu2 %v4124_v26 }
 0xdcf   :  { %1111 = vmatpush.msrb.mxu0 %v4341_v13 }
 0xdd0   :  { %1400 = vmatpush.msra.mxu2 %v4123_v10 }
 0xdd1   :  { %1112 = vmatpush.msrb.mxu0 %v4342_v14 }
 0xdd2   :  { %4097 = vmatmul.msk.f32.vlgmr.msrb.gmra.mxu0 %vm175_vm4, %v1083_v15  ;;  %1401 = vmatpush.msra.mxu2 %v4122_v1 }
 0xdd3   :  { %v4541_v17 = vpop.eup %4540 }
 0xdd4   :  { %v1176_v16 = vpop.xlane.xlu0 %1175  ;;  %v1084_v18 = vmul.f32 %v4541_v17, %v4529_v51  ;;  %v4121_v17 = vld [vmem:[%s6261_s6 + $0x60] sm:$0xff] }
 0xdd5   :  { %4542 = vrcp.f32 %v1176_v16  ;;  %1402 = vmatpush.msra.mxu2 %v4121_v17 }
 0xdda   :  { %4098 = vmatmul.msk.f32.gmra.mxu0 %vm175_vm4, %v1084_v18 }
 0xddb   :  { %v4543_v20 = vpop.eup %4542 }
 0xddc   :  { %v1180_v21 = vmul.f32 %v4543_v20, %v4531_v54 }
 0xdde   :  { %4104 = vmatmul.msk.f32.gmra.mxu1 %vm175_vm4, %v1180_v21  ;;  %v4120_v21 = vld [vmem:[%s6261_s6 + $0x58] sm:$0xff] }
 0xddf   :  { %1403 = vmatpush.msra.mxu2 %v4120_v21  ;;  %v1493_v21 = vld [vmem:[#allocation2 + $0x100] sm:$0xff] }
 0xde7   :  { %v1018_v23 = vpop.f32.mrf.mxu1 }
 0xde8   :  { %1218 = vrot.lane.b32.xlu1 %v1018_v23, %s4820_s18 }
 0xdef   :  { %v1021_v24 = vpop.f32.mrf.mxu1 }
 0xdf0   :  { %1220 = vrot.lane.b32.xlu1 %v1021_v24, %s4820_s18 }
 0xdf7   :  { %v1210_v25 = vpop.f32.mrf.mxu1 }
 0xdf8   :  { %1234 = vrot.lane.b32.xlu2 %v1210_v25, %s4835_s24 }
 0xe4f   :  { %v1114_v39 = vpop.f32.mrf.mxu0 }
 0xe50   :  { %1226 = vrot.lane.b32.xlu0 %v1114_v39, %s4834_s22  ;;  %v4438_v39 = vld [vmem:[%s6257_s2 + $0xc] ss:$0 sm:$0xff] }
 0xe52   :  { %v1235_v36 = vpop.permute.xlu2 %1234 }
 0xe57   :  { %v1117_v27 = vpop.f32.mrf.mxu0 }
 0xe58   :  { %1228 = vrot.lane.b32.xlu2 %v1117_v27, %s4834_s22 }
 0xe5a   :  { %v1219_v32 = vpop.permute.xlu1 %1218 }
 0xe5b   :  { %v1213_v28 = vpop.f32.mrf.mxu1  ;;  %v1240_v33 = vsel %vm143_vm3, %v5225_v11, %v1219_v32  ;;  %v4437_v11 = vld [vmem:[%s6257_s2 + $0x9] ss:$0 sm:$0xff] }
 0xe5c   :  { %1236 = vrot.lane.b32.xlu1 %v1213_v28, %s4835_s24 }
 0xe62   :  { %v1221_v40 = vpop.permute.xlu1 %1220 }
 0xe63   :  { %v1241_v44 = vsel %vm143_vm3, %v5227_v12, %v1221_v40 }
 0xeb2   :  { %v1229_v43 = vpop.permute.xlu2 %1228 }
 0xeb3   :  { %v1243_v45 = vsel %vm175_vm4, %v1241_v44, %v1229_v43 }
 0xec2   :  { %v1227_v34 = vpop.permute.xlu0 %1226 }
 0xec3   :  { %v1242_v37 = vsel %vm175_vm4, %v1240_v33, %v1227_v34 }
 0xec4   :  { %v1244_v38 = vsel %vm549_vm5, %v1242_v37, %v1235_v36 }
 0xec5   :  { %4109 = vmatmul.msk.f32.vlgmr.msrb.gmra.mxu3 %vm87_vm0, %v1244_v38 }
 0xece   :  { %v1237_v46 = vpop.permute.xlu1 %1236 }
 0xecf   :  { %v1245_v47 = vsel %vm549_vm5, %v1243_v45, %v1237_v46  ;;  %v4119_v45 = vld [vmem:[%s6261_s6 + $0x50] sm:$0xff]  ;;  %v4118_v46 = vld [vmem:[%s6261_s6 + $0x48] sm:$0xff] }
 0xed0   :  { %4110 = vmatmul.msk.f32.gmra.mxu3 %vm87_vm0, %v1245_v47  ;;  %1404 = vmatpush.msra.mxu2 %v4119_v45  ;;  %v4117_v47 = vld [vmem:[%s6261_s6 + $0x40] sm:$0xff] }
 0xed2   :  { %1405 = vmatpush.msra.mxu2 %v4118_v46 }
 0xed4   :  { %1406 = vmatpush.msra.mxu2 %v4117_v47  ;;  %v1492_v47 = vld [vmem:[#allocation2 + $0xf8] sm:$0xff] }
 0xf48   :  { %v1276_v48 = vpop.f32.mrf.mxu3 }
 0xf49   :  { %v1277_v50 = vadd.f32 %v4437_v11, %v1276_v48 }
 0xf4b   :  { %v1282_v51 = vadd.f32 %v1277_v50, %v5146_v61 }
 0xf4d   :  { %v1284_v52 = vsel %vm87_vm0, %v1282_v51, 0.0 }
 0xf4e   :  { %1285 = vadd.xlane.f32.xlu2 %v1284_v52 }
 0xf53   :  { %v1279_v53 = vpop.f32.mrf.mxu3 }
 0xf54   :  { %v1280_v12 = vadd.f32 %v4437_v11, %v1279_v53  ;;  %v4440_v11 = vld [vmem:[%s6257_s2 + $0xa] ss:$0 sm:$0xff] }
 0xf56   :  { %v1283_v54 = vadd.f32 %v1280_v12, %v5150_v4  ;;  %v4114_v4 = vld [vmem:[%s6260_s5 + $0x38] sm:$0xff] }
 0xf57   :  { %1361 = vmatpush.msra.mxu0 %v4114_v4 }
 0xf58   :  { %v1287_v55 = vsel %vm87_vm0, %v1283_v54, 0.0 }
 0xf59   :  { %1288 = vadd.xlane.f32.xlu0 %v1287_v55  ;;  %1362 = vmatpush.msra.mxu0 %v4113_v3 }
 0xf5b   :  { %1363 = vmatpush.msra.mxu0 %v4112_v35 }
 0xf5d   :  { %1364 = vmatpush.msra.mxu0 %v4111_v5 }
 0xfc1   :  { %v1286_v56 = vpop.xlane.xlu2 %1285 }
 0xfc2   :  { %v1290_v41 = vmul.f32 %v1286_v56, %v5072_v8 }
 0xfc4   :  { %v1292_v57 = vsub.f32 %v1282_v51, %v1290_v41 }
 0xfc6   :  { %v1294_v58 = vmul.f32 %v1292_v57, %v1292_v57 }
 0xfc8   :  { %v1296_v59 = vsel %vm87_vm0, %v1294_v58, 0.0 }
 0xfc9   :  { %1297 = vadd.xlane.f32.xlu1 %v1296_v59 }
 0xfcc   :  { %v1289_v60 = vpop.xlane.xlu0 %1288 }
 0xfcd   :  { %v1291_v61 = vmul.f32 %v1289_v60, %v5072_v8 }
 0xfcf   :  { %v1293_v42 = vsub.f32 %v1283_v54, %v1291_v61  ;;  %v4441_v54 = vld [vmem:[%s6257_s2 + $0xb] ss:$0 sm:$0xff] }
 0xfd1   :  { %v1295_v62 = vmul.f32 %v1293_v42, %v1293_v42 }
 0xfd3   :  { %v1299_v63 = vsel %vm87_vm0, %v1295_v62, 0.0 }
 0xfd4   :  { %1300 = vadd.xlane.f32.xlu2 %v1299_v63 }
0x103c   :  { %v1298_v7 = vpop.xlane.xlu1 %1297 }
0x103d   :  { %v1302_v0 = vmul.f32 %v1298_v7, %v5072_v8 }
0x103f   :  { %v1304_v9 = vadd.f32 1e-05, %v1302_v0 }
0x1041   :  { %4544 = vrsqrt.f32 %v1304_v9  ;;  %vm1312_vm10 = vweird.f32 %v1304_v9 }
0x1047   :  { %v4545_v13 = vpop.eup %4544  ;;  %v1301_v14 = vpop.xlane.xlu2 %1300 }
0x1048   :  { %v1307_v15 = vmul.f32 %v4545_v13, %v1304_v9  ;;  %v1303_v16 = vmul.f32 %v1301_v14, %v5072_v8  ;;  %vm1313_vm9 = vweird.f32 %v4545_v13  ;;  %v1495_v14 = vld [vmem:[#allocation2 + $0x110] sm:$0xff] }
0x1049   :  { %vm1314_vm11 = vmor %vm1312_vm10, %vm1313_vm9 }
0x104a   :  { %v1308_v18 = vmul.f32 %v4545_v13, %v1307_v15  ;;  %v1305_v20 = vadd.f32 1e-05, %v1303_v16  ;;  %v1494_v15 = vld [vmem:[#allocation2 + $0x108] sm:$0xff] }
0x104c   :  { %v1309_v23 = vmul.f32 0.5, %v1308_v18  ;;  %4546 = vrsqrt.f32 %v1305_v20  ;;  %vm1322_vm13 = vweird.f32 %v1305_v20 }
0x104e   :  { %v1310_v24 = vsub.f32 1.5, %v1309_v23 }
0x1050   :  { %v1311_v25 = vmul.f32 %v4545_v13, %v1310_v24 }
0x1052   :  { %v4547_v27 = vpop.eup %4546  ;;  %v1315_v28 = vsel %vm1314_vm11, %v4545_v13, %v1311_v25  ;;  %v1496_v13 = vld [vmem:[#allocation2 + $0x118] sm:$0xff] }
0x1053   :  { %v1326_v29 = vmul.f32 %v1315_v28, %v1292_v57  ;;  %v1317_v30 = vmul.f32 %v4547_v27, %v1305_v20  ;;  %vm1323_vm12 = vweird.f32 %v4547_v27  ;;  %1509 = vmatpush.msra.mxu1 %v1496_v13  ;;  %v4442_v28 = vld [vmem:[%s6257_s2 + $0xe] ss:$0 sm:$0xff] }
0x1054   :  { %vm1324_vm14 = vmor %vm1322_vm13, %vm1323_vm12 }
0x1055   :  { %v1330_v31 = vmul.f32 %v4438_v39, %v1326_v29  ;;  %v1318_v32 = vmul.f32 %v4547_v27, %v1317_v30  ;;  %1510 = vmatpush.msra.mxu1 %v1495_v14 }
0x1057   :  { %v1319_v33 = vmul.f32 0.5, %v1318_v32  ;;  %v1334_v34 = vadd.f32 %v4439_v49, %v1330_v31  ;;  %1511 = vmatpush.msra.mxu1 %v1494_v15  ;;  %v4443_v32 = vld [vmem:[%s6257_s2 + $0xf] ss:$0 sm:$0xff] }
0x1059   :  { %v1320_v36 = vsub.f32 1.5, %v1319_v33  ;;  %4115 = vmatmul.msk.f32.vlgmr.msra.gmra.mxu0 %vm87_vm0, %v1334_v34  ;;  %1512 = vmatpush.msra.mxu1 %v1493_v21 }
0x105b   :  { %v1321_v37 = vmul.f32 %v4547_v27, %v1320_v36  ;;  %1513 = vmatpush.msra.mxu1 %v1492_v47 }
0x105d   :  { %v1325_v38 = vsel %vm1324_vm14, %v4547_v27, %v1321_v37 }
0x105e   :  { %v1327_v40 = vmul.f32 %v1325_v38, %v1293_v42 }
0x1060   :  { %v1331_v43 = vmul.f32 %v4438_v39, %v1327_v40 }
0x1062   :  { %v1335_v44 = vadd.f32 %v4439_v49, %v1331_v43 }
0x1064   :  { %4116 = vmatmul.msk.f32.gmra.mxu0 %vm87_vm0, %v1335_v44 }
0x10d6   :  { %v1366_v48 = vpop.f32.mrf.mxu0 }
0x10d7   :  { %v1367_v50 = vadd.f32 %v4440_v11, %v1366_v48  ;;  %v1490_v48 = vld [vmem:[#allocation2 + $0xe8] sm:$0xff] }
0x10d9   :  { %v1372_v51 = vmax.f32 %v1367_v50, 0.0  ;;  %v1489_v50 = vld [vmem:[#allocation2 + $0xe0] sm:$0xff] }
0x10db   :  { %4125 = vmatmul.msk.f32.vlgmr.msra.gmra.mxu2 %vm90_vm1, %v1372_v51  ;;  %v1488_v51 = vld [vmem:[#allocation2 + $0xd8] sm:$0xff] }
0x10e1   :  { %v1369_v52 = vpop.f32.mrf.mxu0 }
0x10e2   :  { %v1370_v53 = vadd.f32 %v4440_v11, %v1369_v52  ;;  %v1491_v11 = vld [vmem:[#allocation2 + $0xf0] sm:$0xff] }
0x10e3   :  { %1514 = vmatpush.msra.mxu1 %v1491_v11  ;;  %v1487_v52 = vld [vmem:[#allocation2 + $0xd0] sm:$0xff] }
0x10e4   :  { %v1373_v12 = vmax.f32 %v1370_v53, 0.0  ;;  %v1486_v53 = vld [vmem:[#allocation2 + $0xc8] sm:$0xff] }
0x10e5   :  { %1515 = vmatpush.msra.mxu1 %v1490_v48 }
0x10e6   :  { %4126 = vmatmul.msk.f32.gmra.mxu2 %vm90_vm1, %v1373_v12  ;;  %v1485_v12 = vld [vmem:[#allocation2 + $0xc0] sm:$0xff] }
0x10e7   :  { %1516 = vmatpush.msra.mxu1 %v1489_v50 }
0x10e9   :  { %1517 = vmatpush.msra.mxu1 %v1488_v51 }
0x10eb   :  { %1518 = vmatpush.msra.mxu1 %v1487_v52 }
0x10ed   :  { %1519 = vmatpush.msra.mxu1 %v1486_v53 }
0x10ef   :  { %1520 = vmatpush.msra.mxu1 %v1485_v12 }
0x115e   :  { %v1408_v55 = vpop.f32.mrf.mxu2 }
0x115f   :  { %v1409_v56 = vadd.f32 %v4441_v54, %v1408_v55 }
0x1161   :  { %v1414_v41 = vadd.f32 %v1409_v56, %v1334_v34 }
0x1163   :  { %v1416_v57 = vsel %vm87_vm0, %v1414_v41, 0.0 }
0x1164   :  { %1417 = vadd.xlane.f32.xlu0 %v1416_v57 }
0x1169   :  { %v1411_v58 = vpop.f32.mrf.mxu2 }
0x116a   :  { %v1412_v59 = vadd.f32 %v4441_v54, %v1411_v58  ;;  %v5364_v54 = vld [vmem:[#allocation5] sm:$0xff]  ;;  %v5376_v58 = vld [vmem:[#allocation5 + $0x8] sm:$0xff] }
0x116c   :  { %v1415_v60 = vadd.f32 %v1412_v59, %v1335_v44 }
0x116e   :  { %v1419_v61 = vsel %vm87_vm0, %v1415_v60, 0.0 }
0x116f   :  { %1420 = vadd.xlane.f32.xlu1 %v1419_v61  ;;  %v4444_v61 = vld [vmem:[%s6257_s2 + $0x10] ss:$0 sm:$0xff] }
0x11d7   :  { %v1418_v42 = vpop.xlane.xlu0 %1417 }
0x11d8   :  { %v1422_v62 = vmul.f32 %v1418_v42, %v5072_v8 }
0x11da   :  { %v1424_v63 = vsub.f32 %v1414_v41, %v1422_v62 }
0x11dc   :  { %v1426_v4 = vmul.f32 %v1424_v63, %v1424_v63 }
0x11de   :  { %v1428_v3 = vsel %vm87_vm0, %v1426_v4, 0.0 }
0x11df   :  { %1429 = vadd.xlane.f32.xlu2 %v1428_v3 }
0x11e2   :  { %v1421_v35 = vpop.xlane.xlu1 %1420 }
0x11e3   :  { %v1423_v5 = vmul.f32 %v1421_v35, %v5072_v8 }
0x11e5   :  { %v1425_v7 = vsub.f32 %v1415_v60, %v1423_v5 }
0x11e7   :  { %v1427_v0 = vmul.f32 %v1425_v7, %v1425_v7 }
0x11e9   :  { %v1431_v9 = vsel %vm87_vm0, %v1427_v0, 0.0 }
0x11ea   :  { %1432 = vadd.xlane.f32.xlu0 %v1431_v9 }
0x1252   :  { %v1430_v26 = vpop.xlane.xlu2 %1429 }
0x1253   :  { %v1434_v10 = vmul.f32 %v1430_v26, %v5072_v8 }
0x1255   :  { %v1436_v1 = vadd.f32 1e-05, %v1434_v10 }
0x1257   :  { %4548 = vrsqrt.f32 %v1436_v1  ;;  %vm1444_vm6 = vweird.f32 %v1436_v1 }
0x125d   :  { %v4549_v16 = vpop.eup %4548  ;;  %v1433_v17 = vpop.xlane.xlu0 %1432 }
0x125e   :  { %v1439_v18 = vmul.f32 %v4549_v16, %v1436_v1  ;;  %v1435_v20 = vmul.f32 %v1433_v17, %v5072_v8  ;;  %vm1445_vm15 = vweird.f32 %v4549_v16 }
0x125f   :  { %vm1446_vm7 = vmor %vm1444_vm6, %vm1445_vm15 }
0x1260   :  { %v1440_v23 = vmul.f32 %v4549_v16, %v1439_v18  ;;  %v1437_v24 = vadd.f32 1e-05, %v1435_v20 }
0x1262   :  { %v1441_v25 = vmul.f32 0.5, %v1440_v23  ;;  %4550 = vrsqrt.f32 %v1437_v24  ;;  %vm1454_vm9 = vweird.f32 %v1437_v24 }
0x1264   :  { %v1442_v39 = vsub.f32 1.5, %v1441_v25 }
0x1266   :  { %v1443_v27 = vmul.f32 %v4549_v16, %v1442_v39 }
0x1268   :  { %v4551_v29 = vpop.eup %4550  ;;  %v1447_v30 = vsel %vm1446_vm7, %v4549_v16, %v1443_v27 }
0x1269   :  { %v1449_v49 = vmul.f32 %v4551_v29, %v1437_v24  ;;  %v1458_v31 = vmul.f32 %v1447_v30, %v1424_v63  ;;  %vm1455_vm8 = vweird.f32 %v4551_v29 }
0x126a   :  { %vm1456_vm10 = vmor %vm1454_vm9, %vm1455_vm8 }
0x126b   :  { %v1450_v33 = vmul.f32 %v4551_v29, %v1449_v49  ;;  %v1462_v34 = vmul.f32 %v4442_v28, %v1458_v31 }
0x126d   :  { %v1451_v36 = vmul.f32 0.5, %v1450_v33  ;;  %v1466_v37 = vadd.f32 %v4443_v32, %v1462_v34 }
0x126f   :  { %v1452_v38 = vsub.f32 1.5, %v1451_v36  ;;  %1474 = vrot.lane.b32.xlu1 %v1466_v37, %s4822_s23  ;;  %1468 = vst.msk [vmem:[#allocation8] sm:$0xff] %vm87_vm0, %v1466_v37 }
0x1271   :  { %v1453_v40 = vmul.f32 %v4551_v29, %v1452_v38 }
0x1273   :  { %v1457_v43 = vsel %vm1456_vm10, %v4551_v29, %v1453_v40 }
0x1274   :  { %v1459_v44 = vmul.f32 %v1457_v43, %v1425_v7 }
0x1276   :  { %v1463_v45 = vmul.f32 %v4442_v28, %v1459_v44 }
0x1278   :  { %v1467_v46 = vadd.f32 %v4443_v32, %v1463_v45 }
0x127a   :  { %1476 = vrot.lane.b32.xlu2 %v1467_v46, %s4822_s23  ;;  %1469 = vst.msk [vmem:[#allocation8 + $0x8] sm:$0xff] %vm87_vm0, %v1467_v46 }
0x12d4   :  { %v5374_v57 = vpop.permute.xlu2 %1476 }
0x12d5   :  { %v1481_v59 = vsel %vm87_vm0, %v5376_v58, %v5374_v57 }
0x12d6   :  { %v1483_v60 = vsel %vm90_vm1, %v1481_v59, %v4932_v22 }
0x12e1   :  { %v5366_v55 = vpop.permute.xlu1 %1474 }
0x12e2   :  { %v1480_v56 = vsel %vm87_vm0, %v5364_v54, %v5366_v55 }
0x12e3   :  { %v1482_v41 = vsel %vm90_vm1, %v1480_v56, %v4925_v19 }
0x12e4   :  { %4127 = vmatmul.msk.f32.vlgmr.msra.gmra.mxu1 %vm107_vm2, %v1482_v41 }
0x12ec   :  { %4128 = vmatmul.msk.f32.gmra.mxu1 %vm107_vm2, %v1483_v60 }
0x1361   :  { %v1522_v42 = vpop.f32.mrf.mxu1 }
0x1362   :  { %v1523_v62 = vadd.f32 %v4444_v61, %v1522_v42 }
0x1364   :  { %1530 = vrot.lane.b32.xlu1 %v1523_v62, %s4825_s30 }
0x1369   :  { %v1525_v63 = vpop.f32.mrf.mxu1 }
0x136a   :  { %v5388_v4 = vadd.f32 %v4444_v61, %v1525_v63 }
0x136c   :  { %1626 = vrot.lane.b32.xlu1 %v1523_v62, %s4824_s29  ;;  %1624 = vrot.lane.b32.xlu2 %v5388_v4, %s4826_s10  ;;  %v5413_v16 = vpack.i.bf16 %v1523_v62, %v5388_v4 }
0x136d   :  { %1532 = vrot.lane.b32.xlu0 %v5388_v4, %s4825_s30 }
0x1374   :  { %1622 = vrot.lane.b32.xlu1 %v1523_v62, %s4826_s10 }
0x137c   :  { %1628 = vrot.lane.b32.xlu1 %v5388_v4, %s4824_s29 }
0x1384   :  { %1818 = vrot.lane.b32.xlu1 %v1523_v62, %s4830_s20 }
0x13c6   :  { %v1625_v9 = vpop.permute.xlu2 %1624 }
0x13d6   :  { %v1531_v3 = vpop.permute.xlu1 %1530 }
0x13de   :  { %v1627_v35 = vpop.permute.xlu1 %1626 }
0x13df   :  { %v1533_v5 = vpop.permute.xlu0 %1532 }
0x13e0   :  { %4129 = vmatpush.xpose.msk.msra.mxu3 %vm143_vm3, %v1533_v5 }
0x13e4   :  { %4130 = vmatpush.xpose.msk.msra.mxu3 %vm143_vm3, %v1531_v3 }
0x13e6   :  { %v1623_v7 = vpop.permute.xlu1 %1622 }
0x13e7   :  { %4131 = vmatmul.msk.f32.vlgmr.msra.gmra.mxu3 %vm143_vm3, %v1523_v62 }
0x13ee   :  { %v1629_v0 = vpop.permute.xlu1 %1628 }
0x13ef   :  { %4132 = vmatmul.msk.f32.gmra.mxu3 %vm143_vm3, %v5388_v4  ;;  %4135 = vmatpush.xpose.msk.msrb.mxu2 %vm143_vm3, %v1629_v0 }
0x13f3   :  { %4136 = vmatpush.xpose.msk.msrb.mxu2 %vm143_vm3, %v1627_v35 }
0x13f6   :  { %4137 = vmatmul.msk.f32.vlgmr.msrb.gmra.mxu2 %vm143_vm3, %v1623_v7  ;;  %v1819_v33 = vpop.permute.xlu1 %1818 }
0x13fe   :  { %4138 = vmatmul.msk.f32.gmra.mxu2 %vm143_vm3, %v1625_v9 }
0x146a   :  { %v1559_v26 = vpop.f32.mrf.mxu3 }
0x146b   :  { %v1560_v10 = vadd.f32 %v5221_v6, %v1559_v26 }
0x146d   :  { %v1565_v1 = vsel %vm175_vm4, %v1560_v10, -inf }
0x146e   :  { %1566 = vmax.xlane.f32.xlu0 %v1565_v1 }
0x1472   :  { %v1562_v13 = vpop.f32.mrf.mxu3 }
0x1473   :  { %v1563_v14 = vadd.f32 %v5214_v2, %v1562_v13 }
0x1475   :  { %v1568_v15 = vsel %vm175_vm4, %v1563_v14, -inf }
0x1476   :  { %1569 = vmax.xlane.f32.xlu2 %v1568_v15 }
0x1479   :  { %v1655_v17 = vpop.f32.mrf.mxu2 }
0x147a   :  { %v1656_v44 = vadd.f32 %v5221_v6, %v1655_v17 }
0x147c   :  { %v1661_v45 = vsel %vm175_vm4, %v1656_v44, -inf }
0x1481   :  { %v1658_v18 = vpop.f32.mrf.mxu2 }
0x1482   :  { %4349 = vrot.lane.b32.xlu0 %v5413_v16, %s4823_s0  ;;  %v5425_v20 = vadd.f32 %v5214_v2, %v1658_v18 }
0x1484   :  { %v1664_v21 = vsel %vm175_vm4, %v5425_v20, -inf }
0x148e   :  { %1820 = vrot.lane.b32.xlu2 %v5388_v4, %s4830_s20 }
0x1496   :  { %1814 = vrot.lane.b32.xlu2 %v1523_v62, %s4831_s3 }
0x149e   :  { %1724 = vrot.lane.b32.xlu2 %v5388_v4, %s4827_s15 }
0x14a6   :  { %1722 = vrot.lane.b32.xlu2 %v1523_v62, %s4827_s15 }
0x14ae   :  { %1718 = vrot.lane.b32.xlu2 %v1523_v62, %s4829_s19 }
0x14d7   :  { %1665 = vmax.xlane.f32.xlu2 %v1664_v21 }
0x14e1   :  { %v1567_v23 = vpop.xlane.xlu0 %1566 }
0x14e2   :  { %v1571_v24 = vsub.f32 %v1560_v10, %v1567_v23 }
0x14e4   :  { %v1573_v25 = vmul.f32 1.442695, %v1571_v24 }
0x14e6   :  { %4552 = vpow2.f32 %v1573_v25 }
0x14e9   :  { %v1570_v39 = vpop.xlane.xlu2 %1569 }
0x14ea   :  { %v1572_v27 = vsub.f32 %v1563_v14, %v1570_v39 }
0x14ec   :  { %v4553_v28 = vpop.eup %4552  ;;  %v1575_v29 = vmul.f32 1.442695, %v1572_v27 }
0x14ed   :  { %v1577_v30 = vsel %vm175_vm4, %v4553_v28, 0.0 }
0x14ee   :  { %4554 = vpow2.f32 %v1575_v29  ;;  %1578 = vadd.xlane.f32.xlu1 %v1577_v30 }
0x14f1   :  { %v1821_v49 = vpop.permute.xlu2 %1820 }
0x14f2   :  { %4147 = vmatpush.xpose.msk.msra.mxu2 %vm143_vm3, %v1821_v49 }
0x14f4   :  { %v4555_v31 = vpop.eup %4554  ;;  %v4350_v32 = vpop.permute.xlu0 %4349 }
0x14f5   :  { %v4351_v34 = vunpack.i.l.bf16 %v4350_v32  ;;  %v1580_v36 = vsel %vm175_vm4, %v4555_v31, 0.0  ;;  %v4352_v37 = vunpack.i.h.bf16 %v4350_v32 }
0x14f6   :  { %4148 = vmatpush.xpose.msk.msra.mxu2 %vm143_vm3, %v1819_v33  ;;  %1581 = vadd.xlane.f32.xlu0 %v1580_v36 }
0x14f7   :  { %1613 = vmatpush.msrb.mxu0 %v4351_v34 }
0x14f9   :  { %v1815_v38 = vpop.permute.xlu2 %1814  ;;  %1614 = vmatpush.msrb.mxu0 %v4352_v37 }
0x14fa   :  { %4149 = vmatmul.msk.f32.vlgmr.msra.gmra.mxu2 %vm143_vm3, %v1815_v38 }
0x1501   :  { %v1725_v40 = vpop.permute.xlu2 %1724 }
0x1502   :  { %4141 = vmatpush.xpose.msk.msra.mxu0 %vm143_vm3, %v1725_v40 }
0x1507   :  { %1816 = vrot.lane.b32.xlu1 %v5388_v4, %s4831_s3 }
0x1509   :  { %v1723_v43 = vpop.permute.xlu2 %1722 }
0x150a   :  { %1720 = vrot.lane.b32.xlu0 %v5388_v4, %s4829_s19  ;;  %4142 = vmatpush.xpose.msk.msra.mxu0 %vm143_vm3, %v1723_v43 }
0x1511   :  { %v1719_v53 = vpop.permute.xlu2 %1718 }
0x1531   :  { %1662 = vmax.xlane.f32.xlu1 %v1661_v45 }
0x154a   :  { %v1666_v9 = vpop.xlane.xlu2 %1665 }
0x154b   :  { %v1668_v13 = vsub.f32 %v5425_v20, %v1666_v9 }
0x154d   :  { %v1671_v18 = vmul.f32 1.442695, %v1668_v13 }
0x1561   :  { %v1579_v46 = vpop.xlane.xlu1 %1578 }
0x1562   :  { %4556 = vrcp.f32 %v1579_v46 }
0x1568   :  { %v4557_v47 = vpop.eup %4556 }
0x1569   :  { %v1585_v11 = vmul.f32 %v4557_v47, %v4553_v28  ;;  %v1582_v48 = vpop.xlane.xlu0 %1581 }
0x156a   :  { %4558 = vrcp.f32 %v1582_v48 }
0x156b   :  { %4133 = vmatmul.msk.f32.vlgmr.msrb.gmra.mxu0 %vm175_vm4, %v1585_v11 }
0x1570   :  { %v4559_v50 = vpop.eup %4558 }
0x1571   :  { %v1586_v51 = vmul.f32 %v4559_v50, %v4555_v31 }
0x1573   :  { %4134 = vmatmul.msk.f32.gmra.mxu0 %vm175_vm4, %v1586_v51 }
0x1579   :  { %v1817_v52 = vpop.permute.xlu1 %1816 }
0x157a   :  { %4150 = vmatmul.msk.f32.gmra.mxu2 %vm143_vm3, %v1817_v52 }
0x157b   :  { %4143 = vmatmul.msk.f32.vlgmr.msra.gmra.mxu0 %vm143_vm3, %v1719_v53 }
0x157c   :  { %v1721_v59 = vpop.permute.xlu0 %1720 }
0x157d   :  { %v1847_v12 = vpop.f32.mrf.mxu2 }
0x157e   :  { %v1848_v56 = vadd.f32 %v5221_v6, %v1847_v12 }
0x1580   :  { %v1853_v41 = vsel %vm175_vm4, %v1848_v56, -inf }
0x1581   :  { %1854 = vmax.xlane.f32.xlu0 %v1853_v41 }
0x1583   :  { %4144 = vmatmul.msk.f32.gmra.mxu0 %vm143_vm3, %v1721_v59 }
0x15a4   :  { %v1663_v42 = vpop.xlane.xlu1 %1662 }
0x15a5   :  { %v1667_v4 = vsub.f32 %v1656_v44, %v1663_v42 }
0x15a7   :  { %v1669_v7 = vmul.f32 1.442695, %v1667_v4 }
0x15e8   :  { %v5449_v60 = vpop.f32.mrf.mxu0 }
0x15f0   :  { %v5451_v61 = vpop.f32.mrf.mxu0 }
0x15f4   :  { %v1855_v62 = vpop.xlane.xlu0 %1854 }
0x15f5   :  { %v1859_v63 = vsub.f32 %v1848_v56, %v1855_v62 }
0x15f7   :  { %v1861_v3 = vmul.f32 1.442695, %v1859_v63 }
0x15f8   :  { %v1751_v35 = vpop.f32.mrf.mxu0 }
0x15f9   :  { %4560 = vpow2.f32 %v1861_v3  ;;  %v1752_v5 = vadd.f32 %v5221_v6, %v1751_v35 }
0x15fa   :  { %4562 = vpow2.f32 %v1669_v7 }
0x15fb   :  { %v1757_v0 = vsel %vm175_vm4, %v1752_v5, -inf  ;;  %4564 = vpow2.f32 %v1671_v18 }
0x15fc   :  { %1758 = vmax.xlane.f32.xlu1 %v1757_v0 }
0x15fd   :  { %v1850_v26 = vpop.f32.mrf.mxu2 }
0x15fe   :  { %v1851_v10 = vadd.f32 %v5214_v2, %v1850_v26 }
0x15ff   :  { %v5456_v1 = vpop.eup %4560 }
0x1600   :  { %v1754_v14 = vpop.f32.mrf.mxu0  ;;  %v1856_v15 = vsel %vm175_vm4, %v1851_v10, -inf  ;;  %v1865_v17 = vsel %vm175_vm4, %v5456_v1, 0.0  ;;  %v4563_v23 = vpop.eup %4562 }
0x1601   :  { %v1755_v6 = vadd.f32 %v5214_v2, %v1754_v14  ;;  %1857 = vmax.xlane.f32.xlu2 %v1856_v15  ;;  %1866 = vadd.xlane.f32.xlu0 %v1865_v17  ;;  %v1673_v24 = vsel %vm175_vm4, %v4563_v23, 0.0  ;;  %v4565_v20 = vpop.eup %4564  ;;  %v4156_v14 = vld [vmem:[%s6259_s4 + $0x58] sm:$0xff]  ;;  %v4155_v15 = vld [vmem:[%s6259_s4 + $0x50] sm:$0xff] }
0x1602   :  { %v1676_v25 = vsel %vm175_vm4, %v4565_v20, 0.0  ;;  %1965 = vmatpush.msrb.mxu0 %v4156_v14 }
0x1603   :  { %v1760_v21 = vsel %vm175_vm4, %v1755_v6, -inf }
0x1604   :  { %1761 = vmax.xlane.f32.xlu1 %v1760_v21  ;;  %1966 = vmatpush.msrb.mxu0 %v4155_v15  ;;  %v4154_v21 = vld [vmem:[%s6259_s4 + $0x48] sm:$0xff] }
0x1606   :  { %1967 = vmatpush.msrb.mxu0 %v4154_v21  ;;  %v4446_v21 = vld [vmem:[%s6257_s2 + $0x16] ss:$0 sm:$0xff] }
0x1609   :  { %1674 = vadd.xlane.f32.xlu2 %v1673_v24 }
0x1611   :  { %1677 = vadd.xlane.f32.xlu2 %v1676_v25 }
0x1615   :  { %4359 = vrot.lane.b32.xlu0 %v5413_v16, %s4833_s21 }
0x161d   :  { %4354 = vrot.lane.b32.xlu1 %v5413_v16, %s4828_s16 }
0x1625   :  { %4364 = vrot.lane.b32.xlu1 %v5413_v16, %s4832_s7 }
0x166f   :  { %v1759_v2 = vpop.xlane.xlu1 %1758 }
0x1670   :  { %v1763_v28 = vsub.f32 %v1752_v5, %v1759_v2 }
0x1672   :  { %v1765_v30 = vmul.f32 1.442695, %v1763_v28 }
0x1674   :  { %v1858_v39 = vpop.xlane.xlu2 %1857  ;;  %v1867_v38 = vpop.xlane.xlu0 %1866 }
0x1675   :  { %v1860_v27 = vsub.f32 %v1851_v10, %v1858_v39 }
0x1677   :  { %v1863_v29 = vmul.f32 1.442695, %v1860_v27  ;;  %v1762_v49 = vpop.xlane.xlu1 %1761 }
0x1678   :  { %v1764_v32 = vsub.f32 %v1755_v6, %v1762_v49 }
0x1679   :  { %4566 = vpow2.f32 %v1863_v29 }
0x167a   :  { %4568 = vpow2.f32 %v1765_v30  ;;  %v1767_v34 = vmul.f32 1.442695, %v1764_v32 }
0x167c   :  { %v1675_v37 = vpop.xlane.xlu2 %1674  ;;  %4570 = vpow2.f32 %v1767_v34 }
0x167d   :  { %4572 = vrcp.f32 %v1675_v37 }
0x167f   :  { %v4567_v31 = vpop.eup %4566 }
0x1680   :  { %v1868_v33 = vsel %vm175_vm4, %v4567_v31, 0.0  ;;  %v4569_v36 = vpop.eup %4568 }
0x1681   :  { %1869 = vadd.xlane.f32.xlu2 %v1868_v33  ;;  %v1769_v16 = vsel %vm175_vm4, %v4569_v36, 0.0 }
0x1682   :  { %v4571_v40 = vpop.eup %4570 }
0x1683   :  { %v4573_v45 = vpop.eup %4572  ;;  %v1772_v47 = vsel %vm175_vm4, %v4571_v40, 0.0 }
0x1684   :  { %v1678_v43 = vpop.xlane.xlu2 %1677  ;;  %v1681_v50 = vmul.f32 %v4573_v45, %v4563_v23  ;;  %v4153_v23 = vld [vmem:[%s6259_s4 + $0x40] sm:$0xff] }
0x1685   :  { %4574 = vrcp.f32 %v1678_v43  ;;  %1968 = vmatpush.msrb.mxu0 %v4153_v23 }
0x1686   :  { %4576 = vrcp.f32 %v1867_v38 }
0x1687   :  { %v4360_v11 = vpop.permute.xlu0 %4359 }
0x1688   :  { %v4361_v51 = vunpack.i.l.bf16 %v4360_v11  ;;  %v4362_v52 = vunpack.i.h.bf16 %v4360_v11 }
0x1689   :  { %1770 = vadd.xlane.f32.xlu2 %v1769_v16 }
0x168b   :  { %v4575_v12 = vpop.eup %4574 }
0x168c   :  { %v1682_v59 = vmul.f32 %v4575_v12, %v4565_v20  ;;  %v4577_v42 = vpop.eup %4576  ;;  %v2043_v12 = vld [vmem:[#allocation2 + $0x160] sm:$0xff] }
0x168d   :  { %v1873_v62 = vmul.f32 %v4577_v42, %v5456_v1  ;;  %v2039_v42 = vld [vmem:[#allocation2 + $0x140] sm:$0xff] }
0x168f   :  { %v4355_v44 = vpop.permute.xlu1 %4354 }
0x1690   :  { %v4356_v46 = vunpack.i.l.bf16 %v4355_v44  ;;  %v4357_v48 = vunpack.i.h.bf16 %v4355_v44 }
0x1691   :  { %1773 = vadd.xlane.f32.xlu2 %v1772_v47 }
0x1692   :  { %1709 = vmatpush.msrb.mxu3 %v4356_v46 }
0x1694   :  { %1710 = vmatpush.msrb.mxu3 %v4357_v48 }
0x1695   :  { %4139 = vmatmul.msk.f32.vlgmr.msrb.gmra.mxu3 %vm175_vm4, %v1681_v50 }
0x1696   :  { %1901 = vmatpush.msra.mxu3 %v4361_v51  ;;  %v2046_v51 = vld [vmem:[#allocation2 + $0x178] sm:$0xff] }
0x1697   :  { %v4365_v53 = vpop.permute.xlu1 %4364 }
0x1698   :  { %v4366_v56 = vunpack.i.l.bf16 %v4365_v53  ;;  %1902 = vmatpush.msra.mxu3 %v4362_v52  ;;  %v4367_v41 = vunpack.i.h.bf16 %v4365_v53  ;;  %v2045_v52 = vld [vmem:[#allocation2 + $0x170] sm:$0xff]  ;;  %v2044_v53 = vld [vmem:[#allocation2 + $0x168] sm:$0xff] }
0x169a   :  { %1805 = vmatpush.msrb.mxu1 %v4366_v56  ;;  %v2042_v56 = vld [vmem:[#allocation2 + $0x158] sm:$0xff] }
0x169c   :  { %1806 = vmatpush.msrb.mxu1 %v4367_v41  ;;  %v2041_v41 = vld [vmem:[#allocation2 + $0x150] sm:$0xff] }
0x169d   :  { %4140 = vmatmul.msk.f32.gmra.mxu3 %vm175_vm4, %v1682_v59  ;;  %v2040_v59 = vld [vmem:[#allocation2 + $0x148] sm:$0xff] }
0x169e   :  { %2059 = vmatpush.msra.mxu1 %v2046_v51 }
0x16a0   :  { %2060 = vmatpush.msra.mxu1 %v2045_v52 }
0x16a2   :  { %2061 = vmatpush.msra.mxu1 %v2044_v53 }
0x16a4   :  { %2062 = vmatpush.msra.mxu1 %v2043_v12 }
0x16a5   :  { %4151 = vmatmul.msk.f32.vlgmr.msra.gmra.mxu3 %vm175_vm4, %v1873_v62  ;;  %v2038_v62 = vld [vmem:[#allocation2 + $0x138] sm:$0xff] }
0x16a6   :  { %2063 = vmatpush.msra.mxu1 %v2042_v56 }
0x16a8   :  { %2064 = vmatpush.msra.mxu1 %v2041_v41  ;;  %v5606_v41 = vld [vmem:[%s6257_s2 + $0x30] sm:$0xff] }
0x16aa   :  { %2065 = vmatpush.msra.mxu1 %v2040_v59 }
0x16ac   :  { %2066 = vmatpush.msra.mxu1 %v2039_v42 }
0x16ae   :  { %2067 = vmatpush.msra.mxu1 %v2038_v62 }
0x16f4   :  { %v1870_v63 = vpop.xlane.xlu2 %1869 }
0x16f5   :  { %4578 = vrcp.f32 %v1870_v63  ;;  %v2037_v63 = vld [vmem:[#allocation2 + $0x130] sm:$0xff] }
0x16f6   :  { %2068 = vmatpush.msra.mxu1 %v2037_v63 }
0x16fb   :  { %v4579_v4 = vpop.eup %4578 }
0x16fc   :  { %v1771_v3 = vpop.xlane.xlu2 %1770  ;;  %v1874_v35 = vmul.f32 %v4579_v4, %v4567_v31  ;;  %v2036_v4 = vld [vmem:[#allocation2 + $0x128] sm:$0xff] }
0x16fd   :  { %4580 = vrcp.f32 %v1771_v3  ;;  %2069 = vmatpush.msra.mxu1 %v2036_v4  ;;  %v2035_v3 = vld [vmem:[#allocation2 + $0x120] sm:$0xff] }
0x16fe   :  { %4152 = vmatmul.msk.f32.gmra.mxu3 %vm175_vm4, %v1874_v35 }
0x16ff   :  { %2070 = vmatpush.msra.mxu1 %v2035_v3 }
0x1703   :  { %v4581_v5 = vpop.eup %4580 }
0x1704   :  { %v1777_v7 = vmul.f32 %v4581_v5, %v4569_v36  ;;  %v1774_v0 = vpop.xlane.xlu2 %1773 }
0x1705   :  { %4582 = vrcp.f32 %v1774_v0 }
0x1706   :  { %4145 = vmatmul.msk.f32.vlgmr.msrb.gmra.mxu1 %vm175_vm4, %v1777_v7 }
0x170b   :  { %v4583_v9 = vpop.eup %4582 }
0x170c   :  { %v1778_v26 = vmul.f32 %v4583_v9, %v4571_v40 }
0x170e   :  { %4146 = vmatmul.msk.f32.gmra.mxu1 %vm175_vm4, %v1778_v26 }
0x1718   :  { %v1712_v10 = vpop.f32.mrf.mxu3 }
0x1719   :  { %1912 = vrot.lane.b32.xlu0 %v1712_v10, %s4820_s18 }
0x1720   :  { %v1715_v1 = vpop.f32.mrf.mxu3 }
0x1721   :  { %1914 = vrot.lane.b32.xlu0 %v1715_v1, %s4820_s18 }
0x1728   :  { %v1904_v13 = vpop.f32.mrf.mxu3 }
0x1729   :  { %1928 = vrot.lane.b32.xlu2 %v1904_v13, %s4835_s24 }
0x1781   :  { %v1907_v17 = vpop.f32.mrf.mxu3 }
0x1782   :  { %1930 = vrot.lane.b32.xlu0 %v1907_v17, %s4835_s24 }
0x1783   :  { %v1808_v6 = vpop.f32.mrf.mxu1  ;;  %v1929_v2 = vpop.permute.xlu2 %1928 }
0x1784   :  { %1920 = vrot.lane.b32.xlu1 %v1808_v6, %s4834_s22 }
0x178b   :  { %v1811_v18 = vpop.f32.mrf.mxu1  ;;  %v1913_v24 = vpop.permute.xlu0 %1912 }
0x178c   :  { %1922 = vrot.lane.b32.xlu1 %v1811_v18, %s4834_s22  ;;  %v1934_v20 = vsel %vm143_vm3, %v5449_v60, %v1913_v24  ;;  %v4445_v60 = vld [vmem:[%s6257_s2 + $0x11] ss:$0 sm:$0xff] }
0x1793   :  { %v1915_v39 = vpop.permute.xlu0 %1914 }
0x1794   :  { %v1935_v29 = vsel %vm143_vm3, %v5451_v61, %v1915_v39 }
0x17f4   :  { %v1931_v49 = vpop.permute.xlu0 %1930 }
0x17f6   :  { %v1921_v25 = vpop.permute.xlu1 %1920 }
0x17f7   :  { %v1936_v27 = vsel %vm175_vm4, %v1934_v20, %v1921_v25  ;;  %v4447_v25 = vld [vmem:[%s6257_s2 + $0x17] ss:$0 sm:$0xff] }
0x17f8   :  { %v1938_v28 = vsel %vm549_vm5, %v1936_v27, %v1929_v2 }
0x17f9   :  { %4157 = vmatmul.msk.f32.vlgmr.msrb.gmra.mxu0 %vm87_vm0, %v1938_v28 }
0x17fe   :  { %v1923_v30 = vpop.permute.xlu1 %1922 }
0x17ff   :  { %v1937_v31 = vsel %vm175_vm4, %v1935_v29, %v1923_v30 }
0x1800   :  { %v1939_v32 = vsel %vm549_vm5, %v1937_v31, %v1931_v49 }
0x1801   :  { %4158 = vmatmul.msk.f32.gmra.mxu0 %vm87_vm0, %v1939_v32 }
0x1876   :  { %v1970_v33 = vpop.f32.mrf.mxu0 }
0x1877   :  { %v1971_v34 = vadd.f32 %v4445_v60, %v1970_v33 }
0x1879   :  { %v1976_v36 = vadd.f32 %v1971_v34, %v5364_v54 }
0x187b   :  { %v1978_v37 = vsel %vm87_vm0, %v1976_v36, 0.0 }
0x187c   :  { %1979 = vadd.xlane.f32.xlu1 %v1978_v37  ;;  %v4448_v37 = vld [vmem:[%s6257_s2 + $0x12] ss:$0 sm:$0xff] }
0x187e   :  { %v1973_v61 = vpop.f32.mrf.mxu0 }
0x187f   :  { %v1974_v16 = vadd.f32 %v4445_v60, %v1973_v61 }
0x1881   :  { %v1977_v38 = vadd.f32 %v1974_v16, %v5376_v58 }
0x1883   :  { %v1981_v40 = vsel %vm87_vm0, %v1977_v38, 0.0 }
0x1884   :  { %1982 = vadd.xlane.f32.xlu0 %v1981_v40 }
0x18ef   :  { %v1980_v43 = vpop.xlane.xlu1 %1979 }
0x18f0   :  { %v1984_v44 = vmul.f32 %v1980_v43, %v5072_v8 }
0x18f2   :  { %v1986_v45 = vsub.f32 %v1976_v36, %v1984_v44 }
0x18f4   :  { %v1988_v46 = vmul.f32 %v1986_v45, %v1986_v45 }
0x18f6   :  { %v1990_v47 = vsel %vm87_vm0, %v1988_v46, 0.0 }
0x18f7   :  { %1991 = vadd.xlane.f32.xlu2 %v1990_v47  ;;  %v1983_v11 = vpop.xlane.xlu0 %1982 }
0x18f8   :  { %v1985_v54 = vmul.f32 %v1983_v11, %v5072_v8 }
0x18fa   :  { %v5520_v48 = vsub.f32 %v1977_v38, %v1985_v54 }
0x18fc   :  { %v1989_v50 = vmul.f32 %v5520_v48, %v5520_v48 }
0x18fe   :  { %v1993_v58 = vsel %vm87_vm0, %v1989_v50, 0.0 }
0x18ff   :  { %1994 = vadd.xlane.f32.xlu1 %v1993_v58 }
0x196a   :  { %v1992_v35 = vpop.xlane.xlu2 %1991 }
0x196b   :  { %v1996_v5 = vmul.f32 %v1992_v35, %v5072_v8  ;;  %v5615_v35 = vld [vmem:[%s6257_s2 + $0x38] sm:$0xff] }
0x196d   :  { %v1998_v7 = vadd.f32 1e-05, %v1996_v5 }
0x196f   :  { %4584 = vrsqrt.f32 %v1998_v7  ;;  %vm2006_vm12 = vweird.f32 %v1998_v7 }
0x1972   :  { %v1995_v0 = vpop.xlane.xlu1 %1994 }
0x1973   :  { %v1997_v9 = vmul.f32 %v1995_v0, %v5072_v8 }
0x1975   :  { %v4585_v26 = vpop.eup %4584  ;;  %v1999_v10 = vadd.f32 1e-05, %v1997_v9 }
0x1976   :  { %v2001_v1 = vmul.f32 %v4585_v26, %v1998_v7  ;;  %vm2007_vm11 = vweird.f32 %v4585_v26 }
0x1977   :  { %4586 = vrsqrt.f32 %v1999_v10  ;;  %vm2008_vm13 = vmor %vm2006_vm12, %vm2007_vm11  ;;  %vm2016_vm15 = vweird.f32 %v1999_v10 }
0x1978   :  { %v2002_v13 = vmul.f32 %v4585_v26, %v2001_v1 }
0x197a   :  { %v2003_v14 = vmul.f32 0.5, %v2002_v13 }
0x197c   :  { %v2004_v15 = vsub.f32 1.5, %v2003_v14 }
0x197d   :  { %v4587_v17 = vpop.eup %4586 }
0x197e   :  { %v2005_v6 = vmul.f32 %v4585_v26, %v2004_v15  ;;  %v2011_v18 = vmul.f32 %v4587_v17, %v1999_v10  ;;  %vm2017_vm14 = vweird.f32 %v4587_v17 }
0x197f   :  { %vm2018_vm6 = vmor %vm2016_vm15, %vm2017_vm14 }
0x1980   :  { %v2009_v23 = vsel %vm2008_vm13, %v4585_v26, %v2005_v6  ;;  %v2012_v24 = vmul.f32 %v4587_v17, %v2011_v18 }
0x1981   :  { %v2020_v20 = vmul.f32 %v2009_v23, %v1986_v45 }
0x1982   :  { %v2013_v2 = vmul.f32 0.5, %v2012_v24 }
0x1983   :  { %v2024_v39 = vmul.f32 %v4446_v21, %v2020_v20 }
0x1984   :  { %v2014_v27 = vsub.f32 1.5, %v2013_v2 }
0x1985   :  { %v5533_v28 = vadd.f32 %v4447_v25, %v2024_v39 }
0x1986   :  { %v2015_v29 = vmul.f32 %v4587_v17, %v2014_v27 }
0x1987   :  { %v2030_v30 = vsel %vm87_vm0, %v5533_v28, %v5366_v55 }
0x1988   :  { %v2019_v49 = vsel %vm2018_vm6, %v4587_v17, %v2015_v29  ;;  %v2032_v31 = vsel %vm90_vm1, %v2030_v30, %v4925_v19 }
0x1989   :  { %v2021_v32 = vmul.f32 %v2019_v49, %v5520_v48  ;;  %4159 = vmatmul.msk.f32.vlgmr.msra.gmra.mxu1 %vm107_vm2, %v2032_v31 }
0x198b   :  { %v2025_v60 = vmul.f32 %v4446_v21, %v2021_v32 }
0x198d   :  { %v5542_v33 = vadd.f32 %v4447_v25, %v2025_v60 }
0x198f   :  { %v2031_v34 = vsel %vm87_vm0, %v5542_v33, %v5374_v57 }
0x1990   :  { %v2033_v36 = vsel %vm90_vm1, %v2031_v34, %v4932_v22 }
0x1991   :  { %4160 = vmatmul.msk.f32.gmra.mxu1 %vm107_vm2, %v2033_v36 }
0x1a06   :  { %v2072_v61 = vpop.f32.mrf.mxu1 }
0x1a07   :  { %v5553_v16 = vadd.f32 %v4448_v37, %v2072_v61 }
0x1a09   :  { %2080 = vrot.lane.b32.xlu2 %v5553_v16, %s4825_s30 }
0x1a0e   :  { %v2075_v38 = vpop.f32.mrf.mxu1 }
0x1a0f   :  { %v5557_v40 = vadd.f32 %v4448_v37, %v2075_v38 }
0x1a11   :  { %2172 = vrot.lane.b32.xlu2 %v5553_v16, %s4826_s10  ;;  %2178 = vrot.lane.b32.xlu1 %v5557_v40, %s4824_s29  ;;  %v4378_v25 = vpack.i.bf16 %v5553_v16, %v5557_v40 }
0x1a12   :  { %2082 = vrot.lane.b32.xlu0 %v5557_v40, %s4825_s30 }
0x1a19   :  { %2370 = vrot.lane.b32.xlu2 %v5557_v40, %s4830_s20  ;;  %2272 = vrot.lane.b32.xlu1 %v5553_v16, %s4827_s15 }
0x1a1a   :  { %2176 = vrot.lane.b32.xlu0 %v5553_v16, %s4824_s29 }
0x1a21   :  { %2268 = vrot.lane.b32.xlu2 %v5553_v16, %s4829_s19  ;;  %2174 = vrot.lane.b32.xlu1 %v5557_v40, %s4826_s10 }
0x1a22   :  { %2274 = vrot.lane.b32.xlu0 %v5557_v40, %s4827_s15 }
0x1a29   :  { %2366 = vrot.lane.b32.xlu2 %v5557_v40, %s4831_s3  ;;  %2364 = vrot.lane.b32.xlu1 %v5553_v16, %s4831_s3 }
0x1a2a   :  { %2368 = vrot.lane.b32.xlu0 %v5553_v16, %s4830_s20 }
0x1a32   :  { %2270 = vrot.lane.b32.xlu0 %v5557_v40, %s4829_s19 }
0x1a63   :  { %v2081_v43 = vpop.permute.xlu2 %2080 }
0x1a6b   :  { %v2173_v44 = vpop.permute.xlu2 %2172 }
0x1a73   :  { %v2371_v54 = vpop.permute.xlu2 %2370 }
0x1a7b   :  { %v2269_v58 = vpop.permute.xlu2 %2268 }
0x1a83   :  { %v2179_v45 = vpop.permute.xlu1 %2178  ;;  %v2367_v12 = vpop.permute.xlu2 %2366 }
0x1a84   :  { %v2083_v46 = vpop.permute.xlu0 %2082  ;;  %4167 = vmatpush.xpose.msk.msra.mxu0 %vm143_vm3, %v2179_v45 }
0x1a85   :  { %4161 = vmatpush.xpose.msk.msrb.mxu2 %vm143_vm3, %v2083_v46 }
0x1a89   :  { %4162 = vmatpush.xpose.msk.msrb.mxu2 %vm143_vm3, %v2081_v43 }
0x1a8b   :  { %v2273_v47 = vpop.permute.xlu1 %2272 }
0x1a8c   :  { %4163 = vmatmul.msk.f32.vlgmr.msrb.gmra.mxu2 %vm143_vm3, %v5553_v16  ;;  %v2177_v11 = vpop.permute.xlu0 %2176 }
0x1a8d   :  { %4168 = vmatpush.xpose.msk.msra.mxu0 %vm143_vm3, %v2177_v11 }
0x1a90   :  { %4169 = vmatmul.msk.f32.vlgmr.msra.gmra.mxu0 %vm143_vm3, %v2173_v44 }
0x1a91   :  { %4179 = vmatpush.xpose.msk.msrb.mxu0 %vm143_vm3, %v2371_v54 }
0x1a93   :  { %v2175_v50 = vpop.permute.xlu1 %2174 }
0x1a94   :  { %4164 = vmatmul.msk.f32.gmra.mxu2 %vm143_vm3, %v5557_v40  ;;  %v2275_v48 = vpop.permute.xlu0 %2274 }
0x1a95   :  { %4173 = vmatpush.xpose.msk.msrb.mxu1 %vm143_vm3, %v2275_v48 }
0x1a98   :  { %4170 = vmatmul.msk.f32.gmra.mxu0 %vm143_vm3, %v2175_v50 }
0x1a99   :  { %4174 = vmatpush.xpose.msk.msrb.mxu1 %vm143_vm3, %v2273_v47 }
0x1a9b   :  { %v2365_v52 = vpop.permute.xlu1 %2364 }
0x1a9c   :  { %4175 = vmatmul.msk.f32.vlgmr.msrb.gmra.mxu1 %vm143_vm3, %v2269_v58  ;;  %v2369_v51 = vpop.permute.xlu0 %2368 }
0x1a9d   :  { %4180 = vmatpush.xpose.msk.msrb.mxu0 %vm143_vm3, %v2369_v51 }
0x1aa0   :  { %4181 = vmatmul.msk.f32.vlgmr.msrb.gmra.mxu0 %vm143_vm3, %v2365_v52 }
0x1aa4   :  { %v2271_v53 = vpop.permute.xlu0 %2270 }
0x1aa5   :  { %4176 = vmatmul.msk.f32.gmra.mxu1 %vm143_vm3, %v2271_v53 }
0x1aa8   :  { %4182 = vmatmul.msk.f32.gmra.mxu0 %vm143_vm3, %v2367_v12 }
0x1b0d   :  { %v2205_v56 = vpop.f32.mrf.mxu0 }
0x1b0e   :  { %v2206_v59 = vadd.f32 %v5606_v41, %v2205_v56 }
0x1b0f   :  { %v2109_v42 = vpop.f32.mrf.mxu2 }
0x1b10   :  { %v2110_v62 = vadd.f32 %v5606_v41, %v2109_v42  ;;  %v2211_v63 = vsel %vm175_vm4, %v2206_v59, -inf }
0x1b11   :  { %2212 = vmax.xlane.f32.xlu0 %v2211_v63 }
0x1b12   :  { %v2115_v4 = vsel %vm175_vm4, %v2110_v62, -inf }
0x1b13   :  { %2116 = vmax.xlane.f32.xlu1 %v2115_v4 }
0x1b15   :  { %v2208_v3 = vpop.f32.mrf.mxu0 }
0x1b16   :  { %v2209_v5 = vadd.f32 %v5615_v35, %v2208_v3 }
0x1b17   :  { %v2112_v7 = vpop.f32.mrf.mxu2 }
0x1b18   :  { %v2113_v0 = vadd.f32 %v5615_v35, %v2112_v7  ;;  %v2214_v1 = vsel %vm175_vm4, %v2209_v5, -inf }
0x1b19   :  { %v2301_v9 = vpop.f32.mrf.mxu1 }
0x1b1a   :  { %v2302_v26 = vadd.f32 %v5606_v41, %v2301_v9  ;;  %v2118_v10 = vsel %vm175_vm4, %v2113_v0, -inf }
0x1b1b   :  { %2119 = vmax.xlane.f32.xlu2 %v2118_v10  ;;  %2215 = vmax.xlane.f32.xlu1 %v2214_v1 }
0x1b1c   :  { %v2307_v13 = vsel %vm175_vm4, %v2302_v26, -inf }
0x1b1d   :  { %2308 = vmax.xlane.f32.xlu0 %v2307_v13  ;;  %v2397_v14 = vpop.f32.mrf.mxu0 }
0x1b1e   :  { %v5624_v15 = vadd.f32 %v5606_v41, %v2397_v14 }
0x1b20   :  { %v2403_v6 = vsel %vm175_vm4, %v5624_v15, -inf }
0x1b22   :  { %v2304_v17 = vpop.f32.mrf.mxu1 }
0x1b23   :  { %v2305_v18 = vadd.f32 %v5615_v35, %v2304_v17  ;;  %2404 = vmax.xlane.f32.xlu2 %v2403_v6 }
0x1b25   :  { %v2400_v21 = vpop.f32.mrf.mxu0  ;;  %v2310_v23 = vsel %vm175_vm4, %v2305_v18, -inf }
0x1b26   :  { %v5631_v24 = vadd.f32 %v5615_v35, %v2400_v21  ;;  %2311 = vmax.xlane.f32.xlu1 %v2310_v23 }
0x1b28   :  { %v2406_v20 = vsel %vm175_vm4, %v5631_v24, -inf }
0x1b29   :  { %2407 = vmax.xlane.f32.xlu0 %v2406_v20 }
0x1b3b   :  { %4379 = vrot.lane.b32.xlu2 %v4378_v25, %s4832_s7 }
0x1b3d   :  { %4369 = vrot.lane.b32.xlu0 %v4378_v25, %s4823_s0 }
0x1b84   :  { %v2213_v2 = vpop.xlane.xlu0 %2212 }
0x1b85   :  { %v2217_v39 = vsub.f32 %v2206_v59, %v2213_v2 }
0x1b86   :  { %v2117_v27 = vpop.xlane.xlu1 %2116 }
0x1b87   :  { %v2219_v29 = vmul.f32 1.442695, %v2217_v39  ;;  %v2121_v30 = vsub.f32 %v2110_v62, %v2117_v27 }
0x1b89   :  { %4588 = vpow2.f32 %v2219_v29  ;;  %v2123_v49 = vmul.f32 1.442695, %v2121_v30 }
0x1b8b   :  { %4590 = vpow2.f32 %v2123_v49 }
0x1b8e   :  { %v2216_v31 = vpop.xlane.xlu1 %2215  ;;  %v2120_v60 = vpop.xlane.xlu2 %2119 }
0x1b8f   :  { %v5639_v32 = vpop.eup %4588  ;;  %v2218_v34 = vsub.f32 %v2209_v5, %v2216_v31  ;;  %v2122_v40 = vsub.f32 %v2113_v0, %v2120_v60 }
0x1b90   :  { %v2309_v36 = vpop.xlane.xlu0 %2308  ;;  %v2223_v37 = vsel %vm175_vm4, %v5639_v32, 0.0 }
0x1b91   :  { %v4591_v61 = vpop.eup %4590  ;;  %v2221_v16 = vmul.f32 1.442695, %v2218_v34  ;;  %v2313_v38 = vsub.f32 %v2302_v26, %v2309_v36  ;;  %2224 = vadd.xlane.f32.xlu1 %v2223_v37  ;;  %v2125_v45 = vmul.f32 1.442695, %v2122_v40  ;;  %v2728_v40 = vld [vmem:[#allocation2 + $0x1c0] sm:$0xff] }
0x1b92   :  { %v2127_v43 = vsel %vm175_vm4, %v4591_v61, 0.0 }
0x1b93   :  { %v2315_v44 = vmul.f32 1.442695, %v2313_v38  ;;  %2128 = vadd.xlane.f32.xlu2 %v2127_v43  ;;  %4592 = vpow2.f32 %v2221_v16  ;;  %v2730_v16 = vld [vmem:[#allocation2 + $0x1d0] sm:$0xff]  ;;  %v2729_v38 = vld [vmem:[#allocation2 + $0x1c8] sm:$0xff]  ;;  %v2727_v43 = vld [vmem:[#allocation2 + $0x1b8] sm:$0xff] }
0x1b95   :  { %4594 = vpow2.f32 %v2315_v44  ;;  %v2726_v44 = vld [vmem:[#allocation2 + $0x1b0] sm:$0xff] }
0x1b96   :  { %4596 = vpow2.f32 %v2125_v45  ;;  %v2405_v58 = vpop.xlane.xlu2 %2404  ;;  %v2725_v45 = vld [vmem:[#allocation2 + $0x1a8] sm:$0xff] }
0x1b97   :  { %v2409_v5 = vsub.f32 %v5624_v15, %v2405_v58  ;;  %v2720_v58 = vld [vmem:[#allocation2 + $0x180] sm:$0xff] }
0x1b99   :  { %v5644_v46 = vpop.eup %4592  ;;  %v2312_v62 = vpop.xlane.xlu1 %2311  ;;  %v2411_v0 = vmul.f32 1.442695, %v2409_v5 }
0x1b9a   :  { %v2226_v11 = vsel %vm175_vm4, %v5644_v46, 0.0  ;;  %v2314_v63 = vsub.f32 %v2305_v18, %v2312_v62  ;;  %v5683_v62 = vld [vmem:[#allocation5 + $0x10] sm:$0xff] }
0x1b9b   :  { %v5646_v47 = vpop.eup %4594  ;;  %2227 = vadd.xlane.f32.xlu2 %v2226_v11 }
0x1b9c   :  { %v2319_v54 = vsel %vm175_vm4, %v5646_v47, 0.0  ;;  %v4597_v48 = vpop.eup %4596  ;;  %v2408_v51 = vpop.xlane.xlu0 %2407  ;;  %v2317_v4 = vmul.f32 1.442695, %v2314_v63  ;;  %v2715_v63 = vsel %vm87_vm0, %v5683_v62, %v5366_v55 }
0x1b9d   :  { %2320 = vadd.xlane.f32.xlu0 %v2319_v54  ;;  %v2130_v50 = vsel %vm175_vm4, %v4597_v48, 0.0  ;;  %v2410_v9 = vsub.f32 %v5631_v24, %v2408_v51  ;;  %v2722_v54 = vld [vmem:[#allocation2 + $0x190] sm:$0xff] }
0x1b9e   :  { %v4380_v53 = vpop.permute.xlu2 %4379  ;;  %4598 = vpow2.f32 %v2317_v4  ;;  %v2717_v4 = vsel %vm90_vm1, %v2715_v63, %v4925_v19 }
0x1b9f   :  { %v4381_v59 = vunpack.i.l.bf16 %v4380_v53  ;;  %v4382_v42 = vunpack.i.h.bf16 %v4380_v53  ;;  %4600 = vpow2.f32 %v2411_v0  ;;  %v2413_v26 = vmul.f32 1.442695, %v2410_v9 }
0x1ba1   :  { %4602 = vpow2.f32 %v2413_v26 }
0x1ba3   :  { %2131 = vadd.xlane.f32.xlu2 %v2130_v50 }
0x1ba4   :  { %v5655_v3 = vpop.eup %4598 }
0x1ba5   :  { %v2322_v7 = vsel %vm175_vm4, %v5655_v3, 0.0  ;;  %v5661_v10 = vpop.eup %4600 }
0x1ba6   :  { %v2415_v1 = vsel %vm175_vm4, %v5661_v10, 0.0 }
0x1ba7   :  { %v5665_v13 = vpop.eup %4602 }
0x1ba8   :  { %v2418_v14 = vsel %vm175_vm4, %v5665_v13, 0.0 }
0x1baa   :  { %4374 = vrot.lane.b32.xlu1 %v4378_v25, %s4828_s16 }
0x1baf   :  { %v4370_v52 = vpop.permute.xlu0 %4369 }
0x1bb0   :  { %v4371_v12 = vunpack.i.l.bf16 %v4370_v52  ;;  %v4372_v56 = vunpack.i.h.bf16 %v4370_v52 }
0x1bb2   :  { %2163 = vmatpush.msrb.mxu3 %v4371_v12 }
0x1bb4   :  { %2164 = vmatpush.msrb.mxu3 %v4372_v56 }
0x1bb6   :  { %2355 = vmatpush.msra.mxu3 %v4381_v59 }
0x1bb8   :  { %2356 = vmatpush.msra.mxu3 %v4382_v42 }
0x1bbb   :  { %4384 = vrot.lane.b32.xlu2 %v4378_v25, %s4833_s21 }
0x1bd4   :  { %2323 = vadd.xlane.f32.xlu1 %v2322_v7 }
0x1be4   :  { %2416 = vadd.xlane.f32.xlu2 %v2415_v1 }
0x1bec   :  { %2419 = vadd.xlane.f32.xlu2 %v2418_v14 }
0x1c04   :  { %v2225_v21 = vpop.xlane.xlu1 %2224 }
0x1c06   :  { %v2129_v15 = vpop.xlane.xlu2 %2128 }
0x1c07   :  { %4604 = vrcp.f32 %v2129_v15  ;;  %v4449_v15 = vld [vmem:[%s6257_s2 + $0x1c] ss:$0 sm:$0xff] }
0x1c08   :  { %4606 = vrcp.f32 %v2225_v21  ;;  %v4188_v21 = vld [vmem:[%s6259_s4 + $0x78] sm:$0xff] }
0x1c09   :  { %2515 = vmatpush.msra.mxu1 %v4188_v21 }
0x1c0d   :  { %v4605_v17 = vpop.eup %4604 }
0x1c0e   :  { %v2135_v6 = vmul.f32 %v4605_v17, %v4591_v61  ;;  %v2228_v18 = vpop.xlane.xlu2 %2227  ;;  %v4607_v25 = vpop.eup %4606 }
0x1c0f   :  { %v2231_v49 = vmul.f32 %v4607_v25, %v5639_v32  ;;  %v2731_v32 = vld [vmem:[#allocation2 + $0x1d8] sm:$0xff] }
0x1c10   :  { %4165 = vmatmul.msk.f32.vlgmr.msrb.gmra.mxu3 %vm175_vm4, %v2135_v6  ;;  %v2321_v24 = vpop.xlane.xlu0 %2320 }
0x1c16   :  { %v2132_v23 = vpop.xlane.xlu2 %2131 }
0x1c17   :  { %4608 = vrcp.f32 %v2132_v23  ;;  %v4187_v23 = vld [vmem:[%s6259_s4 + $0x70] sm:$0xff] }
0x1c18   :  { %4610 = vrcp.f32 %v2321_v24  ;;  %v4186_v24 = vld [vmem:[%s6259_s4 + $0x68] sm:$0xff]  ;;  %2516 = vmatpush.msra.mxu1 %v4187_v23 }
0x1c19   :  { %4612 = vrcp.f32 %v2228_v18 }
0x1c1a   :  { %2517 = vmatpush.msra.mxu1 %v4186_v24 }
0x1c1c   :  { %v4375_v20 = vpop.permute.xlu1 %4374 }
0x1c1d   :  { %v4376_v2 = vunpack.i.l.bf16 %v4375_v20  ;;  %v4609_v39 = vpop.eup %4608  ;;  %v4377_v27 = vunpack.i.h.bf16 %v4375_v20  ;;  %v4185_v20 = vld [vmem:[%s6259_s4 + $0x60] sm:$0xff] }
0x1c1e   :  { %v4385_v29 = vpop.permute.xlu2 %4384  ;;  %v2136_v30 = vmul.f32 %v4609_v39, %v4597_v48  ;;  %v4611_v34 = vpop.eup %4610  ;;  %v2721_v48 = vld [vmem:[#allocation2 + $0x188] sm:$0xff]  ;;  %2518 = vmatpush.msra.mxu1 %v4185_v20  ;;  %v4194_v20 = vld [vmem:[%s6260_s5 + $0x58] sm:$0xff] }
0x1c1f   :  { %2259 = vmatpush.msra.mxu2 %v4376_v2  ;;  %v4386_v31 = vunpack.i.l.bf16 %v4385_v29  ;;  %v4387_v60 = vunpack.i.h.bf16 %v4385_v29  ;;  %v4613_v36 = vpop.eup %4612  ;;  %v2327_v37 = vmul.f32 %v4611_v34, %v5646_v47  ;;  %v2724_v47 = vld [vmem:[#allocation2 + $0x1a0] sm:$0xff]  ;;  %2605 = vmatpush.msrb.mxu3 %v4194_v20 }
0x1c20   :  { %4166 = vmatmul.msk.f32.gmra.mxu3 %vm175_vm4, %v2136_v30  ;;  %v2232_v61 = vmul.f32 %v4613_v36, %v5644_v46  ;;  %v2723_v46 = vld [vmem:[#allocation2 + $0x198] sm:$0xff] }
0x1c21   :  { %2260 = vmatpush.msra.mxu2 %v4377_v27 }
0x1c22   :  { %4171 = vmatmul.msk.f32.vlgmr.msra.gmra.mxu2 %vm175_vm4, %v2231_v49 }
0x1c23   :  { %2451 = vmatpush.msrb.mxu2 %v4386_v31 }
0x1c25   :  { %2452 = vmatpush.msrb.mxu2 %v4387_v60 }
0x1c27   :  { %2744 = vmatpush.msra.mxu2 %v2731_v32 }
0x1c28   :  { %4177 = vmatmul.msk.f32.vlgmr.msra.gmra.mxu3 %vm175_vm4, %v2327_v37 }
0x1c29   :  { %2745 = vmatpush.msra.mxu2 %v2730_v16  ;;  %v4450_v16 = vld [vmem:[%s6257_s2 + $0x13] ss:$0 sm:$0xff] }
0x1c2a   :  { %4172 = vmatmul.msk.f32.gmra.mxu2 %vm175_vm4, %v2232_v61 }
0x1c2b   :  { %2746 = vmatpush.msra.mxu2 %v2729_v38 }
0x1c2d   :  { %2747 = vmatpush.msra.mxu2 %v2728_v40 }
0x1c2f   :  { %2748 = vmatpush.msra.mxu2 %v2727_v43 }
0x1c31   :  { %2749 = vmatpush.msra.mxu2 %v2726_v44 }
0x1c33   :  { %2750 = vmatpush.msra.mxu2 %v2725_v45 }
0x1c35   :  { %2751 = vmatpush.msra.mxu2 %v2724_v47 }
0x1c37   :  { %2752 = vmatpush.msra.mxu2 %v2723_v46 }
0x1c39   :  { %2753 = vmatpush.msra.mxu2 %v2722_v54 }
0x1c3b   :  { %2754 = vmatpush.msra.mxu2 %v2721_v48 }
0x1c3d   :  { %2755 = vmatpush.msra.mxu2 %v2720_v58 }
0x1c47   :  { %v2324_v11 = vpop.xlane.xlu1 %2323 }
0x1c48   :  { %4614 = vrcp.f32 %v2324_v11 }
0x1c4e   :  { %v4615_v50 = vpop.eup %4614 }
0x1c4f   :  { %v2328_v51 = vmul.f32 %v4615_v50, %v5655_v3  ;;  %v5691_v3 = vld [vmem:[#allocation5 + $0x18] sm:$0xff] }
0x1c50   :  { %v2716_v5 = vsel %vm87_vm0, %v5691_v3, %v5374_v57 }
0x1c51   :  { %4178 = vmatmul.msk.f32.gmra.mxu3 %vm175_vm4, %v2328_v51  ;;  %v2718_v7 = vsel %vm90_vm1, %v2716_v5, %v4932_v22  ;;  %v4197_v5 = vld [vmem:[%s6261_s6 + $0x80] sm:$0xff] }
0x1c57   :  { %v2417_v52 = vpop.xlane.xlu2 %2416 }
0x1c58   :  { %4616 = vrcp.f32 %v2417_v52  ;;  %v4202_v52 = vld [vmem:[%s6261_s6 + $0xa8] sm:$0xff] }
0x1c5e   :  { %v4617_v53 = vpop.eup %4616 }
0x1c5f   :  { %v2423_v12 = vmul.f32 %v4617_v53, %v5661_v10  ;;  %v2420_v56 = vpop.xlane.xlu2 %2419  ;;  %v4201_v53 = vld [vmem:[%s6261_s6 + $0xa0] sm:$0xff] }
0x1c60   :  { %4618 = vrcp.f32 %v2420_v56  ;;  %v4200_v56 = vld [vmem:[%s6261_s6 + $0x98] sm:$0xff] }
0x1c61   :  { %4183 = vmatmul.msk.f32.vlgmr.msrb.gmra.mxu2 %vm175_vm4, %v2423_v12 }
0x1c66   :  { %v4619_v59 = vpop.eup %4618 }
0x1c67   :  { %v2424_v42 = vmul.f32 %v4619_v59, %v5665_v13 }
0x1c69   :  { %4184 = vmatmul.msk.f32.gmra.mxu2 %vm175_vm4, %v2424_v42  ;;  %v4199_v42 = vld [vmem:[%s6261_s6 + $0x90] sm:$0xff] }
0x1c71   :  { %4207 = vmatmul.msk.f32.vlgmr.msra.gmra.mxu2 %vm107_vm2, %v2717_v4  ;;  %v4198_v4 = vld [vmem:[%s6261_s6 + $0x88] sm:$0xff] }
0x1c79   :  { %4208 = vmatmul.msk.f32.gmra.mxu2 %vm107_vm2, %v2718_v7 }
0x1c93   :  { %v2166_v0 = vpop.f32.mrf.mxu3 }
0x1ca3   :  { %v2169_v9 = vpop.f32.mrf.mxu3 }
0x1ca5   :  { %v2262_v26 = vpop.f32.mrf.mxu2 }
0x1ca6   :  { %2462 = vrot.lane.b32.xlu0 %v2262_v26, %s4820_s18 }
0x1cab   :  { %v2358_v55 = vpop.f32.mrf.mxu3 }
0x1cac   :  { %2470 = vrot.lane.b32.xlu1 %v2358_v55, %s4834_s22 }
0x1cad   :  { %v2265_v10 = vpop.f32.mrf.mxu2 }
0x1cd4   :  { %v2361_v57 = vpop.f32.mrf.mxu3 }
0x1ce4   :  { %v2454_v1 = vpop.f32.mrf.mxu2 }
0x1ce5   :  { %2478 = vrot.lane.b32.xlu0 %v2454_v1, %s4835_s24 }
0x1cec   :  { %v2457_v13 = vpop.f32.mrf.mxu2 }
0x1ced   :  { %2464 = vrot.lane.b32.xlu0 %v2265_v10, %s4820_s18  ;;  %2480 = vrot.lane.b32.xlu1 %v2457_v13, %s4835_s24 }
0x1cf4   :  { %v2757_v14 = vpop.f32.mrf.mxu2 }
0x1cf5   :  { %2472 = vrot.lane.b32.xlu0 %v2361_v57, %s4834_s22  ;;  %v5708_v17 = vadd.f32 %v4449_v15, %v2757_v14 }
0x1cfc   :  { %v2760_v6 = vpop.f32.mrf.mxu2 }
0x1cfd   :  { %v5710_v18 = vadd.f32 %v4449_v15, %v2760_v6  ;;  %2765 = vrot.lane.b32.xlu0 %v5708_v17, %s4825_s30 }
0x1cff   :  { %2767 = vrot.lane.b32.xlu2 %v5710_v18, %s4825_s30  ;;  %v5808_v24 = vpack.i.bf16 %v5708_v17, %v5710_v18 }
0x1d18   :  { %v2463_v25 = vpop.permute.xlu0 %2462 }
0x1d19   :  { %v2484_v39 = vsel %vm143_vm3, %v2166_v0, %v2463_v25  ;;  %v4193_v25 = vld [vmem:[%s6260_s5 + $0x50] sm:$0xff] }
0x1d1a   :  { %2606 = vmatpush.msrb.mxu3 %v4193_v25 }
0x1d1e   :  { %v2471_v2 = vpop.permute.xlu1 %2470 }
0x1d1f   :  { %v2486_v27 = vsel %vm175_vm4, %v2484_v39, %v2471_v2  ;;  %v4192_v2 = vld [vmem:[%s6260_s5 + $0x48] sm:$0xff]  ;;  %v4191_v39 = vld [vmem:[%s6260_s5 + $0x40] sm:$0xff] }
0x1d20   :  { %2607 = vmatpush.msrb.mxu3 %v4192_v2 }
0x1d22   :  { %2608 = vmatpush.msrb.mxu3 %v4191_v39 }
0x1d57   :  { %v2479_v29 = vpop.permute.xlu0 %2478 }
0x1d58   :  { %v2488_v30 = vsel %vm549_vm5, %v2486_v27, %v2479_v29 }
0x1d59   :  { %v2768_v49 = vpop.permute.xlu2 %2767  ;;  %4189 = vmatmul.msk.f32.vlgmr.msra.gmra.mxu1 %vm87_vm0, %v2488_v30 }
0x1d5a   :  { %4209 = vmatpush.xpose.msk.msrb.mxu1 %vm143_vm3, %v2768_v49 }
0x1d5f   :  { %v2465_v31 = vpop.permute.xlu0 %2464  ;;  %v2481_v36 = vpop.permute.xlu1 %2480 }
0x1d60   :  { %v2485_v60 = vsel %vm143_vm3, %v2169_v9, %v2465_v31 }
0x1d67   :  { %v2473_v34 = vpop.permute.xlu0 %2472 }
0x1d68   :  { %v2487_v37 = vsel %vm175_vm4, %v2485_v60, %v2473_v34 }
0x1d69   :  { %v2489_v61 = vsel %vm549_vm5, %v2487_v37, %v2481_v36 }
0x1d6a   :  { %4190 = vmatmul.msk.f32.gmra.mxu1 %vm87_vm0, %v2489_v61 }
0x1d6f   :  { %v2766_v32 = vpop.permute.xlu0 %2765 }
0x1d70   :  { %4210 = vmatpush.xpose.msk.msrb.mxu1 %vm143_vm3, %v2766_v32 }
0x1d73   :  { %4211 = vmatmul.msk.f32.vlgmr.msrb.gmra.mxu1 %vm143_vm3, %v5708_v17 }
0x1d7b   :  { %4212 = vmatmul.msk.f32.gmra.mxu1 %vm143_vm3, %v5710_v18 }
0x1dd6   :  { %v2520_v38 = vpop.f32.mrf.mxu1 }
0x1dd7   :  { %v2521_v40 = vadd.f32 %v4450_v16, %v2520_v38 }
0x1dd9   :  { %v2526_v43 = vadd.f32 %v2521_v40, %v5533_v28  ;;  %v4204_v28 = vld [vmem:[%s6261_s6 + $0xb8] sm:$0xff] }
0x1dda   :  { %2643 = vmatpush.msra.mxu0 %v4204_v28 }
0x1ddb   :  { %v2528_v44 = vsel %vm87_vm0, %v2526_v43, 0.0 }
0x1ddc   :  { %2529 = vadd.xlane.f32.xlu1 %v2528_v44  ;;  %v4452_v44 = vld [vmem:[%s6257_s2 + $0x19] ss:$0 sm:$0xff] }
0x1de7   :  { %v2523_v45 = vpop.f32.mrf.mxu1 }
0x1de8   :  { %v2524_v47 = vadd.f32 %v4450_v16, %v2523_v45  ;;  %v4451_v16 = vld [vmem:[%s6257_s2 + $0x18] ss:$0 sm:$0xff] }
0x1dea   :  { %v2527_v11 = vadd.f32 %v2524_v47, %v5542_v33  ;;  %v4203_v33 = vld [vmem:[%s6261_s6 + $0xb0] sm:$0xff] }
0x1deb   :  { %2644 = vmatpush.msra.mxu0 %v4203_v33 }
0x1dec   :  { %v2531_v46 = vsel %vm87_vm0, %v2527_v11, 0.0 }
0x1ded   :  { %2532 = vadd.xlane.f32.xlu0 %v2531_v46  ;;  %2645 = vmatpush.msra.mxu0 %v4202_v52 }
0x1def   :  { %2646 = vmatpush.msra.mxu0 %v4201_v53 }
0x1df0   :  { %v2794_v54 = vpop.f32.mrf.mxu1 }
0x1df1   :  { %v2795_v48 = vadd.f32 %v5606_v41, %v2794_v54  ;;  %2647 = vmatpush.msra.mxu0 %v4200_v56 }
0x1df3   :  { %v2800_v50 = vsel %vm175_vm4, %v2795_v48, -inf  ;;  %2648 = vmatpush.msra.mxu0 %v4199_v42 }
0x1df5   :  { %2801 = vmax.xlane.f32.xlu0 %v2800_v50  ;;  %2649 = vmatpush.msra.mxu0 %v4198_v4 }
0x1df7   :  { %2650 = vmatpush.msra.mxu0 %v4197_v5 }
0x1df8   :  { %v2797_v10 = vpop.f32.mrf.mxu1 }
0x1df9   :  { %v2798_v57 = vadd.f32 %v5615_v35, %v2797_v10 }
0x1dfb   :  { %v2803_v15 = vsel %vm175_vm4, %v2798_v57, -inf }
0x1e09   :  { %2863 = vrot.lane.b32.xlu0 %v5710_v18, %s4824_s29 }
0x1e11   :  { %2857 = vrot.lane.b32.xlu0 %v5708_v17, %s4826_s10 }
0x1e19   :  { %2859 = vrot.lane.b32.xlu0 %v5710_v18, %s4826_s10 }
0x1e4f   :  { %v2530_v58 = vpop.xlane.xlu1 %2529 }
0x1e50   :  { %v2534_v51 = vmul.f32 %v2530_v58, %v5072_v8 }
0x1e52   :  { %v5770_v12 = vsub.f32 %v2526_v43, %v2534_v51 }
0x1e54   :  { %v2538_v59 = vmul.f32 %v5770_v12, %v5770_v12 }
0x1e56   :  { %v2540_v63 = vsel %vm87_vm0, %v2538_v59, 0.0 }
0x1e57   :  { %2541 = vadd.xlane.f32.xlu2 %v2540_v63 }
0x1e60   :  { %v2533_v7 = vpop.xlane.xlu0 %2532 }
0x1e61   :  { %v2535_v0 = vmul.f32 %v2533_v7, %v5072_v8 }
0x1e63   :  { %v5788_v9 = vsub.f32 %v2527_v11, %v2535_v0 }
0x1e65   :  { %v2539_v26 = vmul.f32 %v5788_v9, %v5788_v9 }
0x1e67   :  { %v2543_v55 = vsel %vm87_vm0, %v2539_v26, 0.0 }
0x1e68   :  { %2544 = vadd.xlane.f32.xlu1 %v2543_v55  ;;  %v2802_v1 = vpop.xlane.xlu0 %2801 }
0x1e69   :  { %v2806_v13 = vsub.f32 %v2795_v48, %v2802_v1 }
0x1e6b   :  { %v2808_v14 = vmul.f32 1.442695, %v2806_v13 }
0x1e6d   :  { %4620 = vpow2.f32 %v2808_v14 }
0x1e6f   :  { %2959 = vrot.lane.b32.xlu2 %v5710_v18, %s4827_s15 }
0x1e70   :  { %2804 = vmax.xlane.f32.xlu1 %v2803_v15  ;;  %v4453_v15 = vld [vmem:[%s6257_s2 + $0x14] ss:$0 sm:$0xff] }
0x1e73   :  { %v5797_v6 = vpop.eup %4620 }
0x1e74   :  { %v2812_v21 = vsel %vm175_vm4, %v5797_v6, 0.0 }
0x1e75   :  { %2813 = vadd.xlane.f32.xlu0 %v2812_v21 }
0x1e77   :  { %2953 = vrot.lane.b32.xlu2 %v5708_v17, %s4829_s19 }
0x1e7b   :  { %v2864_v23 = vpop.permute.xlu0 %2863 }
0x1e7c   :  { %4215 = vmatpush.xpose.msk.msrb.mxu0 %vm143_vm3, %v2864_v23 }
0x1e7f   :  { %2955 = vrot.lane.b32.xlu2 %v5710_v18, %s4829_s19 }
0x1e83   :  { %v5839_v40 = vpop.permute.xlu0 %2857 }
0x1e89   :  { %4389 = vrot.lane.b32.xlu1 %v5808_v24, %s4823_s0  ;;  %3053 = vrot.lane.b32.xlu0 %v5708_v17, %s4830_s20 }
0x1e8b   :  { %v2860_v33 = vpop.permute.xlu0 %2859 }
0x1e91   :  { %2861 = vrot.lane.b32.xlu1 %v5708_v17, %s4824_s29 }
0x1e99   :  { %2957 = vrot.lane.b32.xlu1 %v5708_v17, %s4827_s15 }
0x1ea1   :  { %3055 = vrot.lane.b32.xlu1 %v5710_v18, %s4830_s20 }
0x1ea9   :  { %3049 = vrot.lane.b32.xlu1 %v5708_v17, %s4831_s3 }
0x1eca   :  { %v2542_v17 = vpop.xlane.xlu2 %2541 }
0x1ecb   :  { %v2546_v27 = vmul.f32 %v2542_v17, %v5072_v8 }
0x1ecd   :  { %v2548_v29 = vadd.f32 1e-05, %v2546_v27 }
0x1ecf   :  { %4622 = vrsqrt.f32 %v2548_v29  ;;  %vm2556_vm8 = vweird.f32 %v2548_v29 }
0x1ed2   :  { %v2960_v10 = vpop.permute.xlu2 %2959 }
0x1ed5   :  { %v4623_v30 = vpop.eup %4622 }
0x1ed6   :  { %v2551_v49 = vmul.f32 %v4623_v30, %v2548_v29  ;;  %vm2557_vm7 = vweird.f32 %v4623_v30 }
0x1ed7   :  { %vm2558_vm9 = vmor %vm2556_vm8, %vm2557_vm7 }
0x1ed8   :  { %v2552_v31 = vmul.f32 %v4623_v30, %v2551_v49 }
0x1eda   :  { %v2553_v60 = vmul.f32 0.5, %v2552_v31  ;;  %v2954_v13 = vpop.permute.xlu2 %2953 }
0x1edb   :  { %v2545_v34 = vpop.xlane.xlu1 %2544 }
0x1edc   :  { %v2554_v36 = vsub.f32 1.5, %v2553_v60  ;;  %v2547_v37 = vmul.f32 %v2545_v34, %v5072_v8 }
0x1ede   :  { %v2555_v61 = vmul.f32 %v4623_v30, %v2554_v36  ;;  %v2549_v32 = vadd.f32 1e-05, %v2547_v37 }
0x1ee0   :  { %v2559_v38 = vsel %vm2558_vm9, %v4623_v30, %v2555_v61  ;;  %4624 = vrsqrt.f32 %v2549_v32  ;;  %vm2566_vm11 = vweird.f32 %v2549_v32 }
0x1ee1   :  { %v2570_v43 = vmul.f32 %v2559_v38, %v5770_v12 }
0x1ee3   :  { %v2574_v45 = vmul.f32 %v4451_v16, %v2570_v43  ;;  %v2805_v47 = vpop.xlane.xlu1 %2804 }
0x1ee4   :  { %v2807_v11 = vsub.f32 %v2798_v57, %v2805_v47  ;;  %v2956_v57 = vpop.permute.xlu2 %2955 }
0x1ee5   :  { %v5845_v46 = vadd.f32 %v4452_v44, %v2574_v45 }
0x1ee6   :  { %v4625_v54 = vpop.eup %4624  ;;  %v2810_v48 = vmul.f32 1.442695, %v2807_v11 }
0x1ee7   :  { %v2561_v50 = vmul.f32 %v4625_v54, %v2549_v32  ;;  %4195 = vmatmul.msk.f32.vlgmr.msrb.gmra.mxu3 %vm87_vm0, %v5845_v46  ;;  %vm2567_vm10 = vweird.f32 %v4625_v54 }
0x1ee8   :  { %4626 = vpow2.f32 %v2810_v48  ;;  %vm2568_vm12 = vmor %vm2566_vm11, %vm2567_vm10  ;;  %v2814_v42 = vpop.xlane.xlu0 %2813 }
0x1ee9   :  { %v2562_v28 = vmul.f32 %v4625_v54, %v2561_v50  ;;  %4628 = vrcp.f32 %v2814_v42 }
0x1eeb   :  { %v2563_v58 = vmul.f32 0.5, %v2562_v28 }
0x1eed   :  { %v2564_v51 = vsub.f32 1.5, %v2563_v58 }
0x1eee   :  { %v4627_v52 = vpop.eup %4626 }
0x1eef   :  { %v2565_v53 = vmul.f32 %v4625_v54, %v2564_v51  ;;  %v2815_v12 = vsel %vm175_vm4, %v4627_v52, 0.0  ;;  %v4629_v7 = vpop.eup %4628 }
0x1ef0   :  { %2816 = vadd.xlane.f32.xlu2 %v2815_v12  ;;  %v2820_v55 = vmul.f32 %v4629_v7, %v5797_v6 }
0x1ef1   :  { %v2569_v56 = vsel %vm2568_vm12, %v4625_v54, %v2565_v53 }
0x1ef2   :  { %v2571_v59 = vmul.f32 %v2569_v56, %v5788_v9 }
0x1ef4   :  { %v2575_v63 = vmul.f32 %v4451_v16, %v2571_v59 }
0x1ef6   :  { %v5851_v4 = vadd.f32 %v4452_v44, %v2575_v63 }
0x1ef8   :  { %4196 = vmatmul.msk.f32.gmra.mxu3 %vm87_vm0, %v5851_v4 }
0x1efb   :  { %v4390_v5 = vpop.permute.xlu1 %4389 }
0x1efc   :  { %v4391_v0 = vunpack.i.l.bf16 %v4390_v5  ;;  %v4392_v26 = vunpack.i.h.bf16 %v4390_v5 }
0x1efe   :  { %2848 = vmatpush.msra.mxu3 %v4391_v0 }
0x1f00   :  { %2849 = vmatpush.msra.mxu3 %v4392_v26 }
0x1f01   :  { %4213 = vmatmul.msk.f32.vlgmr.msra.gmra.mxu3 %vm175_vm4, %v2820_v55 }
0x1f02   :  { %4221 = vmatpush.xpose.msk.msrb.mxu3 %vm143_vm3, %v2960_v10 }
0x1f03   :  { %v2862_v9 = vpop.permute.xlu1 %2861 }
0x1f04   :  { %4216 = vmatpush.xpose.msk.msrb.mxu0 %vm143_vm3, %v2862_v9 }
0x1f08   :  { %3051 = vrot.lane.b32.xlu2 %v5710_v18, %s4831_s3  ;;  %v3054_v18 = vpop.permute.xlu0 %3053 }
0x1f0b   :  { %v2958_v1 = vpop.permute.xlu1 %2957 }
0x1f0c   :  { %4222 = vmatpush.xpose.msk.msrb.mxu3 %vm143_vm3, %v2958_v1 }
0x1f13   :  { %v3056_v2 = vpop.permute.xlu1 %3055 }
0x1f1b   :  { %v3050_v29 = vpop.permute.xlu1 %3049 }
0x1f63   :  { %v2817_v14 = vpop.xlane.xlu2 %2816 }
0x1f64   :  { %4630 = vrcp.f32 %v2817_v14 }
0x1f6a   :  { %v4631_v6 = vpop.eup %4630  ;;  %v2610_v21 = vpop.f32.mrf.mxu3 }
0x1f6b   :  { %v2611_v23 = vadd.f32 %v4453_v15, %v2610_v21  ;;  %v2821_v20 = vmul.f32 %v4631_v6, %v4627_v52  ;;  %v3052_v30 = vpop.permute.xlu2 %3051 }
0x1f6d   :  { %v2616_v25 = vmax.f32 %v2611_v23, 0.0  ;;  %4214 = vmatmul.msk.f32.gmra.mxu3 %vm175_vm4, %v2821_v20 }
0x1f6f   :  { %4205 = vmatmul.msk.f32.vlgmr.msra.gmra.mxu0 %vm90_vm1, %v2616_v25 }
0x1f70   :  { %4227 = vmatpush.xpose.msk.msra.mxu0 %vm143_vm3, %v3056_v2 }
0x1f74   :  { %4228 = vmatpush.xpose.msk.msra.mxu0 %vm143_vm3, %v3054_v18 }
0x1f75   :  { %4223 = vmatmul.msk.f32.vlgmr.msrb.gmra.mxu3 %vm143_vm3, %v2954_v13 }
0x1f7b   :  { %v2613_v39 = vpop.f32.mrf.mxu3 }
0x1f7c   :  { %v2614_v17 = vadd.f32 %v4453_v15, %v2613_v39 }
0x1f7d   :  { %4224 = vmatmul.msk.f32.gmra.mxu3 %vm143_vm3, %v2956_v57 }
0x1f7e   :  { %v2617_v27 = vmax.f32 %v2614_v17, 0.0 }
0x1f80   :  { %4206 = vmatmul.msk.f32.gmra.mxu0 %vm90_vm1, %v2617_v27 }
0x1f84   :  { %v5877_v49 = vpop.f32.mrf.mxu3 }
0x1f88   :  { %4217 = vmatmul.msk.f32.vlgmr.msrb.gmra.mxu0 %vm143_vm3, %v5839_v40 }
0x1f90   :  { %4218 = vmatmul.msk.f32.gmra.mxu0 %vm143_vm3, %v2860_v33 }
0x1f98   :  { %4229 = vmatmul.msk.f32.vlgmr.msra.gmra.mxu0 %vm143_vm3, %v3050_v29 }
0x1fa0   :  { %4230 = vmatmul.msk.f32.gmra.mxu0 %vm143_vm3, %v3052_v30 }
0x1fec   :  { %v5881_v60 = vpop.f32.mrf.mxu0 }
0x1ff0   :  { %v5879_v31 = vpop.f32.mrf.mxu3 }
0x1ff8   :  { %v2986_v34 = vpop.f32.mrf.mxu3 }
0x1ff9   :  { %v2987_v36 = vadd.f32 %v5606_v41, %v2986_v34 }
0x1ffb   :  { %v2992_v37 = vsel %vm175_vm4, %v2987_v36, -inf }
0x1ffc   :  { %2993 = vmax.xlane.f32.xlu2 %v2992_v37 }
0x1ffd   :  { %v5885_v61 = vpop.f32.mrf.mxu0 }
0x2000   :  { %v2989_v32 = vpop.f32.mrf.mxu3 }
0x2001   :  { %v2990_v16 = vadd.f32 %v5615_v35, %v2989_v32 }
0x2003   :  { %v2995_v38 = vsel %vm175_vm4, %v2990_v16, -inf }
0x2004   :  { %2996 = vmax.xlane.f32.xlu2 %v2995_v38 }
0x2005   :  { %v2890_v40 = vpop.f32.mrf.mxu0 }
0x2006   :  { %v2891_v43 = vadd.f32 %v5606_v41, %v2890_v40 }
0x2008   :  { %v2896_v44 = vsel %vm175_vm4, %v2891_v43, -inf }
0x2009   :  { %2897 = vmax.xlane.f32.xlu0 %v2896_v44 }
0x200d   :  { %v2893_v45 = vpop.f32.mrf.mxu0 }
0x200e   :  { %v2894_v47 = vadd.f32 %v5615_v35, %v2893_v45 }
0x2010   :  { %v2899_v11 = vsel %vm175_vm4, %v2894_v47, -inf }
0x2011   :  { %2900 = vmax.xlane.f32.xlu1 %v2899_v11 }
0x2015   :  { %v3082_v54 = vpop.f32.mrf.mxu0 }
0x2016   :  { %v3083_v48 = vadd.f32 %v5606_v41, %v3082_v54 }
0x2018   :  { %v3088_v50 = vsel %vm175_vm4, %v3083_v48, -inf }
0x2019   :  { %3089 = vmax.xlane.f32.xlu0 %v3088_v50 }
0x201c   :  { %4394 = vrot.lane.b32.xlu2 %v5808_v24, %s4828_s16 }
0x201d   :  { %v3085_v28 = vpop.f32.mrf.mxu0 }
0x201e   :  { %v3086_v33 = vadd.f32 %v5615_v35, %v3085_v28 }
0x2020   :  { %v3091_v58 = vsel %vm175_vm4, %v3086_v33, -inf }
0x2021   :  { %3092 = vmax.xlane.f32.xlu1 %v3091_v58 }
0x2024   :  { %4404 = vrot.lane.b32.xlu2 %v5808_v24, %s4833_s21 }
0x206f   :  { %v2994_v51 = vpop.xlane.xlu2 %2993 }
0x2070   :  { %v2998_v52 = vsub.f32 %v2987_v36, %v2994_v51 }
0x2072   :  { %v3000_v53 = vmul.f32 1.442695, %v2998_v52 }
0x2074   :  { %4632 = vpow2.f32 %v3000_v53 }
0x2077   :  { %v2997_v41 = vpop.xlane.xlu2 %2996 }
0x2078   :  { %v2999_v35 = vsub.f32 %v2990_v16, %v2997_v41 }
0x207a   :  { %v5901_v12 = vpop.eup %4632  ;;  %v3002_v26 = vmul.f32 1.442695, %v2999_v35 }
0x207b   :  { %v3004_v56 = vsel %vm175_vm4, %v5901_v12, 0.0 }
0x207c   :  { %3005 = vadd.xlane.f32.xlu0 %v3004_v56  ;;  %v2898_v59 = vpop.xlane.xlu0 %2897 }
0x207d   :  { %v2902_v42 = vsub.f32 %v2891_v43, %v2898_v59 }
0x207f   :  { %v2904_v63 = vmul.f32 1.442695, %v2902_v42  ;;  %v4395_v5 = vpop.permute.xlu2 %4394 }
0x2080   :  { %v4396_v7 = vunpack.i.l.bf16 %v4395_v5  ;;  %v4397_v0 = vunpack.i.h.bf16 %v4395_v5  ;;  %v4454_v5 = vld [vmem:[%s6257_s2 + $0x15] ss:$0 sm:$0xff] }
0x2081   :  { %4634 = vpow2.f32 %v2904_v63 }
0x2082   :  { %2944 = vmatpush.msra.mxu1 %v4396_v7  ;;  %4636 = vpow2.f32 %v3002_v26  ;;  %v2656_v7 = vadd.f32 %v4454_v5, %v5885_v61  ;;  %v4235_v61 = vld [vmem:[%s6259_s4 + $0x90] sm:$0xff] }
0x2084   :  { %2945 = vmatpush.msra.mxu1 %v4397_v0  ;;  %v2901_v55 = vpop.xlane.xlu1 %2900  ;;  %v2659_v0 = vadd.f32 %v2656_v7, %v5851_v4  ;;  %v4234_v4 = vld [vmem:[%s6259_s4 + $0x88] sm:$0xff] }
0x2085   :  { %v2903_v10 = vsub.f32 %v2894_v47, %v2901_v55  ;;  %v2653_v55 = vadd.f32 %v4454_v5, %v5881_v60 }
0x2086   :  { %v2663_v26 = vsel %vm87_vm0, %v2659_v0, 0.0 }
0x2087   :  { %v4635_v9 = vpop.eup %4634  ;;  %v2906_v1 = vmul.f32 1.442695, %v2903_v10  ;;  %v4405_v13 = vpop.permute.xlu2 %4404  ;;  %v2658_v10 = vadd.f32 %v2653_v55, %v5845_v46  ;;  %v4233_v46 = vld [vmem:[%s6259_s4 + $0x80] sm:$0xff] }
0x2088   :  { %v4406_v57 = vunpack.i.l.bf16 %v4405_v13  ;;  %v2908_v14 = vsel %vm175_vm4, %v4635_v9, 0.0  ;;  %v4407_v15 = vunpack.i.h.bf16 %v4405_v13  ;;  %v4637_v21 = vpop.eup %4636 }
0x2089   :  { %4638 = vpow2.f32 %v2906_v1  ;;  %2909 = vadd.xlane.f32.xlu0 %v2908_v14  ;;  %v3007_v18 = vsel %vm175_vm4, %v4637_v21, 0.0  ;;  %v4236_v1 = vld [vmem:[%s6259_s4 + $0x98] sm:$0xff] }
0x208a   :  { %3136 = vmatpush.msrb.mxu1 %v4406_v57  ;;  %3200 = vmatpush.msra.mxu3 %v4236_v1 }
0x208c   :  { %3137 = vmatpush.msrb.mxu1 %v4407_v15  ;;  %v3090_v6 = vpop.xlane.xlu0 %3089  ;;  %3201 = vmatpush.msra.mxu3 %v4235_v61 }
0x208d   :  { %v3094_v23 = vsub.f32 %v3083_v48, %v3090_v6 }
0x208e   :  { %3202 = vmatpush.msra.mxu3 %v4234_v4 }
0x208f   :  { %v4639_v20 = vpop.eup %4638  ;;  %v3096_v25 = vmul.f32 1.442695, %v3094_v23 }
0x2090   :  { %v2911_v2 = vsel %vm175_vm4, %v4639_v20, 0.0  ;;  %3203 = vmatpush.msra.mxu3 %v4233_v46 }
0x2091   :  { %4640 = vpow2.f32 %v3096_v25  ;;  %2912 = vadd.xlane.f32.xlu1 %v2911_v2  ;;  %3008 = vadd.xlane.f32.xlu0 %v3007_v18 }
0x2094   :  { %v3093_v39 = vpop.xlane.xlu1 %3092 }
0x2095   :  { %v3095_v17 = vsub.f32 %v3086_v33, %v3093_v39 }
0x2097   :  { %v4641_v27 = vpop.eup %4640  ;;  %v3098_v29 = vmul.f32 1.442695, %v3095_v17 }
0x2098   :  { %v3100_v30 = vsel %vm175_vm4, %v4641_v27, 0.0 }
0x2099   :  { %4642 = vpow2.f32 %v3098_v29  ;;  %3101 = vadd.xlane.f32.xlu0 %v3100_v30 }
0x209f   :  { %v4643_v34 = vpop.eup %4642 }
0x20a0   :  { %v3103_v36 = vsel %vm175_vm4, %v4643_v34, 0.0 }
0x20a1   :  { %3104 = vadd.xlane.f32.xlu0 %v3103_v36 }
0x20aa   :  { %4399 = vrot.lane.b32.xlu1 %v5808_v24, %s4832_s7 }
0x20ef   :  { %v3006_v37 = vpop.xlane.xlu0 %3005 }
0x20fc   :  { %v2910_v32 = vpop.xlane.xlu0 %2909 }
0x20fd   :  { %4644 = vrcp.f32 %v2910_v32 }
0x2103   :  { %v4645_v16 = vpop.eup %4644 }
0x2104   :  { %v2916_v38 = vmul.f32 %v4645_v16, %v4635_v9  ;;  %v2913_v40 = vpop.xlane.xlu1 %2912  ;;  %v3009_v43 = vpop.xlane.xlu0 %3008  ;;  %v2660_v9 = vsel %vm87_vm0, %v2658_v10, 0.0 }
0x2105   :  { %4646 = vrcp.f32 %v2913_v40 }
0x2106   :  { %4219 = vmatmul.msk.f32.vlgmr.msra.gmra.mxu1 %vm175_vm4, %v2916_v38 }
0x210b   :  { %v4647_v44 = vpop.eup %4646 }
0x210c   :  { %v3102_v45 = vpop.xlane.xlu0 %3101  ;;  %v2917_v47 = vmul.f32 %v4647_v44, %v4639_v20 }
0x210d   :  { %4648 = vrcp.f32 %v3102_v45 }
0x210e   :  { %4220 = vmatmul.msk.f32.gmra.mxu1 %vm175_vm4, %v2917_v47 }
0x2113   :  { %v4649_v11 = vpop.eup %4648 }
0x2114   :  { %v3108_v54 = vmul.f32 %v4649_v11, %v4641_v27  ;;  %v3105_v48 = vpop.xlane.xlu0 %3104 }
0x2115   :  { %4650 = vrcp.f32 %v3105_v48 }
0x2116   :  { %4231 = vmatmul.msk.f32.vlgmr.msrb.gmra.mxu1 %vm175_vm4, %v3108_v54  ;;  %4652 = vrcp.f32 %v3006_v37 }
0x2117   :  { %4654 = vrcp.f32 %v3009_v43 }
0x211b   :  { %v4651_v24 = vpop.eup %4650 }
0x211c   :  { %v4400_v50 = vpop.permute.xlu1 %4399  ;;  %v3109_v28 = vmul.f32 %v4651_v24, %v4643_v34  ;;  %v4653_v33 = vpop.eup %4652 }
0x211d   :  { %v4401_v58 = vunpack.i.l.bf16 %v4400_v50  ;;  %v4402_v51 = vunpack.i.h.bf16 %v4400_v50  ;;  %v3012_v52 = vmul.f32 %v4653_v33, %v5901_v12  ;;  %v4655_v53 = vpop.eup %4654 }
0x211e   :  { %4232 = vmatmul.msk.f32.gmra.mxu1 %vm175_vm4, %v3109_v28  ;;  %v3013_v41 = vmul.f32 %v4655_v53, %v4637_v21 }
0x211f   :  { %3040 = vmatpush.msrb.mxu2 %v4401_v58 }
0x2121   :  { %3041 = vmatpush.msrb.mxu2 %v4402_v51 }
0x2122   :  { %4225 = vmatmul.msk.f32.vlgmr.msrb.gmra.mxu2 %vm175_vm4, %v3012_v52 }
0x212a   :  { %4226 = vmatmul.msk.f32.gmra.mxu2 %vm175_vm4, %v3013_v41  ;;  %v4457_v41 = vld [vmem:[%s6257_s2 + $0x1b] ss:$0 sm:$0xff] }
0x2183   :  { %v2947_v56 = vpop.f32.mrf.mxu1 }
0x2184   :  { %3147 = vrot.lane.b32.xlu2 %v2947_v56, %s4820_s18 }
0x218b   :  { %v2950_v59 = vpop.f32.mrf.mxu1 }
0x218c   :  { %3149 = vrot.lane.b32.xlu2 %v2950_v59, %s4820_s18 }
0x2193   :  { %v3139_v42 = vpop.f32.mrf.mxu1 }
0x2194   :  { %3163 = vrot.lane.b32.xlu0 %v3139_v42, %s4835_s24 }
0x219b   :  { %v3142_v35 = vpop.f32.mrf.mxu1 }
0x219c   :  { %3165 = vrot.lane.b32.xlu2 %v3142_v35, %s4835_s24 }
0x21a5   :  { %v3043_v12 = vpop.f32.mrf.mxu2 }
0x21a6   :  { %3155 = vrot.lane.b32.xlu1 %v3043_v12, %s4834_s22 }
0x21ad   :  { %v3046_v63 = vpop.f32.mrf.mxu2 }
0x21ae   :  { %3157 = vrot.lane.b32.xlu1 %v3046_v63, %s4834_s22 }
0x21be   :  { %2664 = vadd.xlane.f32.xlu0 %v2663_v26 }
0x21d8   :  { %2661 = vadd.xlane.f32.xlu1 %v2660_v9 }
0x21de   :  { %v3148_v60 = vpop.permute.xlu2 %3147 }
0x21df   :  { %v3169_v13 = vsel %vm143_vm3, %v5877_v49, %v3148_v60 }
0x21e6   :  { %v3150_v14 = vpop.permute.xlu2 %3149 }
0x21e7   :  { %v3170_v23 = vsel %vm143_vm3, %v5879_v31, %v3150_v14  ;;  %v4455_v31 = vld [vmem:[%s6257_s2 + $0x1d] ss:$0 sm:$0xff] }
0x21f6   :  { %v3166_v25 = vpop.permute.xlu2 %3165 }
0x2206   :  { %v3164_v15 = vpop.permute.xlu0 %3163 }
0x2218   :  { %v3156_v57 = vpop.permute.xlu1 %3155 }
0x2219   :  { %v3171_v6 = vsel %vm175_vm4, %v3169_v13, %v3156_v57 }
0x221a   :  { %v3173_v21 = vsel %vm549_vm5, %v3171_v6, %v3164_v15 }
0x221b   :  { %4237 = vmatmul.msk.f32.vlgmr.msra.gmra.mxu3 %vm87_vm0, %v3173_v21 }
0x2220   :  { %v3158_v20 = vpop.permute.xlu1 %3157 }
0x2221   :  { %v3172_v2 = vsel %vm175_vm4, %v3170_v23, %v3158_v20  ;;  %v3289_v20 = vld [vmem:[#allocation2 + $0x238] sm:$0xff] }
0x2222   :  { %v3174_v18 = vsel %vm549_vm5, %v3172_v2, %v3166_v25  ;;  %3302 = vmatpush.msra.mxu2 %v3289_v20  ;;  %v3288_v25 = vld [vmem:[#allocation2 + $0x230] sm:$0xff]  ;;  %v3287_v2 = vld [vmem:[#allocation2 + $0x228] sm:$0xff] }
0x2223   :  { %4238 = vmatmul.msk.f32.gmra.mxu3 %vm87_vm0, %v3174_v18  ;;  %v3286_v18 = vld [vmem:[#allocation2 + $0x220] sm:$0xff] }
0x2224   :  { %3303 = vmatpush.msra.mxu2 %v3288_v25 }
0x2226   :  { %3304 = vmatpush.msra.mxu2 %v3287_v2 }
0x2228   :  { %3305 = vmatpush.msra.mxu2 %v3286_v18  ;;  %v4712_v18 = vld [vmem:[%s6257_s2 + $0x30] sm:$0xff] }
0x2231   :  { %v2665_v30 = vpop.xlane.xlu0 %2664 }
0x2232   :  { %v2667_v36 = vmul.f32 %v2665_v30, %v5072_v8  ;;  %v3279_v30 = vld [vmem:[#allocation2 + $0x1e8] sm:$0xff] }
0x2234   :  { %v2669_v16 = vsub.f32 %v2659_v0, %v2667_v36 }
0x2236   :  { %v2671_v44 = vmul.f32 %v2669_v16, %v2669_v16 }
0x2238   :  { %v2675_v11 = vsel %vm87_vm0, %v2671_v44, 0.0 }
0x224b   :  { %v2662_v49 = vpop.xlane.xlu1 %2661 }
0x224c   :  { %v2666_v39 = vmul.f32 %v2662_v49, %v5072_v8  ;;  %v3285_v49 = vld [vmem:[#allocation2 + $0x218] sm:$0xff] }
0x224d   :  { %3306 = vmatpush.msra.mxu2 %v3285_v49 }
0x224e   :  { %v2668_v17 = vsub.f32 %v2658_v10, %v2666_v39  ;;  %v3284_v39 = vld [vmem:[#allocation2 + $0x210] sm:$0xff] }
0x224f   :  { %3307 = vmatpush.msra.mxu2 %v3284_v39 }
0x2250   :  { %v2670_v27 = vmul.f32 %v2668_v17, %v2668_v17 }
0x2252   :  { %v2672_v29 = vsel %vm87_vm0, %v2670_v27, 0.0  ;;  %v3282_v27 = vld [vmem:[#allocation2 + $0x200] sm:$0xff] }
0x2253   :  { %2673 = vadd.xlane.f32.xlu1 %v2672_v29  ;;  %v3281_v29 = vld [vmem:[#allocation2 + $0x1f8] sm:$0xff] }
0x229e   :  { %v3205_v34 = vpop.f32.mrf.mxu3 }
0x229f   :  { %v3206_v37 = vadd.f32 %v4455_v31, %v3205_v34  ;;  %v3278_v34 = vld [vmem:[#allocation2 + $0x1e0] sm:$0xff] }
0x22a1   :  { %v3211_v32 = vadd.f32 %v3206_v37, %v5683_v62 }
0x22a3   :  { %v3213_v38 = vsel %vm87_vm0, %v3211_v32, 0.0 }
0x22a4   :  { %3214 = vadd.xlane.f32.xlu2 %v3213_v38 }
0x22a6   :  { %v3208_v40 = vpop.f32.mrf.mxu3 }
0x22a7   :  { %v3209_v43 = vadd.f32 %v4455_v31, %v3208_v40  ;;  %v3280_v31 = vld [vmem:[#allocation2 + $0x1f0] sm:$0xff] }
0x22a9   :  { %v3212_v45 = vadd.f32 %v3209_v43, %v5691_v3  ;;  %v4456_v3 = vld [vmem:[%s6257_s2 + $0x1a] ss:$0 sm:$0xff] }
0x22ab   :  { %v3216_v47 = vsel %vm87_vm0, %v3212_v45, 0.0 }
0x22ac   :  { %3217 = vadd.xlane.f32.xlu0 %v3216_v47  ;;  %2676 = vadd.xlane.f32.xlu2 %v2675_v11 }
0x22c6   :  { %v2674_v54 = vpop.xlane.xlu1 %2673 }
0x22c7   :  { %v2678_v48 = vmul.f32 %v2674_v54, %v5072_v8 }
0x22c9   :  { %v2680_v24 = vadd.f32 1e-05, %v2678_v48 }
0x22cb   :  { %4656 = vrsqrt.f32 %v2680_v24  ;;  %vm2688_vm14 = vweird.f32 %v2680_v24 }
0x22d1   :  { %v4657_v62 = vpop.eup %4656 }
0x22d2   :  { %v2683_v50 = vmul.f32 %v4657_v62, %v2680_v24  ;;  %vm2689_vm13 = vweird.f32 %v4657_v62 }
0x22d3   :  { %vm2690_vm15 = vmor %vm2688_vm14, %vm2689_vm13 }
0x22d4   :  { %v2684_v28 = vmul.f32 %v4657_v62, %v2683_v50 }
0x22d6   :  { %v2685_v33 = vmul.f32 0.5, %v2684_v28 }
0x22d8   :  { %v2686_v58 = vsub.f32 1.5, %v2685_v33 }
0x22da   :  { %v2687_v51 = vmul.f32 %v4657_v62, %v2686_v58  ;;  %v4459_v58 = vld [vmem:[%s6257_s2 + $0x23] ss:$0 sm:$0xff] }
0x22dc   :  { %v2691_v52 = vsel %vm2690_vm15, %v4657_v62, %v2687_v51  ;;  %v4458_v62 = vld [vmem:[%s6257_s2 + $0x22] ss:$0 sm:$0xff] }
0x22dd   :  { %v2702_v53 = vmul.f32 %v2691_v52, %v2668_v17  ;;  %v3283_v17 = vld [vmem:[#allocation2 + $0x208] sm:$0xff] }
0x22de   :  { %3308 = vmatpush.msra.mxu2 %v3283_v17 }
0x22df   :  { %v2706_v56 = vmul.f32 %v4456_v3, %v2702_v53 }
0x22e0   :  { %3309 = vmatpush.msra.mxu2 %v3282_v27 }
0x22e1   :  { %v2710_v59 = vadd.f32 %v4457_v41, %v2706_v56 }
0x22e2   :  { %3310 = vmatpush.msra.mxu2 %v3281_v29 }
0x22e3   :  { %3267 = vrot.lane.b32.xlu2 %v2710_v59, %s4822_s23 }
0x22e4   :  { %3311 = vmatpush.msra.mxu2 %v3280_v31 }
0x22e6   :  { %3312 = vmatpush.msra.mxu2 %v3279_v30  ;;  %v4713_v30 = vld [vmem:[%s6257_s2 + $0x38] sm:$0xff] }
0x22e8   :  { %3313 = vmatpush.msra.mxu2 %v3278_v34 }
0x2317   :  { %v3215_v42 = vpop.xlane.xlu2 %3214 }
0x2318   :  { %v3219_v35 = vmul.f32 %v3215_v42, %v5072_v8 }
0x231a   :  { %v5976_v12 = vsub.f32 %v3211_v32, %v3219_v35 }
0x231c   :  { %v3223_v63 = vmul.f32 %v5976_v12, %v5976_v12 }
0x231e   :  { %v3225_v5 = vsel %vm87_vm0, %v3223_v63, 0.0 }
0x231f   :  { %v2677_v7 = vpop.xlane.xlu2 %2676  ;;  %v3218_v0 = vpop.xlane.xlu0 %3217  ;;  %3226 = vadd.xlane.f32.xlu1 %v3225_v5 }
0x2320   :  { %v2679_v26 = vmul.f32 %v2677_v7, %v5072_v8  ;;  %v3220_v55 = vmul.f32 %v3218_v0, %v5072_v8 }
0x2322   :  { %v2681_v10 = vadd.f32 1e-05, %v2679_v26  ;;  %v5983_v9 = vsub.f32 %v3212_v45, %v3220_v55 }
0x2324   :  { %4658 = vrsqrt.f32 %v2681_v10  ;;  %v3224_v1 = vmul.f32 %v5983_v9, %v5983_v9  ;;  %vm2698_vm7 = vweird.f32 %v2681_v10 }
0x2326   :  { %v3228_v61 = vsel %vm87_vm0, %v3224_v1, 0.0 }
0x2327   :  { %3229 = vadd.xlane.f32.xlu0 %v3228_v61 }
0x232a   :  { %v4659_v4 = vpop.eup %4658 }
0x232b   :  { %v2693_v46 = vmul.f32 %v4659_v4, %v2681_v10  ;;  %vm2699_vm6 = vweird.f32 %v4659_v4 }
0x232c   :  { %vm2700_vm8 = vmor %vm2698_vm7, %vm2699_vm6 }
0x232d   :  { %v2694_v60 = vmul.f32 %v4659_v4, %v2693_v46 }
0x232f   :  { %v2695_v13 = vmul.f32 0.5, %v2694_v60 }
0x2331   :  { %v2696_v57 = vsub.f32 1.5, %v2695_v13 }
0x2333   :  { %v2697_v14 = vmul.f32 %v4659_v4, %v2696_v57 }
0x2335   :  { %v2701_v15 = vsel %vm2700_vm8, %v4659_v4, %v2697_v14 }
0x2336   :  { %v2703_v6 = vmul.f32 %v2701_v15, %v2669_v16 }
0x2338   :  { %v2707_v21 = vmul.f32 %v4456_v3, %v2703_v6 }
0x233a   :  { %v2711_v23 = vadd.f32 %v4457_v41, %v2707_v21 }
0x233c   :  { %3269 = vrot.lane.b32.xlu1 %v2711_v23, %s4822_s23 }
0x233d   :  { %v3268_v41 = vpop.permute.xlu2 %3267 }
0x2392   :  { %v3227_v36 = vpop.xlane.xlu1 %3226 }
0x2393   :  { %v3231_v37 = vmul.f32 %v3227_v36, %v5072_v8 }
0x2395   :  { %v3233_v32 = vadd.f32 1e-05, %v3231_v37 }
0x2397   :  { %4660 = vrsqrt.f32 %v3233_v32  ;;  %vm3241_vm10 = vweird.f32 %v3233_v32 }
0x239a   :  { %v3230_v16 = vpop.xlane.xlu0 %3229 }
0x239b   :  { %v3232_v38 = vmul.f32 %v3230_v16, %v5072_v8 }
0x239d   :  { %v4661_v40 = vpop.eup %4660  ;;  %v3234_v43 = vadd.f32 1e-05, %v3232_v38 }
0x239e   :  { %v3236_v44 = vmul.f32 %v4661_v40, %v3233_v32  ;;  %vm3242_vm9 = vweird.f32 %v4661_v40 }
0x239f   :  { %4662 = vrsqrt.f32 %v3234_v43  ;;  %vm3243_vm11 = vmor %vm3241_vm10, %vm3242_vm9  ;;  %vm3251_vm13 = vweird.f32 %v3234_v43 }
0x23a0   :  { %v3237_v45 = vmul.f32 %v4661_v40, %v3236_v44 }
0x23a2   :  { %v3238_v47 = vmul.f32 0.5, %v3237_v45 }
0x23a4   :  { %v3239_v11 = vsub.f32 1.5, %v3238_v47 }
0x23a5   :  { %v4663_v54 = vpop.eup %4662 }
0x23a6   :  { %v3240_v48 = vmul.f32 %v4661_v40, %v3239_v11  ;;  %v3246_v24 = vmul.f32 %v4663_v54, %v3234_v43  ;;  %vm3252_vm12 = vweird.f32 %v4663_v54 }
0x23a7   :  { %vm3253_vm14 = vmor %vm3251_vm13, %vm3252_vm12 }
0x23a8   :  { %v3244_v50 = vsel %vm3243_vm11, %v4661_v40, %v3240_v48  ;;  %v3247_v28 = vmul.f32 %v4663_v54, %v3246_v24 }
0x23a9   :  { %v3255_v33 = vmul.f32 %v3244_v50, %v5976_v12 }
0x23aa   :  { %v3248_v51 = vmul.f32 0.5, %v3247_v28 }
0x23ab   :  { %v3259_v3 = vmul.f32 %v4458_v62, %v3255_v33 }
0x23ac   :  { %v3249_v52 = vsub.f32 1.5, %v3248_v51 }
0x23ad   :  { %v5998_v53 = vadd.f32 %v4459_v58, %v3259_v3 }
0x23ae   :  { %v3250_v56 = vmul.f32 %v4663_v54, %v3249_v52  ;;  %v3270_v7 = vpop.permute.xlu1 %3269 }
0x23af   :  { %v3273_v59 = vsel %vm87_vm0, %v5998_v53, %v3268_v41 }
0x23b0   :  { %v3254_v42 = vsel %vm3253_vm14, %v4663_v54, %v3250_v56  ;;  %v3275_v35 = vsel %vm90_vm1, %v3273_v59, %v4925_v19  ;;  %v4460_v19 = vld [vmem:[%s6257_s2 + $0x1e] ss:$0 sm:$0xff] }
0x23b1   :  { %v3256_v12 = vmul.f32 %v3254_v42, %v5983_v9  ;;  %4239 = vmatmul.msk.f32.vlgmr.msra.gmra.mxu2 %vm107_vm2, %v3275_v35 }
0x23b3   :  { %v3260_v63 = vmul.f32 %v4458_v62, %v3256_v12 }
0x23b5   :  { %v6006_v5 = vadd.f32 %v4459_v58, %v3260_v63 }
0x23b7   :  { %v3274_v0 = vsel %vm87_vm0, %v6006_v5, %v3270_v7 }
0x23b8   :  { %v3276_v26 = vsel %vm90_vm1, %v3274_v0, %v4932_v22 }
0x23b9   :  { %4240 = vmatmul.msk.f32.gmra.mxu2 %vm107_vm2, %v3276_v26 }
0x2434   :  { %v3315_v55 = vpop.f32.mrf.mxu2 }
0x2435   :  { %v6016_v10 = vadd.f32 %v4460_v19, %v3315_v55 }
0x2437   :  { %3415 = vrot.lane.b32.xlu1 %v6016_v10, %s4826_s10  ;;  %3419 = vrot.lane.b32.xlu2 %v6016_v10, %s4824_s29 }
0x243c   :  { %v3318_v9 = vpop.f32.mrf.mxu2 }
0x243d   :  { %v6022_v1 = vadd.f32 %v4460_v19, %v3318_v9 }
0x243f   :  { %3323 = vrot.lane.b32.xlu2 %v6016_v10, %s4825_s30  ;;  %3517 = vrot.lane.b32.xlu1 %v6022_v1, %s4827_s15  ;;  %v4408_v28 = vpack.i.bf16 %v6016_v10, %v6022_v1 }
0x2440   :  { %3421 = vrot.lane.b32.xlu0 %v6022_v1, %s4824_s29 }
0x2447   :  { %3613 = vrot.lane.b32.xlu2 %v6022_v1, %s4830_s20  ;;  %3611 = vrot.lane.b32.xlu1 %v6016_v10, %s4830_s20 }
0x2448   :  { %3325 = vrot.lane.b32.xlu0 %v6022_v1, %s4825_s30 }
0x244f   :  { %3511 = vrot.lane.b32.xlu2 %v6016_v10, %s4829_s19  ;;  %3513 = vrot.lane.b32.xlu1 %v6022_v1, %s4829_s19 }
0x2450   :  { %3515 = vrot.lane.b32.xlu0 %v6016_v10, %s4827_s15  ;;  %s4028_s15 = sshll.u32 %s6264_s9, 4  ;;  %s4029_s15 = int_to_ptr.hbm [resolvable:$true] %s4028_s15 }
0x2457   :  { %3609 = vrot.lane.b32.xlu2 %v6022_v1, %s4831_s3 }
0x2458   :  { %3417 = vrot.lane.b32.xlu0 %v6022_v1, %s4826_s10 }
0x2460   :  { %3607 = vrot.lane.b32.xlu0 %v6016_v10, %s4831_s3 }
0x2491   :  { %v3420_v22 = vpop.permute.xlu2 %3419 }
0x2499   :  { %v3324_v4 = vpop.permute.xlu2 %3323 }
0x24a1   :  { %v3614_v13 = vpop.permute.xlu2 %3613 }
0x24a9   :  { %v3416_v61 = vpop.permute.xlu1 %3415  ;;  %v3512_v6 = vpop.permute.xlu2 %3511 }
0x24b1   :  { %v3518_v46 = vpop.permute.xlu1 %3517  ;;  %v3610_v25 = vpop.permute.xlu2 %3609 }
0x24b2   :  { %v3422_v60 = vpop.permute.xlu0 %3421  ;;  %4253 = vmatpush.xpose.msk.msrb.mxu2 %vm143_vm3, %v3518_v46 }
0x24b3   :  { %4247 = vmatpush.xpose.msk.msrb.mxu3 %vm143_vm3, %v3422_v60 }
0x24b7   :  { %4248 = vmatpush.xpose.msk.msrb.mxu3 %vm143_vm3, %v3420_v22 }
0x24b9   :  { %v3612_v57 = vpop.permute.xlu1 %3611 }
0x24ba   :  { %v3326_v14 = vpop.permute.xlu0 %3325  ;;  %4249 = vmatmul.msk.f32.vlgmr.msrb.gmra.mxu3 %vm143_vm3, %v3416_v61 }
0x24bb   :  { %4259 = vmatpush.xpose.msk.msra.mxu3 %vm143_vm3, %v3614_v13  ;;  %4241 = vmatpush.xpose.msk.msrb.mxu0 %vm143_vm3, %v3326_v14 }
0x24bf   :  { %4260 = vmatpush.xpose.msk.msra.mxu3 %vm143_vm3, %v3612_v57  ;;  %4242 = vmatpush.xpose.msk.msrb.mxu0 %vm143_vm3, %v3324_v4 }
0x24c1   :  { %v3514_v23 = vpop.permute.xlu1 %3513 }
0x24c2   :  { %4243 = vmatmul.msk.f32.vlgmr.msrb.gmra.mxu0 %vm143_vm3, %v6016_v10  ;;  %v3516_v15 = vpop.permute.xlu0 %3515 }
0x24c3   :  { %4254 = vmatpush.xpose.msk.msrb.mxu2 %vm143_vm3, %v3516_v15 }
0x24c6   :  { %4255 = vmatmul.msk.f32.vlgmr.msrb.gmra.mxu2 %vm143_vm3, %v3512_v6 }
0x24ca   :  { %4244 = vmatmul.msk.f32.gmra.mxu0 %vm143_vm3, %v6022_v1  ;;  %v3418_v21 = vpop.permute.xlu0 %3417 }
0x24cb   :  { %4250 = vmatmul.msk.f32.gmra.mxu3 %vm143_vm3, %v3418_v21 }
0x24ce   :  { %4256 = vmatmul.msk.f32.gmra.mxu2 %vm143_vm3, %v3514_v23 }
0x24d2   :  { %v3608_v20 = vpop.permute.xlu0 %3607 }
0x24d3   :  { %4261 = vmatmul.msk.f32.vlgmr.msra.gmra.mxu3 %vm143_vm3, %v3608_v20 }
0x24db   :  { %4262 = vmatmul.msk.f32.gmra.mxu3 %vm143_vm3, %v3610_v25 }
0x253d   :  { %v3448_v2 = vpop.f32.mrf.mxu3 }
0x253e   :  { %v3449_v49 = vadd.f32 %v4712_v18, %v3448_v2 }
0x253f   :  { %v3352_v39 = vpop.f32.mrf.mxu0 }
0x2540   :  { %v3353_v17 = vadd.f32 %v4712_v18, %v3352_v39  ;;  %v3454_v27 = vsel %vm175_vm4, %v3449_v49, -inf }
0x2541   :  { %3455 = vmax.xlane.f32.xlu1 %v3454_v27 }
0x2542   :  { %v3358_v29 = vsel %vm175_vm4, %v3353_v17, -inf }
0x2543   :  { %3359 = vmax.xlane.f32.xlu0 %v3358_v29 }
0x2547   :  { %v3355_v31 = vpop.f32.mrf.mxu0 }
0x2548   :  { %v3356_v34 = vadd.f32 %v4713_v30, %v3355_v31 }
0x2549   :  { %v3544_v36 = vpop.f32.mrf.mxu2 }
0x254a   :  { %v3545_v37 = vadd.f32 %v4712_v18, %v3544_v36  ;;  %v3361_v32 = vsel %vm175_vm4, %v3356_v34, -inf }
0x254b   :  { %3362 = vmax.xlane.f32.xlu2 %v3361_v32 }
0x254c   :  { %v3550_v16 = vsel %vm175_vm4, %v3545_v37, -inf }
0x254d   :  { %3551 = vmax.xlane.f32.xlu1 %v3550_v16 }
0x254e   :  { %v3451_v38 = vpop.f32.mrf.mxu3 }
0x254f   :  { %v3452_v40 = vadd.f32 %v4713_v30, %v3451_v38 }
0x2551   :  { %v3457_v43 = vsel %vm175_vm4, %v3452_v40, -inf  ;;  %v3547_v44 = vpop.f32.mrf.mxu2 }
0x2552   :  { %3458 = vmax.xlane.f32.xlu0 %v3457_v43  ;;  %v6077_v45 = vadd.f32 %v4713_v30, %v3547_v44 }
0x2554   :  { %v3553_v48 = vsel %vm175_vm4, %v6077_v45, -inf }
0x2556   :  { %v3640_v47 = vpop.f32.mrf.mxu3 }
0x2557   :  { %v3641_v11 = vadd.f32 %v4712_v18, %v3640_v47 }
0x2559   :  { %v3646_v54 = vsel %vm175_vm4, %v3641_v11, -inf }
0x255a   :  { %3647 = vmax.xlane.f32.xlu2 %v3646_v54  ;;  %3554 = vmax.xlane.f32.xlu0 %v3553_v48 }
0x255e   :  { %v3643_v24 = vpop.f32.mrf.mxu3 }
0x255f   :  { %v6082_v62 = vadd.f32 %v4713_v30, %v3643_v24 }
0x2561   :  { %v3649_v50 = vsel %vm175_vm4, %v6082_v62, -inf }
0x2562   :  { %3650 = vmax.xlane.f32.xlu1 %v3649_v50 }
0x257b   :  { %4409 = vrot.lane.b32.xlu1 %v4408_v28, %s4823_s0 }
0x25b4   :  { %v3456_v33 = vpop.xlane.xlu1 %3455 }
0x25b5   :  { %v3460_v58 = vsub.f32 %v3449_v49, %v3456_v33 }
0x25b6   :  { %v3360_v51 = vpop.xlane.xlu0 %3359 }
0x25b7   :  { %v3462_v3 = vmul.f32 1.442695, %v3460_v58  ;;  %v3364_v52 = vsub.f32 %v3353_v17, %v3360_v51 }
0x25b9   :  { %4664 = vpow2.f32 %v3462_v3  ;;  %v3366_v41 = vmul.f32 1.442695, %v3364_v52 }
0x25bb   :  { %4666 = vpow2.f32 %v3366_v41 }
0x25be   :  { %v3363_v59 = vpop.xlane.xlu2 %3362 }
0x25bf   :  { %v6089_v56 = vpop.eup %4664  ;;  %v3365_v0 = vsub.f32 %v3356_v34, %v3363_v59 }
0x25c0   :  { %v3552_v42 = vpop.xlane.xlu1 %3551  ;;  %v3466_v35 = vsel %vm175_vm4, %v6089_v56, 0.0 }
0x25c1   :  { %v4667_v12 = vpop.eup %4666  ;;  %v3556_v63 = vsub.f32 %v3545_v37, %v3552_v42  ;;  %3467 = vadd.xlane.f32.xlu0 %v3466_v35  ;;  %v3368_v19 = vmul.f32 1.442695, %v3365_v0 }
0x25c2   :  { %v3370_v7 = vsel %vm175_vm4, %v4667_v12, 0.0 }
0x25c3   :  { %v3558_v26 = vmul.f32 1.442695, %v3556_v63  ;;  %3371 = vadd.xlane.f32.xlu2 %v3370_v7 }
0x25c5   :  { %4668 = vpow2.f32 %v3558_v26  ;;  %v3459_v55 = vpop.xlane.xlu0 %3458 }
0x25c6   :  { %4670 = vpow2.f32 %v3368_v19  ;;  %v3461_v9 = vsub.f32 %v3452_v40, %v3459_v55 }
0x25c8   :  { %v3464_v4 = vmul.f32 1.442695, %v3461_v9 }
0x25cb   :  { %v6094_v10 = vpop.eup %4668 }
0x25cc   :  { %v3562_v1 = vsel %vm175_vm4, %v6094_v10, 0.0  ;;  %v4671_v60 = vpop.eup %4670 }
0x25cd   :  { %v3648_v22 = vpop.xlane.xlu2 %3647  ;;  %3563 = vadd.xlane.f32.xlu2 %v3562_v1  ;;  %v3373_v13 = vsel %vm175_vm4, %v4671_v60, 0.0  ;;  %v3555_v23 = vpop.xlane.xlu0 %3554 }
0x25ce   :  { %v3652_v61 = vsub.f32 %v3641_v11, %v3648_v22  ;;  %v3557_v20 = vsub.f32 %v6077_v45, %v3555_v23 }
0x25d0   :  { %v3654_v46 = vmul.f32 1.442695, %v3652_v61  ;;  %v3560_v49 = vmul.f32 1.442695, %v3557_v20 }
0x25d2   :  { %4672 = vpow2.f32 %v3654_v46  ;;  %v4268_v46 = vld [vmem:[%s6259_s4 + $0xb8] sm:$0xff] }
0x25d3   :  { %4674 = vpow2.f32 %v3464_v4  ;;  %3758 = vmatpush.msra.mxu2 %v4268_v46 }
0x25d4   :  { %4676 = vpow2.f32 %v3560_v49 }
0x25d5   :  { %4414 = vrot.lane.b32.xlu0 %v4408_v28, %s4828_s16  ;;  %3374 = vadd.xlane.f32.xlu2 %v3373_v13  ;;  %v3651_v21 = vpop.xlane.xlu1 %3650  ;;  %v4266_v13 = vld [vmem:[%s6259_s4 + $0xa8] sm:$0xff] }
0x25d6   :  { %v3653_v27 = vsub.f32 %v6082_v62, %v3651_v21 }
0x25d8   :  { %v6100_v57 = vpop.eup %4672  ;;  %v3656_v29 = vmul.f32 1.442695, %v3653_v27  ;;  %v4461_v27 = vld [vmem:[%s6257_s2 + $0x1f] ss:$0 sm:$0xff] }
0x25d9   :  { %v4675_v14 = vpop.eup %4674  ;;  %v3658_v15 = vsel %vm175_vm4, %v6100_v57, 0.0 }
0x25da   :  { %3659 = vadd.xlane.f32.xlu1 %v3658_v15  ;;  %v3469_v6 = vsel %vm175_vm4, %v4675_v14, 0.0  ;;  %v4677_v39 = vpop.eup %4676  ;;  %4678 = vpow2.f32 %v3656_v29 }
0x25db   :  { %v3565_v17 = vsel %vm175_vm4, %v4677_v39, 0.0 }
0x25dd   :  { %3470 = vadd.xlane.f32.xlu2 %v3469_v6 }
0x25e0   :  { %v4679_v31 = vpop.eup %4678 }
0x25e1   :  { %v3661_v30 = vsel %vm175_vm4, %v4679_v31, 0.0 }
0x25ed   :  { %v4410_v25 = vpop.permute.xlu1 %4409 }
0x25ee   :  { %v4411_v2 = vunpack.i.l.bf16 %v4410_v25  ;;  %v4412_v18 = vunpack.i.h.bf16 %v4410_v25 }
0x25f0   :  { %3406 = vmatpush.msra.mxu1 %v4411_v2 }
0x25f2   :  { %3407 = vmatpush.msra.mxu1 %v4412_v18 }
0x25f5   :  { %4419 = vrot.lane.b32.xlu2 %v4408_v28, %s4832_s7 }
0x25fd   :  { %4424 = vrot.lane.b32.xlu2 %v4408_v28, %s4833_s21  ;;  %s4015_s21 = sshll.u32 %s6263_s8, 4  ;;  %s4016_s21 = int_to_ptr.hbm [resolvable:$true] %s4015_s21 }
0x25ff   :  { %3566 = vadd.xlane.f32.xlu0 %v3565_v17 }
0x2626   :  { %3662 = vadd.xlane.f32.xlu2 %v3661_v30 }
0x2634   :  { %v3468_v32 = vpop.xlane.xlu0 %3467 }
0x2636   :  { %v3372_v34 = vpop.xlane.xlu2 %3371 }
0x2637   :  { %4680 = vrcp.f32 %v3372_v34 }
0x2638   :  { %4682 = vrcp.f32 %v3468_v32 }
0x263d   :  { %v4681_v36 = vpop.eup %4680 }
0x263e   :  { %v3378_v37 = vmul.f32 %v4681_v36, %v4667_v12  ;;  %v4683_v40 = vpop.eup %4682 }
0x263f   :  { %v3474_v47 = vmul.f32 %v4683_v40, %v6089_v56 }
0x2640   :  { %v3564_v16 = vpop.xlane.xlu2 %3563  ;;  %4245 = vmatmul.msk.f32.vlgmr.msra.gmra.mxu1 %vm175_vm4, %v3378_v37 }
0x2647   :  { %v4415_v38 = vpop.permute.xlu0 %4414 }
0x2648   :  { %v4416_v43 = vunpack.i.l.bf16 %v4415_v38  ;;  %v3375_v44 = vpop.xlane.xlu2 %3374  ;;  %v4417_v45 = vunpack.i.h.bf16 %v4415_v38 }
0x2649   :  { %4684 = vrcp.f32 %v3375_v44 }
0x264a   :  { %3502 = vmatpush.msra.mxu0 %v4416_v43 }
0x264c   :  { %3503 = vmatpush.msra.mxu0 %v4417_v45 }
0x264d   :  { %4251 = vmatmul.msk.f32.vlgmr.msra.gmra.mxu0 %vm175_vm4, %v3474_v47  ;;  %v3660_v62 = vpop.xlane.xlu1 %3659 }
0x264f   :  { %v4685_v11 = vpop.eup %4684 }
0x2650   :  { %v3471_v54 = vpop.xlane.xlu2 %3470  ;;  %v3379_v48 = vmul.f32 %v4685_v11, %v4671_v60  ;;  %v4267_v60 = vld [vmem:[%s6259_s4 + $0xb0] sm:$0xff] }
0x2651   :  { %4686 = vrcp.f32 %v3471_v54  ;;  %3759 = vmatpush.msra.mxu2 %v4267_v60 }
0x2652   :  { %4246 = vmatmul.msk.f32.gmra.mxu1 %vm175_vm4, %v3379_v48  ;;  %4688 = vrcp.f32 %v3564_v16 }
0x2653   :  { %4690 = vrcp.f32 %v3660_v62  ;;  %3760 = vmatpush.msra.mxu2 %v4266_v13  ;;  %v4272_v62 = vld [vmem:[%s6260_s5 + $0x68] sm:$0xff] }
0x2657   :  { %v4687_v24 = vpop.eup %4686 }
0x2658   :  { %v4420_v50 = vpop.permute.xlu2 %4419  ;;  %v3475_v28 = vmul.f32 %v4687_v24, %v4675_v14  ;;  %v4689_v33 = vpop.eup %4688  ;;  %v4273_v24 = vld [vmem:[%s6260_s5 + $0x70] sm:$0xff] }
0x2659   :  { %v4421_v58 = vunpack.i.l.bf16 %v4420_v50  ;;  %v4422_v51 = vunpack.i.h.bf16 %v4420_v50  ;;  %v3570_v3 = vmul.f32 %v4689_v33, %v6094_v10  ;;  %v4691_v41 = vpop.eup %4690  ;;  %v4271_v50 = vld [vmem:[%s6260_s5 + $0x60] sm:$0xff] }
0x265a   :  { %4252 = vmatmul.msk.f32.gmra.mxu0 %vm175_vm4, %v3475_v28  ;;  %v3666_v42 = vmul.f32 %v4691_v41, %v6100_v57  ;;  %v4265_v57 = vld [vmem:[%s6259_s4 + $0xa0] sm:$0xff] }
0x265b   :  { %3598 = vmatpush.msrb.mxu1 %v4421_v58  ;;  %3761 = vmatpush.msra.mxu2 %v4265_v57 }
0x265d   :  { %3599 = vmatpush.msrb.mxu1 %v4422_v51 }
0x265e   :  { %4257 = vmatmul.msk.f32.vlgmr.msrb.gmra.mxu1 %vm175_vm4, %v3570_v3 }
0x2660   :  { %v4425_v52 = vpop.permute.xlu2 %4424 }
0x2661   :  { %v4426_v56 = vunpack.i.l.bf16 %v4425_v52  ;;  %v4427_v59 = vunpack.i.h.bf16 %v4425_v52 }
0x2663   :  { %3694 = vmatpush.msrb.mxu0 %v4426_v56 }
0x2665   :  { %3695 = vmatpush.msrb.mxu0 %v4427_v59 }
0x2666   :  { %4263 = vmatmul.msk.f32.vlgmr.msrb.gmra.mxu0 %vm175_vm4, %v3666_v42  ;;  %v4462_v42 = vld [vmem:[%s6257_s2 + $0x24] ss:$0 sm:$0xff] }
0x2672   :  { %v3567_v35 = vpop.xlane.xlu0 %3566 }
0x2673   :  { %4692 = vrcp.f32 %v3567_v35 }
0x2679   :  { %v4693_v12 = vpop.eup %4692 }
0x267a   :  { %v3571_v63 = vmul.f32 %v4693_v12, %v4677_v39  ;;  %v4463_v12 = vld [vmem:[%s6257_s2 + $0x25] ss:$0 sm:$0xff] }
0x267c   :  { %4258 = vmatmul.msk.f32.gmra.mxu1 %vm175_vm4, %v3571_v63 }
0x2699   :  { %v3663_v7 = vpop.xlane.xlu2 %3662 }
0x269a   :  { %4694 = vrcp.f32 %v3663_v7 }
0x26a0   :  { %v4695_v0 = vpop.eup %4694 }
0x26a1   :  { %v3667_v26 = vmul.f32 %v4695_v0, %v4679_v31 }
0x26a3   :  { %4264 = vmatmul.msk.f32.gmra.mxu0 %vm175_vm4, %v3667_v26  ;;  %v4284_v26 = vld [vmem:[%s6261_s6 + $0xf8] sm:$0xff] }
0x26a4   :  { %3886 = vmatpush.msrb.mxu3 %v4284_v26 }
0x26bd   :  { %v3409_v55 = vpop.f32.mrf.mxu1 }
0x26ca   :  { %v3505_v19 = vpop.f32.mrf.mxu0 }
0x26cb   :  { %3705 = vrot.lane.b32.xlu1 %v3505_v19, %s4820_s18  ;;  %v4283_v19 = vld [vmem:[%s6261_s6 + $0xf0] sm:$0xff] }
0x26cc   :  { %3887 = vmatpush.msrb.mxu3 %v4283_v19 }
0x26cf   :  { %v3412_v10 = vpop.f32.mrf.mxu1 }
0x26d7   :  { %v3508_v9 = vpop.f32.mrf.mxu0 }
0x26d8   :  { %3707 = vrot.lane.b32.xlu1 %v3508_v9, %s4820_s18 }
0x26db   :  { %v3601_v1 = vpop.f32.mrf.mxu1 }
0x26dc   :  { %3713 = vrot.lane.b32.xlu0 %v3601_v1, %s4834_s22  ;;  %v4281_v1 = vld [vmem:[%s6261_s6 + $0xe0] sm:$0xff] }
0x26e3   :  { %v3697_v22 = vpop.f32.mrf.mxu0 }
0x26e4   :  { %3721 = vrot.lane.b32.xlu0 %v3697_v22, %s4835_s24 }
0x26f9   :  { %v3604_v61 = vpop.f32.mrf.mxu1 }
0x26fa   :  { %3715 = vrot.lane.b32.xlu0 %v3604_v61, %s4834_s22  ;;  %v4280_v61 = vld [vmem:[%s6261_s6 + $0xd8] sm:$0xff] }
0x2720   :  { %v3700_v4 = vpop.f32.mrf.mxu0 }
0x2721   :  { %3723 = vrot.lane.b32.xlu1 %v3700_v4, %s4835_s24 }
0x273d   :  { %v3706_v15 = vpop.permute.xlu1 %3705 }
0x273e   :  { %v3727_v6 = vsel %vm143_vm3, %v3409_v55, %v3706_v15  ;;  %v4282_v55 = vld [vmem:[%s6261_s6 + $0xe8] sm:$0xff] }
0x273f   :  { %3888 = vmatpush.msrb.mxu3 %v4282_v55 }
0x2741   :  { %3889 = vmatpush.msrb.mxu3 %v4281_v1 }
0x2743   :  { %3890 = vmatpush.msrb.mxu3 %v4280_v61 }
0x274a   :  { %v3708_v25 = vpop.permute.xlu1 %3707 }
0x274b   :  { %v3728_v18 = vsel %vm143_vm3, %v3412_v10, %v3708_v25  ;;  %v4278_v25 = vld [vmem:[%s6261_s6 + $0xc8] sm:$0xff] }
0x274e   :  { %v3714_v14 = vpop.permute.xlu0 %3713 }
0x274f   :  { %v3729_v21 = vsel %vm175_vm4, %v3727_v6, %v3714_v14 }
0x2756   :  { %v3722_v23 = vpop.permute.xlu0 %3721 }
0x2757   :  { %v3731_v20 = vsel %vm549_vm5, %v3729_v21, %v3722_v23 }
0x2758   :  { %4269 = vmatmul.msk.f32.vlgmr.msra.gmra.mxu2 %vm87_vm0, %v3731_v20  ;;  %v4279_v20 = vld [vmem:[%s6261_s6 + $0xd0] sm:$0xff] }
0x2759   :  { %3891 = vmatpush.msrb.mxu3 %v4279_v20 }
0x275b   :  { %3892 = vmatpush.msrb.mxu3 %v4278_v25 }
0x276c   :  { %v3716_v2 = vpop.permute.xlu0 %3715 }
0x276d   :  { %v3730_v49 = vsel %vm175_vm4, %v3728_v18, %v3716_v2  ;;  %v4277_v2 = vld [vmem:[%s6261_s6 + $0xc0] sm:$0xff] }
0x276e   :  { %3893 = vmatpush.msrb.mxu3 %v4277_v2  ;;  %v4464_v18 = vld [vmem:[%s6257_s2 + $0x20] ss:$0 sm:$0xff] }
0x2793   :  { %v3724_v39 = vpop.permute.xlu1 %3723 }
0x2794   :  { %v3732_v17 = vsel %vm549_vm5, %v3730_v49, %v3724_v39 }
0x2795   :  { %4270 = vmatmul.msk.f32.gmra.mxu2 %vm87_vm0, %v3732_v17 }
0x27db   :  { %v3763_v29 = vpop.f32.mrf.mxu2 }
0x27dc   :  { %v3764_v31 = vadd.f32 %v4461_v27, %v3763_v29 }
0x27de   :  { %v3769_v30 = vadd.f32 %v3764_v31, %v5998_v53 }
0x27e0   :  { %v3771_v34 = vsel %vm87_vm0, %v3769_v30, 0.0 }
0x27e1   :  { %3772 = vadd.xlane.f32.xlu2 %v3771_v34 }
0x2818   :  { %v3766_v36 = vpop.f32.mrf.mxu2 }
0x2819   :  { %v3767_v37 = vadd.f32 %v4461_v27, %v3766_v36 }
0x281b   :  { %v3770_v32 = vadd.f32 %v3767_v37, %v6006_v5  ;;  %v4274_v5 = vld [vmem:[%s6260_s5 + $0x78] sm:$0xff]  ;;  %s4837_s5 = smov [#allocation8]  }
0x281c   :  { %3848 = vmatpush.msra.mxu1 %v4274_v5  ;;  %s4026_s29 = sshll.u32 %s4837_s5, 4  ;;  %s4027_s29 = int_to_ptr.vmem [resolvable:$true] %s4026_s29 }
0x281d   :  { %v3774_v16 = vsel %vm87_vm0, %v3770_v32, 0.0  ;;  %4034 = dma.vmem_to_hbm [thread:$0]  %s4027_s29, 256, %s4029_s15, [#allocation9], %s4819_s17, %s4819_s17, %s4820_s18  }
0x281e   :  { %3775 = vadd.xlane.f32.xlu0 %v3774_v16  ;;  %3849 = vmatpush.msra.mxu1 %v4273_v24 }
0x2820   :  { %3850 = vmatpush.msra.mxu1 %v4272_v62 }
0x2822   :  { %3851 = vmatpush.msra.mxu1 %v4271_v50 }
0x2854   :  { %v3773_v38 = vpop.xlane.xlu2 %3772 }
0x2855   :  { %v3777_v40 = vmul.f32 %v3773_v38, %v5072_v8 }
0x2857   :  { %v3779_v43 = vsub.f32 %v3769_v30, %v3777_v40  ;;  %v4465_v30 = vld [vmem:[%s6257_s2 + $0x21] ss:$0 sm:$0xff] }
0x2859   :  { %v3781_v44 = vmul.f32 %v3779_v43, %v3779_v43 }
0x285b   :  { %v3783_v45 = vsel %vm87_vm0, %v3781_v44, 0.0 }
0x285c   :  { %3784 = vadd.xlane.f32.xlu1 %v3783_v45 }
0x2891   :  { %v3776_v47 = vpop.xlane.xlu0 %3775 }
0x2892   :  { %v3778_v53 = vmul.f32 %v3776_v47, %v5072_v8 }
0x2894   :  { %v3780_v11 = vsub.f32 %v3770_v32, %v3778_v53 }
0x2896   :  { %v3782_v54 = vmul.f32 %v3780_v11, %v3780_v11 }
0x2898   :  { %v3786_v48 = vsel %vm87_vm0, %v3782_v54, 0.0 }
0x2899   :  { %3787 = vadd.xlane.f32.xlu2 %v3786_v48 }
0x28cf   :  { %v3785_v28 = vpop.xlane.xlu1 %3784 }
0x28d0   :  { %v3789_v33 = vmul.f32 %v3785_v28, %v5072_v8 }
0x28d2   :  { %v3791_v58 = vadd.f32 1e-05, %v3789_v33 }
0x28d4   :  { %4696 = vrsqrt.f32 %v3791_v58  ;;  %vm3799_vm3 = vweird.f32 %v3791_v58 }
0x28da   :  { %v4697_v51 = vpop.eup %4696 }
0x28db   :  { %v3794_v3 = vmul.f32 %v4697_v51, %v3791_v58  ;;  %vm3800_vm2 = vweird.f32 %v4697_v51 }
0x28dc   :  { %vm3801_vm4 = vmor %vm3799_vm3, %vm3800_vm2 }
0x28dd   :  { %v3795_v52 = vmul.f32 %v4697_v51, %v3794_v3 }
0x28df   :  { %v3796_v41 = vmul.f32 0.5, %v3795_v52 }
0x28e1   :  { %v3797_v56 = vsub.f32 1.5, %v3796_v41 }
0x28e3   :  { %v3798_v59 = vmul.f32 %v4697_v51, %v3797_v56 }
0x28e5   :  { %v3802_v35 = vsel %vm3801_vm4, %v4697_v51, %v3798_v59  ;;  %v4466_v59 = vld [vmem:[%s6257_s2 + $0x26] ss:$0 sm:$0xff] }
0x28e6   :  { %v3813_v63 = vmul.f32 %v3802_v35, %v3779_v43 }
0x28e8   :  { %v3817_v7 = vmul.f32 %v4462_v42, %v3813_v63 }
0x28ea   :  { %v3821_v0 = vadd.f32 %v4463_v12, %v3817_v7 }
0x28ec   :  { %4275 = vmatmul.msk.f32.vlgmr.msra.gmra.mxu1 %vm87_vm0, %v3821_v0 }
0x290c   :  { %v3788_v10 = vpop.xlane.xlu2 %3787 }
0x290d   :  { %v3790_v9 = vmul.f32 %v3788_v10, %v5072_v8 }
0x290f   :  { %v3792_v22 = vadd.f32 1e-05, %v3790_v9 }
0x2911   :  { %4698 = vrsqrt.f32 %v3792_v22  ;;  %vm3809_vm15 = vweird.f32 %v3792_v22 }
0x2917   :  { %v4699_v4 = vpop.eup %4698 }
0x2918   :  { %v3804_v46 = vmul.f32 %v4699_v4, %v3792_v22  ;;  %vm3810_vm5 = vweird.f32 %v4699_v4 }
0x2919   :  { %vm3811_vm6 = vmor %vm3809_vm15, %vm3810_vm5 }
0x291a   :  { %v3805_v60 = vmul.f32 %v4699_v4, %v3804_v46 }
0x291c   :  { %v3806_v13 = vmul.f32 0.5, %v3805_v60 }
0x291e   :  { %v3807_v57 = vsub.f32 1.5, %v3806_v13 }
0x2920   :  { %v3808_v14 = vmul.f32 %v4699_v4, %v3807_v57 }
0x2922   :  { %v3812_v15 = vsel %vm3811_vm6, %v4699_v4, %v3808_v14 }
0x2923   :  { %v3814_v6 = vmul.f32 %v3812_v15, %v3780_v11 }
0x2925   :  { %v3818_v21 = vmul.f32 %v4462_v42, %v3814_v6 }
0x2927   :  { %v3822_v23 = vadd.f32 %v4463_v12, %v3818_v21  ;;  %v4467_v12 = vld [vmem:[%s6257_s2 + $0x27] ss:$0 sm:$0xff] }
0x2929   :  { %4276 = vmatmul.msk.f32.gmra.mxu1 %vm87_vm0, %v3822_v23 }
0x2969   :  { %v3853_v49 = vpop.f32.mrf.mxu1 }
0x296a   :  { %v3854_v39 = vadd.f32 %v4464_v18, %v3853_v49 }
0x296c   :  { %v3859_v17 = vmax.f32 %v3854_v39, 0.0 }
0x296e   :  { %4285 = vmatmul.msk.f32.vlgmr.msrb.gmra.mxu3 %vm90_vm1, %v3859_v17 }
0x29a6   :  { %v3856_v27 = vpop.f32.mrf.mxu1 }
0x29a7   :  { %v3857_v29 = vadd.f32 %v4464_v18, %v3856_v27 }
0x29a9   :  { %v3860_v31 = vmax.f32 %v3857_v29, 0.0 }
0x29ab   :  { %4286 = vmatmul.msk.f32.gmra.mxu3 %vm90_vm1, %v3860_v31 }
0x29f1   :  { %v3895_v34 = vpop.f32.mrf.mxu3 }
0x29f2   :  { %v3896_v36 = vadd.f32 %v4465_v30, %v3895_v34 }
0x29f4   :  { %v3901_v37 = vadd.f32 %v3896_v36, %v3821_v0 }
0x29f6   :  { %v3903_v32 = vsel %vm87_vm0, %v3901_v37, 0.0 }
0x29f7   :  { %3904 = vadd.xlane.f32.xlu2 %v3903_v32 }
0x2a2e   :  { %v3898_v16 = vpop.f32.mrf.mxu3 }
0x2a2f   :  { %v3899_v38 = vadd.f32 %v4465_v30, %v3898_v16  ;;  %v4468_v16 = vld [vmem:[%s6257_s2 + $0x28] ss:$0 sm:$0xff] }
0x2a31   :  { %v3902_v40 = vadd.f32 %v3899_v38, %v3822_v23 }
0x2a33   :  { %v3906_v43 = vsel %vm87_vm0, %v3902_v40, 0.0 }
0x2a34   :  { %3907 = vadd.xlane.f32.xlu2 %v3906_v43  ;;  %v4469_v43 = vld [vmem:[%s6257_s2 + $0x29] ss:$0 sm:$0xff]  ;;  %s4838_s2 = smov [#allocation7]  }
0x2a35   :  { %s4013_s20 = sshll.u32 %s4838_s2, 4  ;;  %s4014_s20 = int_to_ptr.vmem [resolvable:$true] %s4013_s20 }
0x2a6a   :  { %v3905_v44 = vpop.xlane.xlu2 %3904 }
0x2a6b   :  { %v3909_v45 = vmul.f32 %v3905_v44, %v5072_v8 }
0x2a6d   :  { %v3911_v47 = vsub.f32 %v3901_v37, %v3909_v45 }
0x2a6f   :  { %v3913_v53 = vmul.f32 %v3911_v47, %v3911_v47 }
0x2a71   :  { %v3915_v11 = vsel %vm87_vm0, %v3913_v53, 0.0 }
0x2a72   :  { %3916 = vadd.xlane.f32.xlu2 %v3915_v11 }
0x2aa7   :  { %v3908_v54 = vpop.xlane.xlu2 %3907 }
0x2aa8   :  { %v3910_v48 = vmul.f32 %v3908_v54, %v5072_v8 }
0x2aaa   :  { %v3912_v5 = vsub.f32 %v3902_v40, %v3910_v48 }
0x2aac   :  { %v3914_v24 = vmul.f32 %v3912_v5, %v3912_v5 }
0x2aae   :  { %v3918_v62 = vsel %vm87_vm0, %v3914_v24, 0.0 }
0x2aaf   :  { %3919 = vadd.xlane.f32.xlu2 %v3918_v62 }
0x2ae5   :  { %v3917_v50 = vpop.xlane.xlu2 %3916 }
0x2ae6   :  { %v3921_v28 = vmul.f32 %v3917_v50, %v5072_v8 }
0x2ae8   :  { %v3923_v33 = vadd.f32 1e-05, %v3921_v28 }
0x2aea   :  { %4700 = vrsqrt.f32 %v3923_v33  ;;  %vm3931_vm7 = vweird.f32 %v3923_v33 }
0x2af0   :  { %v4701_v58 = vpop.eup %4700 }
0x2af1   :  { %v3926_v51 = vmul.f32 %v4701_v58, %v3923_v33  ;;  %vm3932_vm1 = vweird.f32 %v4701_v58 }
0x2af2   :  { %vm3933_vm8 = vmor %vm3931_vm7, %vm3932_vm1 }
0x2af3   :  { %v3927_v3 = vmul.f32 %v4701_v58, %v3926_v51 }
0x2af5   :  { %v3928_v52 = vmul.f32 0.5, %v3927_v3 }
0x2af7   :  { %v3929_v41 = vsub.f32 1.5, %v3928_v52 }
0x2af9   :  { %v3930_v56 = vmul.f32 %v4701_v58, %v3929_v41 }
0x2afb   :  { %v3934_v42 = vsel %vm3933_vm8, %v4701_v58, %v3930_v56 }
0x2afc   :  { %v3945_v35 = vmul.f32 %v3934_v42, %v3911_v47 }
0x2afe   :  { %v3949_v63 = vmul.f32 %v4466_v59, %v3945_v35 }
0x2b00   :  { %v3953_v7 = vadd.f32 %v4467_v12, %v3949_v63 }
0x2b02   :  { %v3955_v0 = vsel %vm87_vm0, %v3953_v7, 0.0 }
0x2b03   :  { %3956 = vadd.xlane.f32.xlu0 %v3955_v0 }
0x2b22   :  { %v3920_v26 = vpop.xlane.xlu2 %3919 }
0x2b23   :  { %v3922_v19 = vmul.f32 %v3920_v26, %v5072_v8 }
0x2b25   :  { %v3924_v55 = vadd.f32 1e-05, %v3922_v19 }
0x2b27   :  { %4702 = vrsqrt.f32 %v3924_v55  ;;  %vm3941_vm10 = vweird.f32 %v3924_v55 }
0x2b2d   :  { %v4703_v10 = vpop.eup %4702 }
0x2b2e   :  { %v3936_v9 = vmul.f32 %v4703_v10, %v3924_v55  ;;  %vm3942_vm9 = vweird.f32 %v4703_v10 }
0x2b2f   :  { %vm3943_vm11 = vmor %vm3941_vm10, %vm3942_vm9 }
0x2b30   :  { %v3937_v1 = vmul.f32 %v4703_v10, %v3936_v9 }
0x2b32   :  { %v3938_v22 = vmul.f32 0.5, %v3937_v1 }
0x2b34   :  { %v3939_v61 = vsub.f32 1.5, %v3938_v22 }
0x2b36   :  { %v3940_v4 = vmul.f32 %v4703_v10, %v3939_v61 }
0x2b38   :  { %v3944_v46 = vsel %vm3943_vm11, %v4703_v10, %v3940_v4 }
0x2b39   :  { %v3946_v60 = vmul.f32 %v3944_v46, %v3912_v5 }
0x2b3b   :  { %v3950_v13 = vmul.f32 %v4466_v59, %v3946_v60 }
0x2b3d   :  { %v3954_v57 = vadd.f32 %v4467_v12, %v3950_v13 }
0x2b3f   :  { %v3958_v14 = vsel %vm87_vm0, %v3954_v57, 0.0 }
0x2b40   :  { %3959 = vadd.xlane.f32.xlu2 %v3958_v14 }
0x2b76   :  { %v3957_v15 = vpop.xlane.xlu0 %3956 }
0x2b77   :  { %v3961_v6 = vmul.f32 %v3957_v15, %v5072_v8 }
0x2b79   :  { %v3963_v21 = vsub.f32 %v3953_v7, %v3961_v6 }
0x2b7b   :  { %v3965_v23 = vmul.f32 %v3963_v21, %v3963_v21 }
0x2b7d   :  { %v3967_v20 = vsel %vm87_vm0, %v3965_v23, 0.0 }
0x2b7e   :  { %3968 = vadd.xlane.f32.xlu1 %v3967_v20 }
0x2bb3   :  { %v3960_v25 = vpop.xlane.xlu2 %3959 }
0x2bb4   :  { %v3962_v2 = vmul.f32 %v3960_v25, %v5072_v8 }
0x2bb6   :  { %v3964_v18 = vsub.f32 %v3954_v57, %v3962_v2 }
0x2bb8   :  { %v3966_v49 = vmul.f32 %v3964_v18, %v3964_v18 }
0x2bba   :  { %v3970_v39 = vsel %vm87_vm0, %v3966_v49, 0.0 }
0x2bbb   :  { %3971 = vadd.xlane.f32.xlu0 %v3970_v39 }
0x2bf1   :  { %v3969_v17 = vpop.xlane.xlu1 %3968 }
0x2bf2   :  { %v3973_v27 = vmul.f32 %v3969_v17, %v5072_v8 }
0x2bf4   :  { %v3975_v29 = vadd.f32 1e-05, %v3973_v27 }
0x2bf6   :  { %4704 = vrsqrt.f32 %v3975_v29  ;;  %vm3983_vm13 = vweird.f32 %v3975_v29 }
0x2bfc   :  { %v4705_v31 = vpop.eup %4704 }
0x2bfd   :  { %v3978_v30 = vmul.f32 %v4705_v31, %v3975_v29  ;;  %vm3984_vm12 = vweird.f32 %v4705_v31 }
0x2bfe   :  { %vm3985_vm14 = vmor %vm3983_vm13, %vm3984_vm12 }
0x2bff   :  { %v3979_v34 = vmul.f32 %v4705_v31, %v3978_v30 }
0x2c01   :  { %v3980_v36 = vmul.f32 0.5, %v3979_v34 }
0x2c03   :  { %v3981_v37 = vsub.f32 1.5, %v3980_v36 }
0x2c05   :  { %v3982_v32 = vmul.f32 %v4705_v31, %v3981_v37 }
0x2c07   :  { %v3986_v38 = vsel %vm3985_vm14, %v4705_v31, %v3982_v32 }
0x2c08   :  { %v3997_v40 = vmul.f32 %v3986_v38, %v3963_v21 }
0x2c0a   :  { %v4001_v44 = vmul.f32 %v4468_v16, %v3997_v40 }
0x2c0c   :  { %v4005_v45 = vadd.f32 %v4469_v43, %v4001_v44 }
0x2c0e   :  { %4007 = vst.msk [vmem:[#allocation7] sm:$0xff] %vm87_vm0, %v4005_v45 }
0x2c2e   :  { %v3972_v47 = vpop.xlane.xlu0 %3971 }
0x2c2f   :  { %v3974_v53 = vmul.f32 %v3972_v47, %v5072_v8 }
0x2c31   :  { %v3976_v11 = vadd.f32 1e-05, %v3974_v53 }
0x2c33   :  { %4706 = vrsqrt.f32 %v3976_v11  ;;  %vm3993_vm3 = vweird.f32 %v3976_v11 }
0x2c39   :  { %v4707_v54 = vpop.eup %4706 }
0x2c3a   :  { %v3988_v48 = vmul.f32 %v4707_v54, %v3976_v11  ;;  %vm3994_vm2 = vweird.f32 %v4707_v54 }
0x2c3b   :  { %vm3995_vm4 = vmor %vm3993_vm3, %vm3994_vm2 }
0x2c3c   :  { %v3989_v5 = vmul.f32 %v4707_v54, %v3988_v48 }
0x2c3e   :  { %v3990_v24 = vmul.f32 0.5, %v3989_v5 }
0x2c40   :  { %v3991_v62 = vsub.f32 1.5, %v3990_v24 }
0x2c42   :  { %v3992_v50 = vmul.f32 %v4707_v54, %v3991_v62 }
0x2c44   :  { %v3996_v28 = vsel %vm3995_vm4, %v4707_v54, %v3992_v50 }
0x2c45   :  { %v3998_v33 = vmul.f32 %v3996_v28, %v3964_v18 }
0x2c47   :  { %v4002_v8 = vmul.f32 %v4468_v16, %v3998_v33 }
0x2c49   :  { %v4006_v58 = vadd.f32 %v4469_v43, %v4002_v8 }
0x2c4b   :  { %4008 = vst.msk [vmem:[#allocation7 + $0x8] sm:$0xff] %vm87_vm0, %v4006_v58 }
0x2c4c   :  { %4021 = dma.vmem_to_hbm [thread:$0]  %s4014_s20, 256, %s4016_s21, [#allocation4], %s4819_s17, %s4819_s17, %s4820_s18  }
0x2c4d   :  { %4814 = dma.done.wait [#allocation4], 256  }
0x2c4e   :  { %4815 = vsyncadd [#allocation4], 4294967040 }
0x2c4f   :  { %4816 = dma.done.wait [#allocation9], 256  }
0x2c50   :  { %4817 = vsyncadd [#allocation9], 4294967040 }
0x2c51   :  { %4043 = vsyncpa [#allocation3], 1 }
0x2c52   :  { %4044 = vsyncpa [#allocation6], 1 }
0x2c53   :  { %4045 = vsyncpa [#allocation4], 1 }
0x2c54   :  { %4046 = vsyncpa [#allocation9], 1 }

</bundles_post_ra>
